<compile_context>
chip_gen: v7x
topology: tpu7x:2x2x1
jax: 0.10.0
libtpu: 0.0.40
codegen_flags: <defaults>
</compile_context>

<pallas_src>
import functools

import jax
import jax.numpy as jnp
import numpy as np
from jax.experimental import pallas as pl
from jax.experimental.pallas import tpu as pltpu

# Explicit scoped-VMEM limit: v5e's default is only 16 MiB; 32 MiB is safe on
# every generation (v5e/v6e have 128 MiB physical, v7x has 64 MiB).
_VMEM_LIMIT = 32 * 1024 * 1024


def _round_up(x, m):
    return (x + m - 1) // m * m


def _compiler_params():
    return pltpu.CompilerParams(
        dimension_semantics=("parallel",),
        vmem_limit_bytes=_VMEM_LIMIT,
    )


# ---------------------------------------------------------------------------
# Pallas kernel 1: fused GEMM + bias + activation (one call per conv layer)
#   A[M, K] @ W[K, N] + b[N], bf16 MXU inputs, f32 accumulate, relu/tanh.
# ---------------------------------------------------------------------------
def _gemm_bias_act_kernel(a_ref, w_ref, b_ref, o_ref, *, act):
    acc = jnp.dot(a_ref[...], w_ref[...], preferred_element_type=jnp.float32)
    acc = acc + b_ref[...]                       # bias broadcast over rows, f32
    if act == "relu":
        acc = jnp.maximum(acc, 0.0)
    elif act == "tanh":
        acc = jnp.tanh(acc)
    o_ref[...] = acc.astype(o_ref.dtype)


def matmul_bias_act(a, w, brow, act, out_dtype=jnp.bfloat16, tm=512):
    """a:[M,K] @ w:[Kp,N] + brow:[1,N] with fused activation, tiled over M.

    `w` (bf16) and `brow` (f32) are GEMM-ready (prepared once); `w` may carry
    K padding (Kp >= K), in which case `a` gets zero-padded columns here.
    """
    M, K = a.shape
    Kp, N = w.shape
    a = a.astype(jnp.bfloat16)

    # Tile over M; K/N blocks span the full extent (W/bias VMEM-resident).
    if M >= tm:
        TM = tm
        Mp = _round_up(M, TM)
    else:
        Mp = _round_up(M, 16)
        TM = Mp

    if Mp != M or Kp != K:
        a = jnp.pad(a, ((0, Mp - M), (0, Kp - K)))

    out = pl.pallas_call(
        functools.partial(_gemm_bias_act_kernel, act=act),
        out_shape=jax.ShapeDtypeStruct((Mp, N), out_dtype),
        grid=(Mp // TM,),
        in_specs=[
            pl.BlockSpec((TM, Kp), lambda i: (i, 0)),   # A: streamed over M
            pl.BlockSpec((Kp, N), lambda i: (0, 0)),    # W: VMEM resident
            pl.BlockSpec((1, N), lambda i: (0, 0)),     # bias: VMEM resident
        ],
        out_specs=pl.BlockSpec((TM, N), lambda i: (i, 0)),
        compiler_params=_compiler_params(),
    )(a, w, brow)
    return out if Mp == M else out[:M]


# ---------------------------------------------------------------------------
# Pallas kernel 2: fused 7x7 bottleneck, tiled over M
#   relu( (x @ W3 + b3) @ W4 + b4 )   with x = flattened [B, 7*7*64]
# (encoder Conv2d(64,128,7,valid) and decoder ConvTranspose2d(128,64,7) both
#  operate on a 1x1 spatial extent, so they are plain matmuls; the [TM,128]
#  latent code never leaves VMEM.)
# ---------------------------------------------------------------------------
def _bottleneck_kernel(x_ref, w3_ref, b3_ref, w4_ref, b4_ref, o_ref):
    code = jnp.dot(x_ref[...], w3_ref[...], preferred_element_type=jnp.float32)
    code = code + b3_ref[...]                    # encoder's last conv: no act
    y = jnp.dot(code.astype(jnp.bfloat16), w4_ref[...],
                preferred_element_type=jnp.float32)
    y = jnp.maximum(y + b4_ref[...], 0.0)        # decoder's first convT: ReLU
    o_ref[...] = y.astype(o_ref.dtype)


def bottleneck_fused(x, w3m, b3r, w4m, b4r, tm=128):
    M, K = x.shape                               # [B, 3136]
    N3 = w3m.shape[1]                            # 128
    N4 = w4m.shape[1]                            # 3136
    if M >= tm:
        TM = tm
        Mp = _round_up(M, TM)
    else:
        Mp = _round_up(M, 16)
        TM = Mp
    xp = x.astype(jnp.bfloat16)
    if Mp != M:
        xp = jnp.pad(xp, ((0, Mp - M), (0, 0)))

    out = pl.pallas_call(
        _bottleneck_kernel,
        out_shape=jax.ShapeDtypeStruct((Mp, N4), jnp.bfloat16),
        grid=(Mp // TM,),
        in_specs=[
            pl.BlockSpec((TM, K), lambda i: (i, 0)),    # x: streamed over M
            pl.BlockSpec((K, N3), lambda i: (0, 0)),    # W3: resident
            pl.BlockSpec((1, N3), lambda i: (0, 0)),
            pl.BlockSpec((N3, N4), lambda i: (0, 0)),   # W4: resident
            pl.BlockSpec((1, N4), lambda i: (0, 0)),
        ],
        out_specs=pl.BlockSpec((TM, N4), lambda i: (i, 0)),
        compiler_params=_compiler_params(),
    )(xp, w3m, b3r, w4m, b4r)
    return out if Mp == M else out[:M]


# ---------------------------------------------------------------------------
# Glue: NHWC im2col (encoder, stride 2) and sub-pixel convT cols (decoder)
# ---------------------------------------------------------------------------
def _im2col(x, kh, kw, stride, pad_h, pad_w):
    """x: [B,H,W,C] NHWC.  Returns ([B*OH*OW, KH*KW*C], B, OH, OW)."""
    if any(p != 0 for p in (*pad_h, *pad_w)):
        x = jnp.pad(x, ((0, 0), pad_h, pad_w, (0, 0)))
    B, H, W, C = x.shape
    oh = (H - kh) // stride + 1
    ow = (W - kw) // stride + 1
    patches = []
    for i in range(kh):
        for j in range(kw):
            patches.append(
                x[:, i:i + (oh - 1) * stride + 1:stride,
                     j:j + (ow - 1) * stride + 1:stride, :])
    cols = jnp.stack(patches, axis=3)            # [B, oh, ow, kh*kw, C]
    return cols.reshape(B * oh * ow, kh * kw * C), B, oh, ow


def conv2d_nhwc(x, wmat, brow, stride, pad, act):
    """Encoder conv: x NHWC, wmat [Kp, Cout] GEMM-ready (K = kh*kw*Cin)."""
    cols, B, oh, ow = _im2col(x, 3, 3, stride, (pad, pad), (pad, pad))
    cout = wmat.shape[1]
    out = matmul_bias_act(cols, wmat, brow, act)
    return out.reshape(B, oh, ow, cout)


def _subpixel_cols(x):
    """2x2-tap cols for the output-parity convT decomposition.

    x: [B,H,W,C] NHWC -> [B*H*W, 4*C] with K order (dh, dw, ci)."""
    B, H, W, C = x.shape
    xp = jnp.pad(x, ((0, 0), (0, 1), (0, 1), (0, 0)))
    patches = [xp[:, dh:dh + H, dw:dw + W, :] for dh in (0, 1) for dw in (0, 1)]
    cols = jnp.concatenate(patches, axis=-1)     # [B, H, W, 4C]
    return cols.reshape(B * H * W, 4 * C)


def subpixel_conv_transpose(x, wsub, brow, act):
    """ConvTranspose2d(k=3, stride=2, pad=1, out_pad=1) via output-parity GEMM.

    wsub: [4*Cin, 4*Cout] phase-stacked weight (prepared once).
    Output spatial size = 2H x 2W, NHWC."""
    B, H, W, C = x.shape
    cout = wsub.shape[1] // 4
    cols = _subpixel_cols(x)                                   # [B*H*W, 4C]
    y = matmul_bias_act(cols, wsub, brow, act)                 # [B*H*W, 4*cout]
    y = y.reshape(B, H, W, 2, 2, cout)                         # (ph, pw, co)
    y = jnp.transpose(y, (0, 1, 3, 2, 4, 5)).reshape(B, 2 * H, 2 * W, cout)
    return y


# ---------------------------------------------------------------------------
# One-time parameter preparation (hoisted out of the forward pass)
# ---------------------------------------------------------------------------
def _conv_weight_mat(w):
    """PyTorch Conv2d weight [Cout,Cin,kh,kw] -> [kh*kw*Cin, Cout] bf16."""
    cout, cin, kh, kw = w.shape
    return jnp.transpose(w, (2, 3, 1, 0)).reshape(kh * kw * cin, cout
                                                  ).astype(jnp.bfloat16)


def _subpixel_weight_bias(w, b):
    """PyTorch ConvTranspose2d weight [Cin,Cout,3,3] (stride=2,pad=1,op=1) ->
    phase-stacked GEMM weight [4*Cin, 4*Cout] (K order (dh,dw,ci), N order
    (ph,pw,co)) and tiled bias [4*Cout]."""
    cin, cout, KH, KW = w.shape
    assert KH == 3 and KW == 3
    # For output row 2a+ph, tap row a+dh contributes kernel row kmap[(ph,dh)]:
    #   ph=0: dh=0 -> kh=1 ;  ph=1: dh=0 -> kh=2, dh=1 -> kh=0
    kmap = {(0, 0): 1, (1, 0): 2, (1, 1): 0}
    zero = jnp.zeros((cin, cout), w.dtype)

    def tap(ph, pw, dh, dw):
        if (ph, dh) in kmap and (pw, dw) in kmap:
            return w[:, :, kmap[(ph, dh)], kmap[(pw, dw)]]     # [cin, cout]
        return zero

    rows = []
    for dh in (0, 1):
        for dw in (0, 1):
            cols = [tap(ph, pw, dh, dw) for ph in (0, 1) for pw in (0, 1)]
            rows.append(jnp.concatenate(cols, axis=1))          # [cin, 4*cout]
    wsub = jnp.concatenate(rows, axis=0)                        # [4*cin, 4*cout]
    bsub = jnp.tile(b, 4)                                       # (ph,pw,co) order
    return wsub.astype(jnp.bfloat16), bsub


def prepare_params(params):
    """One-time conversion of PyTorch-layout params to GEMM-ready arrays."""
    (w1, b1), (w2, b2), (w3, b3), (w4, b4), (w5, b5), (w6, b6) = params

    def brow(b):
        return b.astype(jnp.float32).reshape(1, -1)

    w1m = jnp.pad(_conv_weight_mat(w1), ((0, 16 - 9), (0, 0)))   # K 9 -> 16
    w2m = _conv_weight_mat(w2)                                    # [288, 64]
    w3m = _conv_weight_mat(w3)                                    # [3136, 128]
    # ConvTranspose2d(128,64,7) on 1x1 spatial: plain matmul [128, 7*7*64].
    w4m = jnp.transpose(w4, (0, 2, 3, 1)).reshape(128, 49 * 64
                                                  ).astype(jnp.bfloat16)
    b4t = jnp.tile(b4, 49)
    w5m, b5t = _subpixel_weight_bias(w5, b5)                      # [256, 128]
    w6m, b6t = _subpixel_weight_bias(w6, b6)                      # [128, 4]
    return dict(w1=w1m, b1=brow(b1), w2=w2m, b2=brow(b2),
                w3=w3m, b3=brow(b3), w4=w4m, b4=brow(b4t),
                w5=w5m, b5=brow(b5t), w6=w6m, b6=brow(b6t))


# ---------------------------------------------------------------------------
# Model: parameters + forward
# ---------------------------------------------------------------------------
def init_params(key):
    def layer(k, w_shape, n_bias, fan_in):
        kw, kb = jax.random.split(k)
        bound = 1.0 / np.sqrt(fan_in)
        w = jax.random.uniform(kw, w_shape, jnp.float32, -bound, bound)
        b = jax.random.uniform(kb, (n_bias,), jnp.float32, -bound, bound)
        return w, b

    ks = jax.random.split(key, 6)
    return (
        layer(ks[0], (32, 1, 3, 3), 32, 1 * 3 * 3),       # Conv2d(1,32,3,s2,p1)
        layer(ks[1], (64, 32, 3, 3), 64, 32 * 3 * 3),     # Conv2d(32,64,3,s2,p1)
        layer(ks[2], (128, 64, 7, 7), 128, 64 * 7 * 7),   # Conv2d(64,128,7)
        layer(ks[3], (128, 64, 7, 7), 64, 64 * 7 * 7),    # ConvT(128,64,7)
        layer(ks[4], (64, 32, 3, 3), 32, 32 * 3 * 3),     # ConvT(64,32,3,s2,p1,op1)
        layer(ks[5], (32, 1, 3, 3), 1, 1 * 3 * 3),        # ConvT(32,1,3,s2,p1,op1)
    )


def cnn_autoencoder_forward(x_nchw, p):
    B = x_nchw.shape[0]

    # Single NCHW -> NHWC transpose at the input boundary; bf16 activations.
    h = jnp.transpose(x_nchw, (0, 2, 3, 1)).astype(jnp.bfloat16)

    # ---- Encoder ----
    h = conv2d_nhwc(h, p["w1"], p["b1"], stride=2, pad=1, act="relu")  # [B,14,14,32]
    h = conv2d_nhwc(h, p["w2"], p["b2"], stride=2, pad=1, act="relu")  # [B, 7, 7,64]

    # ---- Bottleneck (Conv2d(64,128,7) + ConvTranspose2d(128,64,7), fused) ----
    h = bottleneck_fused(h.reshape(B, 49 * 64), p["w3"], p["b3"],
                         p["w4"], p["b4"])
    h = h.reshape(B, 7, 7, 64)                                         # [B, 7, 7,64]

    # ---- Decoder tail (sub-pixel / output-parity transposed convs) ----
    h = subpixel_conv_transpose(h, p["w5"], p["b5"], act="relu")       # [B,14,14,32]
    h = subpixel_conv_transpose(h, p["w6"], p["b6"], act="tanh")       # [B,28,28, 1]

    # Single NHWC -> NCHW transpose + f32 cast on the tiny final tensor.
    return jnp.transpose(h, (0, 3, 1, 2)).astype(jnp.float32)


# ---------------------------------------------------------------------------
# Pure-JAX (XLA conv, f32 HIGHEST) reference for validation
# ---------------------------------------------------------------------------
def _ref_forward(x, params):
    dn = ("NCHW", "OIHW", "NCHW")
    prec = jax.lax.Precision.HIGHEST

    def conv(x, w, b, stride, pad):
        y = jax.lax.conv_general_dilated(
            x, w, (stride, stride), ((pad, pad), (pad, pad)),
            dimension_numbers=dn, precision=prec)
        return y + b[None, :, None, None]

    def convT(x, w, b, stride, pad, op):
        kh = w.shape[2]
        w_eq = jnp.transpose(w, (1, 0, 2, 3))[:, :, ::-1, ::-1]
        y = jax.lax.conv_general_dilated(
            x, w_eq, (1, 1),
            ((kh - 1 - pad, kh - 1 - pad + op), (kh - 1 - pad, kh - 1 - pad + op)),
            lhs_dilation=(stride, stride), dimension_numbers=dn, precision=prec)
        return y + b[None, :, None, None]

    (w1, b1), (w2, b2), (w3, b3), (w4, b4), (w5, b5), (w6, b6) = params
    h = jax.nn.relu(conv(x, w1, b1, 2, 1))
    h = jax.nn.relu(conv(h, w2, b2, 2, 1))
    h = conv(h, w3, b3, 1, 0)
    h = jax.nn.relu(convT(h, w4, b4, 1, 0, 0))
    h = jax.nn.relu(convT(h, w5, b5, 2, 1, 1))
    h = jnp.tanh(convT(h, w6, b6, 2, 1, 1))
    return h


# ---------------------------------------------------------------------------
if __name__ == "__main__":
    key = jax.random.PRNGKey(0)
    params = init_params(jax.random.fold_in(key, 7))
    # The module implies 28x28 single-channel input (MNIST); small batch.
    x = jax.random.normal(key, (2, 1, 28, 28), jnp.float32)

    prep = prepare_params(params)          # one-time weight preprocessing
    fwd = jax.jit(cnn_autoencoder_forward)
    y = jax.block_until_ready(fwd(x, prep))
    assert y.shape == (2, 1, 28, 28), y.shape

    y_ref = jax.block_until_ready(_ref_forward(x, params))
    # bf16 MXU inputs / activations with f32 accumulation -> small rounding
    # drift vs the f32 HIGHEST reference.
    np.testing.assert_allclose(np.asarray(y, dtype=np.float32),
                               np.asarray(y_ref), rtol=2e-2, atol=2e-2)
    print("KERNEL_OK")
</pallas_src>

<mosaic_0001>
module attributes {stable_mosaic.version = 11 : i64} {
  func.func @_gemm_bias_act_kernel(%arg0: i32, %arg1: memref<400x16xbf16, #tpu.memory_space<vmem>>, %arg2: memref<16x32xbf16, #tpu.memory_space<vmem>>, %arg3: memref<1x32xf32, #tpu.memory_space<vmem>>, %arg4: memref<400x32xbf16, #tpu.memory_space<vmem>>) attributes {dimension_semantics = [#tpu.dimension_semantics<parallel>], iteration_bounds = array<i64: 1>, scalar_prefetch = 0 : i64, scratch_operands = 0 : i64, tpu.core_type = #tpu.core_type<tc>, window_params = [{transform_indices = @transform_0, window_bounds = array<i64: 400, 16>}, {pipeline_mode = #tpu.pipeline_mode<synchronous>, transform_indices = @transform_1, window_bounds = array<i64: 16, 32>}, {pipeline_mode = #tpu.pipeline_mode<synchronous>, transform_indices = @transform_2, window_bounds = array<i64: 1, 32>}, {transform_indices = @transform_3, window_bounds = array<i64: 400, 32>}]} {
    %c0 = arith.constant 0 : index
    %c0_0 = arith.constant 0 : index
    %0 = vector.load %arg1[%c0, %c0_0] : memref<400x16xbf16, #tpu.memory_space<vmem>>, vector<400x16xbf16>
    %c0_1 = arith.constant 0 : index
    %c0_2 = arith.constant 0 : index
    %1 = vector.load %arg2[%c0_1, %c0_2] : memref<16x32xbf16, #tpu.memory_space<vmem>>, vector<16x32xbf16>
    %cst = arith.constant dense<0.000000e+00> : vector<400x32xf32>
    %2 = tpu.matmul %0, %1, %cst {dimension_numbers = #tpu.dot_dimension_numbers<[1], [0], [0], [1], [0, 0, 1, 1], [], []>} : vector<400x16xbf16>, vector<16x32xbf16>, vector<400x32xf32> -> vector<400x32xf32>
    %c0_3 = arith.constant 0 : index
    %c0_4 = arith.constant 0 : index
    %3 = vector.load %arg3[%c0_3, %c0_4] : memref<1x32xf32, #tpu.memory_space<vmem>>, vector<1x32xf32>
    %4 = vector.broadcast %3 : vector<1x32xf32> to vector<400x32xf32>
    %5 = arith.addf %2, %4 : vector<400x32xf32>
    %cst_5 = arith.constant 0.000000e+00 : f32
    %6 = vector.broadcast %cst_5 : f32 to vector<400x32xf32>
    %7 = arith.maximumf %5, %6 : vector<400x32xf32>
    %8 = arith.truncf %7 : vector<400x32xf32> to vector<400x32xbf16>
    %c0_6 = arith.constant 0 : index
    %c0_7 = arith.constant 0 : index
    %9 = vector.load %arg4[%c0_6, %c0_7] : memref<400x32xbf16, #tpu.memory_space<vmem>>, vector<400x32xbf16>
    tpu.vector_store %arg4[%c0_6, %c0_7], %8 {strides = array<i32>} : memref<400x32xbf16, #tpu.memory_space<vmem>>, vector<400x32xbf16>,
    return
  }
  func.func @transform_0(%arg0: i32) -> (i32, i32) {
    %c0_i32 = arith.constant 0 : i32
    %c0_i32_0 = arith.constant 0 : i32
    return %arg0, %c0_i32 : i32, i32
  }
  func.func @transform_1(%arg0: i32) -> (i32, i32) {
    %c0_i32 = arith.constant 0 : i32
    %c0_i32_0 = arith.constant 0 : i32
    %c0_i32_1 = arith.constant 0 : i32
    return %c0_i32, %c0_i32_0 : i32, i32
  }
  func.func @transform_2(%arg0: i32) -> (i32, i32) {
    %c0_i32 = arith.constant 0 : i32
    %c0_i32_0 = arith.constant 0 : i32
    %c0_i32_1 = arith.constant 0 : i32
    return %c0_i32, %c0_i32_0 : i32, i32
  }
  func.func @transform_3(%arg0: i32) -> (i32, i32) {
    %c0_i32 = arith.constant 0 : i32
    %c0_i32_0 = arith.constant 0 : i32
    return %arg0, %c0_i32 : i32, i32
  }
}

module attributes {stable_mosaic.version = 11 : i64} {
  func.func @_gemm_bias_act_kernel(%arg0: i32, %arg1: memref<112x288xbf16, #tpu.memory_space<vmem>>, %arg2: memref<288x64xbf16, #tpu.memory_space<vmem>>, %arg3: memref<1x64xf32, #tpu.memory_space<vmem>>, %arg4: memref<112x64xbf16, #tpu.memory_space<vmem>>) attributes {dimension_semantics = [#tpu.dimension_semantics<parallel>], iteration_bounds = array<i64: 1>, scalar_prefetch = 0 : i64, scratch_operands = 0 : i64, tpu.core_type = #tpu.core_type<tc>, window_params = [{transform_indices = @transform_0, window_bounds = array<i64: 112, 288>}, {pipeline_mode = #tpu.pipeline_mode<synchronous>, transform_indices = @transform_1, window_bounds = array<i64: 288, 64>}, {pipeline_mode = #tpu.pipeline_mode<synchronous>, transform_indices = @transform_2, window_bounds = array<i64: 1, 64>}, {transform_indices = @transform_3, window_bounds = array<i64: 112, 64>}]} {
    %c0 = arith.constant 0 : index
    %c0_0 = arith.constant 0 : index
    %0 = vector.load %arg1[%c0, %c0_0] : memref<112x288xbf16, #tpu.memory_space<vmem>>, vector<112x288xbf16>
    %c0_1 = arith.constant 0 : index
    %c0_2 = arith.constant 0 : index
    %1 = vector.load %arg2[%c0_1, %c0_2] : memref<288x64xbf16, #tpu.memory_space<vmem>>, vector<288x64xbf16>
    %cst = arith.constant dense<0.000000e+00> : vector<112x64xf32>
    %2 = tpu.matmul %0, %1, %cst {dimension_numbers = #tpu.dot_dimension_numbers<[1], [0], [0], [1], [0, 0, 1, 1], [], []>} : vector<112x288xbf16>, vector<288x64xbf16>, vector<112x64xf32> -> vector<112x64xf32>
    %c0_3 = arith.constant 0 : index
    %c0_4 = arith.constant 0 : index
    %3 = vector.load %arg3[%c0_3, %c0_4] : memref<1x64xf32, #tpu.memory_space<vmem>>, vector<1x64xf32>
    %4 = vector.broadcast %3 : vector<1x64xf32> to vector<112x64xf32>
    %5 = arith.addf %2, %4 : vector<112x64xf32>
    %cst_5 = arith.constant 0.000000e+00 : f32
    %6 = vector.broadcast %cst_5 : f32 to vector<112x64xf32>
    %7 = arith.maximumf %5, %6 : vector<112x64xf32>
    %8 = arith.truncf %7 : vector<112x64xf32> to vector<112x64xbf16>
    %c0_6 = arith.constant 0 : index
    %c0_7 = arith.constant 0 : index
    %9 = vector.load %arg4[%c0_6, %c0_7] : memref<112x64xbf16, #tpu.memory_space<vmem>>, vector<112x64xbf16>
    tpu.vector_store %arg4[%c0_6, %c0_7], %8 {strides = array<i32>} : memref<112x64xbf16, #tpu.memory_space<vmem>>, vector<112x64xbf16>,
    return
  }
  func.func @transform_0(%arg0: i32) -> (i32, i32) {
    %c0_i32 = arith.constant 0 : i32
    %c0_i32_0 = arith.constant 0 : i32
    return %arg0, %c0_i32 : i32, i32
  }
  func.func @transform_1(%arg0: i32) -> (i32, i32) {
    %c0_i32 = arith.constant 0 : i32
    %c0_i32_0 = arith.constant 0 : i32
    %c0_i32_1 = arith.constant 0 : i32
    return %c0_i32, %c0_i32_0 : i32, i32
  }
  func.func @transform_2(%arg0: i32) -> (i32, i32) {
    %c0_i32 = arith.constant 0 : i32
    %c0_i32_0 = arith.constant 0 : i32
    %c0_i32_1 = arith.constant 0 : i32
    return %c0_i32, %c0_i32_0 : i32, i32
  }
  func.func @transform_3(%arg0: i32) -> (i32, i32) {
    %c0_i32 = arith.constant 0 : i32
    %c0_i32_0 = arith.constant 0 : i32
    return %arg0, %c0_i32 : i32, i32
  }
}

module attributes {stable_mosaic.version = 11 : i64} {
  func.func @_bottleneck_kernel(%arg0: i32, %arg1: memref<16x3136xbf16, #tpu.memory_space<vmem>>, %arg2: memref<3136x128xbf16, #tpu.memory_space<vmem>>, %arg3: memref<1x128xf32, #tpu.memory_space<vmem>>, %arg4: memref<128x3136xbf16, #tpu.memory_space<vmem>>, %arg5: memref<1x3136xf32, #tpu.memory_space<vmem>>, %arg6: memref<16x3136xbf16, #tpu.memory_space<vmem>>) attributes {dimension_semantics = [#tpu.dimension_semantics<parallel>], iteration_bounds = array<i64: 1>, scalar_prefetch = 0 : i64, scratch_operands = 0 : i64, tpu.core_type = #tpu.core_type<tc>, window_params = [{transform_indices = @transform_0, window_bounds = array<i64: 16, 3136>}, {pipeline_mode = #tpu.pipeline_mode<synchronous>, transform_indices = @transform_1, window_bounds = array<i64: 3136, 128>}, {pipeline_mode = #tpu.pipeline_mode<synchronous>, transform_indices = @transform_2, window_bounds = array<i64: 1, 128>}, {pipeline_mode = #tpu.pipeline_mode<synchronous>, transform_indices = @transform_3, window_bounds = array<i64: 128, 3136>}, {pipeline_mode = #tpu.pipeline_mode<synchronous>, transform_indices = @transform_4, window_bounds = array<i64: 1, 3136>}, {transform_indices = @transform_5, window_bounds = array<i64: 16, 3136>}]} {
    %c0 = arith.constant 0 : index
    %c0_0 = arith.constant 0 : index
    %0 = vector.load %arg1[%c0, %c0_0] : memref<16x3136xbf16, #tpu.memory_space<vmem>>, vector<16x3136xbf16>
    %c0_1 = arith.constant 0 : index
    %c0_2 = arith.constant 0 : index
    %1 = vector.load %arg2[%c0_1, %c0_2] : memref<3136x128xbf16, #tpu.memory_space<vmem>>, vector<3136x128xbf16>
    %cst = arith.constant dense<0.000000e+00> : vector<16x128xf32>
    %2 = tpu.matmul %0, %1, %cst {dimension_numbers = #tpu.dot_dimension_numbers<[1], [0], [0], [1], [0, 0, 1, 1], [], []>} : vector<16x3136xbf16>, vector<3136x128xbf16>, vector<16x128xf32> -> vector<16x128xf32>
    %c0_3 = arith.constant 0 : index
    %c0_4 = arith.constant 0 : index
    %3 = vector.load %arg3[%c0_3, %c0_4] : memref<1x128xf32, #tpu.memory_space<vmem>>, vector<1x128xf32>
    %4 = vector.broadcast %3 : vector<1x128xf32> to vector<16x128xf32>
    %5 = arith.addf %2, %4 : vector<16x128xf32>
    %6 = arith.truncf %5 : vector<16x128xf32> to vector<16x128xbf16>
    %c0_5 = arith.constant 0 : index
    %c0_6 = arith.constant 0 : index
    %7 = vector.load %arg4[%c0_5, %c0_6] : memref<128x3136xbf16, #tpu.memory_space<vmem>>, vector<128x3136xbf16>
    %cst_7 = arith.constant dense<0.000000e+00> : vector<16x3136xf32>
    %8 = tpu.matmul %6, %7, %cst_7 {dimension_numbers = #tpu.dot_dimension_numbers<[1], [0], [0], [1], [0, 0, 1, 1], [], []>} : vector<16x128xbf16>, vector<128x3136xbf16>, vector<16x3136xf32> -> vector<16x3136xf32>
    %c0_8 = arith.constant 0 : index
    %c0_9 = arith.constant 0 : index
    %9 = vector.load %arg5[%c0_8, %c0_9] : memref<1x3136xf32, #tpu.memory_space<vmem>>, vector<1x3136xf32>
    %10 = vector.broadcast %9 : vector<1x3136xf32> to vector<16x3136xf32>
    %11 = arith.addf %8, %10 : vector<16x3136xf32>
    %cst_10 = arith.constant 0.000000e+00 : f32
    %12 = vector.broadcast %cst_10 : f32 to vector<16x3136xf32>
    %13 = arith.maximumf %11, %12 : vector<16x3136xf32>
    %14 = arith.truncf %13 : vector<16x3136xf32> to vector<16x3136xbf16>
    %c0_11 = arith.constant 0 : index
    %c0_12 = arith.constant 0 : index
    %15 = vector.load %arg6[%c0_11, %c0_12] : memref<16x3136xbf16, #tpu.memory_space<vmem>>, vector<16x3136xbf16>
    tpu.vector_store %arg6[%c0_11, %c0_12], %14 {strides = array<i32>} : memref<16x3136xbf16, #tpu.memory_space<vmem>>, vector<16x3136xbf16>,
    return
  }
  func.func @transform_0(%arg0: i32) -> (i32, i32) {
    %c0_i32 = arith.constant 0 : i32
    %c0_i32_0 = arith.constant 0 : i32
    return %arg0, %c0_i32 : i32, i32
  }
  func.func @transform_1(%arg0: i32) -> (i32, i32) {
    %c0_i32 = arith.constant 0 : i32
    %c0_i32_0 = arith.constant 0 : i32
    %c0_i32_1 = arith.constant 0 : i32
    return %c0_i32, %c0_i32_0 : i32, i32
  }
  func.func @transform_2(%arg0: i32) -> (i32, i32) {
    %c0_i32 = arith.constant 0 : i32
    %c0_i32_0 = arith.constant 0 : i32
    %c0_i32_1 = arith.constant 0 : i32
    return %c0_i32, %c0_i32_0 : i32, i32
  }
  func.func @transform_3(%arg0: i32) -> (i32, i32) {
    %c0_i32 = arith.constant 0 : i32
    %c0_i32_0 = arith.constant 0 : i32
    %c0_i32_1 = arith.constant 0 : i32
    return %c0_i32, %c0_i32_0 : i32, i32
  }
  func.func @transform_4(%arg0: i32) -> (i32, i32) {
    %c0_i32 = arith.constant 0 : i32
    %c0_i32_0 = arith.constant 0 : i32
    %c0_i32_1 = arith.constant 0 : i32
    return %c0_i32, %c0_i32_0 : i32, i32
  }
  func.func @transform_5(%arg0: i32) -> (i32, i32) {
    %c0_i32 = arith.constant 0 : i32
    %c0_i32_0 = arith.constant 0 : i32
    return %arg0, %c0_i32 : i32, i32
  }
}

module attributes {stable_mosaic.version = 11 : i64} {
  func.func @_gemm_bias_act_kernel(%arg0: i32, %arg1: memref<112x256xbf16, #tpu.memory_space<vmem>>, %arg2: memref<256x128xbf16, #tpu.memory_space<vmem>>, %arg3: memref<1x128xf32, #tpu.memory_space<vmem>>, %arg4: memref<112x128xbf16, #tpu.memory_space<vmem>>) attributes {dimension_semantics = [#tpu.dimension_semantics<parallel>], iteration_bounds = array<i64: 1>, scalar_prefetch = 0 : i64, scratch_operands = 0 : i64, tpu.core_type = #tpu.core_type<tc>, window_params = [{transform_indices = @transform_0, window_bounds = array<i64: 112, 256>}, {pipeline_mode = #tpu.pipeline_mode<synchronous>, transform_indices = @transform_1, window_bounds = array<i64: 256, 128>}, {pipeline_mode = #tpu.pipeline_mode<synchronous>, transform_indices = @transform_2, window_bounds = array<i64: 1, 128>}, {transform_indices = @transform_3, window_bounds = array<i64: 112, 128>}]} {
    %c0 = arith.constant 0 : index
    %c0_0 = arith.constant 0 : index
    %0 = vector.load %arg1[%c0, %c0_0] : memref<112x256xbf16, #tpu.memory_space<vmem>>, vector<112x256xbf16>
    %c0_1 = arith.constant 0 : index
    %c0_2 = arith.constant 0 : index
    %1 = vector.load %arg2[%c0_1, %c0_2] : memref<256x128xbf16, #tpu.memory_space<vmem>>, vector<256x128xbf16>
    %cst = arith.constant dense<0.000000e+00> : vector<112x128xf32>
    %2 = tpu.matmul %0, %1, %cst {dimension_numbers = #tpu.dot_dimension_numbers<[1], [0], [0], [1], [0, 0, 1, 1], [], []>} : vector<112x256xbf16>, vector<256x128xbf16>, vector<112x128xf32> -> vector<112x128xf32>
    %c0_3 = arith.constant 0 : index
    %c0_4 = arith.constant 0 : index
    %3 = vector.load %arg3[%c0_3, %c0_4] : memref<1x128xf32, #tpu.memory_space<vmem>>, vector<1x128xf32>
    %4 = vector.broadcast %3 : vector<1x128xf32> to vector<112x128xf32>
    %5 = arith.addf %2, %4 : vector<112x128xf32>
    %cst_5 = arith.constant 0.000000e+00 : f32
    %6 = vector.broadcast %cst_5 : f32 to vector<112x128xf32>
    %7 = arith.maximumf %5, %6 : vector<112x128xf32>
    %8 = arith.truncf %7 : vector<112x128xf32> to vector<112x128xbf16>
    %c0_6 = arith.constant 0 : index
    %c0_7 = arith.constant 0 : index
    %9 = vector.load %arg4[%c0_6, %c0_7] : memref<112x128xbf16, #tpu.memory_space<vmem>>, vector<112x128xbf16>
    tpu.vector_store %arg4[%c0_6, %c0_7], %8 {strides = array<i32>} : memref<112x128xbf16, #tpu.memory_space<vmem>>, vector<112x128xbf16>,
    return
  }
  func.func @transform_0(%arg0: i32) -> (i32, i32) {
    %c0_i32 = arith.constant 0 : i32
    %c0_i32_0 = arith.constant 0 : i32
    return %arg0, %c0_i32 : i32, i32
  }
  func.func @transform_1(%arg0: i32) -> (i32, i32) {
    %c0_i32 = arith.constant 0 : i32
    %c0_i32_0 = arith.constant 0 : i32
    %c0_i32_1 = arith.constant 0 : i32
    return %c0_i32, %c0_i32_0 : i32, i32
  }
  func.func @transform_2(%arg0: i32) -> (i32, i32) {
    %c0_i32 = arith.constant 0 : i32
    %c0_i32_0 = arith.constant 0 : i32
    %c0_i32_1 = arith.constant 0 : i32
    return %c0_i32, %c0_i32_0 : i32, i32
  }
  func.func @transform_3(%arg0: i32) -> (i32, i32) {
    %c0_i32 = arith.constant 0 : i32
    %c0_i32_0 = arith.constant 0 : i32
    return %arg0, %c0_i32 : i32, i32
  }
}

module attributes {stable_mosaic.version = 11 : i64} {
  func.func @_gemm_bias_act_kernel(%arg0: i32, %arg1: memref<400x128xbf16, #tpu.memory_space<vmem>>, %arg2: memref<128x4xbf16, #tpu.memory_space<vmem>>, %arg3: memref<1x4xf32, #tpu.memory_space<vmem>>, %arg4: memref<400x4xbf16, #tpu.memory_space<vmem>>) attributes {dimension_semantics = [#tpu.dimension_semantics<parallel>], iteration_bounds = array<i64: 1>, scalar_prefetch = 0 : i64, scratch_operands = 0 : i64, tpu.core_type = #tpu.core_type<tc>, window_params = [{transform_indices = @transform_0, window_bounds = array<i64: 400, 128>}, {pipeline_mode = #tpu.pipeline_mode<synchronous>, transform_indices = @transform_1, window_bounds = array<i64: 128, 4>}, {pipeline_mode = #tpu.pipeline_mode<synchronous>, transform_indices = @transform_2, window_bounds = array<i64: 1, 4>}, {transform_indices = @transform_3, window_bounds = array<i64: 400, 4>}]} {
    %c0 = arith.constant 0 : index
    %c0_0 = arith.constant 0 : index
    %0 = vector.load %arg1[%c0, %c0_0] : memref<400x128xbf16, #tpu.memory_space<vmem>>, vector<400x128xbf16>
    %c0_1 = arith.constant 0 : index
    %c0_2 = arith.constant 0 : index
    %1 = vector.load %arg2[%c0_1, %c0_2] : memref<128x4xbf16, #tpu.memory_space<vmem>>, vector<128x4xbf16>
    %cst = arith.constant dense<0.000000e+00> : vector<400x4xf32>
    %2 = tpu.matmul %0, %1, %cst {dimension_numbers = #tpu.dot_dimension_numbers<[1], [0], [0], [1], [0, 0, 1, 1], [], []>} : vector<400x128xbf16>, vector<128x4xbf16>, vector<400x4xf32> -> vector<400x4xf32>
    %c0_3 = arith.constant 0 : index
    %c0_4 = arith.constant 0 : index
    %3 = vector.load %arg3[%c0_3, %c0_4] : memref<1x4xf32, #tpu.memory_space<vmem>>, vector<1x4xf32>
    %4 = vector.broadcast %3 : vector<1x4xf32> to vector<400x4xf32>
    %5 = arith.addf %2, %4 : vector<400x4xf32>
    %6 = math.tanh %5 : vector<400x4xf32>
    %7 = arith.truncf %6 : vector<400x4xf32> to vector<400x4xbf16>
    %c0_5 = arith.constant 0 : index
    %c0_6 = arith.constant 0 : index
    %8 = vector.load %arg4[%c0_5, %c0_6] : memref<400x4xbf16, #tpu.memory_space<vmem>>, vector<400x4xbf16>
    tpu.vector_store %arg4[%c0_5, %c0_6], %7 {strides = array<i32>} : memref<400x4xbf16, #tpu.memory_space<vmem>>, vector<400x4xbf16>,
    return
  }
  func.func @transform_0(%arg0: i32) -> (i32, i32) {
    %c0_i32 = arith.constant 0 : i32
    %c0_i32_0 = arith.constant 0 : i32
    return %arg0, %c0_i32 : i32, i32
  }
  func.func @transform_1(%arg0: i32) -> (i32, i32) {
    %c0_i32 = arith.constant 0 : i32
    %c0_i32_0 = arith.constant 0 : i32
    %c0_i32_1 = arith.constant 0 : i32
    return %c0_i32, %c0_i32_0 : i32, i32
  }
  func.func @transform_2(%arg0: i32) -> (i32, i32) {
    %c0_i32 = arith.constant 0 : i32
    %c0_i32_0 = arith.constant 0 : i32
    %c0_i32_1 = arith.constant 0 : i32
    return %c0_i32, %c0_i32_0 : i32, i32
  }
  func.func @transform_3(%arg0: i32) -> (i32, i32) {
    %c0_i32 = arith.constant 0 : i32
    %c0_i32_0 = arith.constant 0 : i32
    return %arg0, %c0_i32 : i32, i32
  }
}

</mosaic_0001>

<bundles_post_ra>
// kernel: cnn_autoencoder_forward.5
= control target key start
LH: loop header
LB: loop body
LE: loop exit
PB: predicated region body
PF: predicated region fallthrough
CT: control target
= control target key end

     0   :  { %v1129_v0 = vmov 0.0   ;;  %vm1130_vm0 = vmmov 0   ;;  %vm205_vm1 = vcmask 130048   ;;  %vm764_vm2 = vcmask 257024   ;;  %s1561_s1 = inlined_call_operand.vmem [shape: bf16[16,32], index: 1, kind: input, shape index: {}]   ;;  %s1562_s0 = inlined_call_operand.vmem [shape: bf16[400,16], index: 0, kind: input, shape index: {}]   ;;  %s1563_s2 = inlined_call_operand.vmem [shape: f32[1,32], index: 2, kind: input, shape index: {}]   ;;  %s1564_s3 = inlined_call_operand.vmem [shape: bf16[400,32], index: 3, kind: output, shape index: {}]  }
   0x1   :  { %997 = vmatprep.subr.bf16.mxu0 %v1129_v0  ;;  %v1103_v1 = vld [vmem:[%s1561_s1] sm:$0xff]   ;;  %999 = vmatprep.mubr.msk.bf16.mxu0 %vm1130_vm0, %v1129_v0  ;;  %v1105_v3 = vld [vmem:[%s1562_s0 + $0x68] sm:$0xff]   ;;  %v1107_v5 = vld [vmem:[%s1562_s0 + $0x70] sm:$0xff]  }
   0x2   :  { %v1104_v2 = vld [vmem:[%s1562_s0] sm:$0xff]   ;;  %1099 = vmatprep.subr.bf16.mxu1 %v1129_v0  ;;  %1051 = vmatprep.mubr.msk.bf16.mxu1 %vm1130_vm0, %v1129_v0  ;;  %v1106_v4 = vld [vmem:[%s1562_s0 + $0x8] sm:$0xff]   ;;  %v1108_v6 = vld [vmem:[%s1562_s0 + $0x10] sm:$0xff]  }
   0x3   :  { %998 = vmatpush3.bf16.msra.mxu0 %v1103_v1  ;;  %1100 = vmatpush3.bf16.msra.mxu1 %v1103_v1  ;;  %v1109_v7 = vld [vmem:[%s1562_s0 + $0x78] sm:$0xff]   ;;  %v1111_v9 = vld [vmem:[%s1562_s0 + $0x80] sm:$0xff]   ;;  %v1113_v11 = vld [vmem:[%s1562_s0 + $0x88] sm:$0xff]  }
   0x4   :  { %v1110_v8 = vld [vmem:[%s1562_s0 + $0x18] sm:$0xff]   ;;  %v1112_v10 = vld [vmem:[%s1562_s0 + $0x20] sm:$0xff]   ;;  %v1114_v12 = vld [vmem:[%s1562_s0 + $0x28] sm:$0xff]  }
   0x5   :  { %v1115_v13 = vld [vmem:[%s1562_s0 + $0x90] sm:$0xff]   ;;  %v1117_v15 = vld [vmem:[%s1562_s0 + $0x98] sm:$0xff]   ;;  %v1119_v17 = vld [vmem:[%s1562_s0 + $0xa0] sm:$0xff]  }
   0x6   :  { %1000 = vmatmul.mubr.msk.bf16.vlgmr.msra.gmra.mrb[0].mxu0 %vm205_vm1, %v1104_v2  ;;  %1052 = vmatmul.mubr.msk.bf16.vlgmr.msra.gmra.mrb[0].mxu1 %vm205_vm1, %v1105_v3  ;;  %v1116_v14 = vld [vmem:[%s1562_s0 + $0x30] sm:$0xff]   ;;  %v1118_v16 = vld [vmem:[%s1562_s0 + $0x38] sm:$0xff]   ;;  %v1120_v18 = vld [vmem:[%s1562_s0 + $0x40] sm:$0xff]  }
   0x7   :  { %1003 = vmatprep.mubr.msk.bf16.mxu0 %vm1130_vm0, %v1129_v0  ;;  %1055 = vmatprep.mubr.msk.bf16.mxu1 %vm1130_vm0, %v1129_v0  ;;  %v1121_v19 = vld [vmem:[%s1562_s0 + $0xa8] sm:$0xff]   ;;  %v1123_v21 = vld [vmem:[%s1562_s0 + $0xb0] sm:$0xff]   ;;  %v1125_v23 = vld [vmem:[%s1562_s0 + $0xb8] sm:$0xff]  }
   0x8   :  { %v1122_v20 = vld [vmem:[%s1562_s0 + $0x48] sm:$0xff]   ;;  %v1124_v22 = vld [vmem:[%s1562_s0 + $0x50] sm:$0xff]   ;;  %v1126_v24 = vld [vmem:[%s1562_s0 + $0x58] sm:$0xff]  }
   0x9   :  { %v1127_v25 = vld [vmem:[%s1562_s0 + $0xc0] sm:$0xff]  }
   0xa   :  { %v1128_v26 = vld [vmem:[%s1562_s0 + $0x60] sm:$0xff]  }
   0xb   :  { %v1309_v27 = vld [vmem:[%s1563_s2] ss:$0 sm:$0xff] }
   0xe   :  { %1004 = vmatmul.mubr.msk.bf16.gmra.mrb[4].mxu0 %vm205_vm1, %v1106_v4  ;;  %1056 = vmatmul.mubr.msk.bf16.gmra.mrb[4].mxu1 %vm205_vm1, %v1107_v5 }
   0xf   :  { %1007 = vmatprep.mubr.msk.bf16.mxu0 %vm1130_vm0, %v1129_v0  ;;  %1059 = vmatprep.mubr.msk.bf16.mxu1 %vm1130_vm0, %v1129_v0 }
  0x16   :  { %1008 = vmatmul.mubr.msk.bf16.gmra.mrb[8].mxu0 %vm205_vm1, %v1108_v6  ;;  %1060 = vmatmul.mubr.msk.bf16.gmra.mrb[8].mxu1 %vm205_vm1, %v1109_v7 }
  0x17   :  { %1011 = vmatprep.mubr.msk.bf16.mxu0 %vm1130_vm0, %v1129_v0  ;;  %1063 = vmatprep.mubr.msk.bf16.mxu1 %vm1130_vm0, %v1129_v0 }
  0x1e   :  { %1012 = vmatmul.mubr.msk.bf16.gmra.mrb[12].mxu0 %vm205_vm1, %v1110_v8  ;;  %1064 = vmatmul.mubr.msk.bf16.gmra.mrb[12].mxu1 %vm205_vm1, %v1111_v9 }
  0x1f   :  { %1015 = vmatprep.mubr.msk.bf16.mxu0 %vm1130_vm0, %v1129_v0  ;;  %1067 = vmatprep.mubr.msk.bf16.mxu1 %vm1130_vm0, %v1129_v0 }
  0x26   :  { %1016 = vmatmul.mubr.msk.bf16.gmra.mrb[16].mxu0 %vm205_vm1, %v1112_v10  ;;  %1068 = vmatmul.mubr.msk.bf16.gmra.mrb[16].mxu1 %vm205_vm1, %v1113_v11 }
  0x27   :  { %1019 = vmatprep.mubr.msk.bf16.mxu0 %vm1130_vm0, %v1129_v0  ;;  %1071 = vmatprep.mubr.msk.bf16.mxu1 %vm1130_vm0, %v1129_v0 }
  0x2e   :  { %1020 = vmatmul.mubr.msk.bf16.gmra.mrb[20].mxu0 %vm205_vm1, %v1114_v12  ;;  %1072 = vmatmul.mubr.msk.bf16.gmra.mrb[20].mxu1 %vm205_vm1, %v1115_v13 }
  0x2f   :  { %1023 = vmatprep.mubr.msk.bf16.mxu0 %vm1130_vm0, %v1129_v0  ;;  %1075 = vmatprep.mubr.msk.bf16.mxu1 %vm1130_vm0, %v1129_v0 }
  0x36   :  { %1024 = vmatmul.mubr.msk.bf16.gmra.mrb[24].mxu0 %vm205_vm1, %v1116_v14  ;;  %1076 = vmatmul.mubr.msk.bf16.gmra.mrb[24].mxu1 %vm205_vm1, %v1117_v15 }
  0x37   :  { %1027 = vmatprep.mubr.msk.bf16.mxu0 %vm1130_vm0, %v1129_v0  ;;  %1079 = vmatprep.mubr.msk.bf16.mxu1 %vm1130_vm0, %v1129_v0 }
  0x3e   :  { %1028 = vmatmul.mubr.msk.bf16.gmra.mrb[28].mxu0 %vm205_vm1, %v1118_v16  ;;  %1080 = vmatmul.mubr.msk.bf16.gmra.mrb[28].mxu1 %vm205_vm1, %v1119_v17 }
  0x3f   :  { %1031 = vmatprep.mubr.msk.bf16.mxu0 %vm1130_vm0, %v1129_v0  ;;  %1083 = vmatprep.mubr.msk.bf16.mxu1 %vm1130_vm0, %v1129_v0 }
  0x46   :  { %1032 = vmatmul.mubr.msk.bf16.gmra.mrb[32].mxu0 %vm205_vm1, %v1120_v18  ;;  %1084 = vmatmul.mubr.msk.bf16.gmra.mrb[32].mxu1 %vm205_vm1, %v1121_v19 }
  0x47   :  { %1035 = vmatprep.mubr.msk.bf16.mxu0 %vm1130_vm0, %v1129_v0  ;;  %1087 = vmatprep.mubr.msk.bf16.mxu1 %vm1130_vm0, %v1129_v0 }
  0x4e   :  { %1036 = vmatmul.mubr.msk.bf16.gmra.mrb[36].mxu0 %vm205_vm1, %v1122_v20  ;;  %1088 = vmatmul.mubr.msk.bf16.gmra.mrb[36].mxu1 %vm205_vm1, %v1123_v21 }
  0x4f   :  { %1039 = vmatprep.mubr.msk.bf16.mxu0 %vm1130_vm0, %v1129_v0  ;;  %1091 = vmatprep.mubr.msk.bf16.mxu1 %vm1130_vm0, %v1129_v0 }
  0x56   :  { %1040 = vmatmul.mubr.msk.bf16.gmra.mrb[40].mxu0 %vm205_vm1, %v1124_v22  ;;  %1092 = vmatmul.mubr.msk.bf16.gmra.mrb[40].mxu1 %vm205_vm1, %v1125_v23 }
  0x57   :  { %1043 = vmatprep.mubr.msk.bf16.mxu0 %vm1130_vm0, %v1129_v0  ;;  %1095 = vmatprep.mubr.msk.bf16.mxu1 %vm1130_vm0, %v1129_v0 }
  0x5e   :  { %1044 = vmatmul.mubr.msk.bf16.gmra.mrb[44].mxu0 %vm205_vm1, %v1126_v24  ;;  %1096 = vmatmul.mubr.msk.bf16.gmra.mrb[44].mxu1 %vm205_vm1, %v1127_v25 }
  0x5f   :  { %1047 = vmatprep.mubr.msk.bf16.mxu0 %vm1130_vm0, %v1129_v0 }
  0x66   :  { %1048 = vmatmul.mubr.msk.bf16.gmra.mrb[48].mxu0 %vm205_vm1, %v1128_v26 }
  0xd9   :  { %v315_v28 = vpop.f32.mrb[0].mxu0  ;;  %v419_v29 = vpop.f32.mrb[0].mxu1 }
  0xda   :  { %v316_v30 = vadd.f32 %v1309_v27, %v315_v28  ;;  %v1001_v31 = vpop.f32.mrb[1].mxu0  ;;  %v420_v32 = vadd.f32 %v1309_v27, %v419_v29  ;;  %v1053_v33 = vpop.f32.mrb[1].mxu1 }
  0xdb   :  { %v318_v34 = vpop.f32.mrb[2].mxu0  ;;  %v422_v35 = vpop.f32.mrb[2].mxu1 }
  0xdc   :  { %v514_v36 = vmax.f32 %v316_v30, 0.0  ;;  %v319_v37 = vadd.f32 %v1309_v27, %v318_v34  ;;  %v1002_v38 = vpop.f32.mrb[3].mxu0  ;;  %v540_v39 = vmax.f32 %v420_v32, 0.0  ;;  %v423_v40 = vadd.f32 %v1309_v27, %v422_v35  ;;  %v1054_v41 = vpop.f32.mrb[3].mxu1 }
  0xde   :  { %v921_v42 = vpack.c.bf16 %v514_v36, %v514_v36  ;;  %v515_v43 = vmax.f32 %v319_v37, 0.0  ;;  %v947_v44 = vpack.c.bf16 %v540_v39, %v540_v39  ;;  %v541_v45 = vmax.f32 %v423_v40, 0.0 }
  0xe0   :  { %765 = vst.msk [vmem:[%s1564_s3] sm:$0xf] %vm764_vm2, %v921_v42  ;;  %v922_v46 = vpack.c.bf16 %v515_v43, %v515_v43  ;;  %791 = vst.msk [vmem:[%s1564_s3 + $0x68] sm:$0xf] %vm764_vm2, %v947_v44  ;;  %v948_v47 = vpack.c.bf16 %v541_v45, %v541_v45 }
  0xe1   :  { %v323_v48 = vpop.f32.mrb[4].mxu0  ;;  %v427_v49 = vpop.f32.mrb[4].mxu1 }
  0xe2   :  { %766 = vst.msk [vmem:[%s1564_s3 + $0x4] sm:$0xf] %vm764_vm2, %v922_v46  ;;  %792 = vst.msk [vmem:[%s1564_s3 + $0x6c] sm:$0xf] %vm764_vm2, %v948_v47  ;;  %v324_v50 = vadd.f32 %v1309_v27, %v323_v48  ;;  %v1005_v51 = vpop.f32.mrb[5].mxu0  ;;  %v428_v52 = vadd.f32 %v1309_v27, %v427_v49  ;;  %v1057_v53 = vpop.f32.mrb[5].mxu1 }
  0xe3   :  { %v326_v54 = vpop.f32.mrb[6].mxu0  ;;  %v430_v55 = vpop.f32.mrb[6].mxu1 }
  0xe4   :  { %v516_v56 = vmax.f32 %v324_v50, 0.0  ;;  %v327_v57 = vadd.f32 %v1309_v27, %v326_v54  ;;  %v1006_v58 = vpop.f32.mrb[7].mxu0  ;;  %v542_v59 = vmax.f32 %v428_v52, 0.0  ;;  %v431_v60 = vadd.f32 %v1309_v27, %v430_v55  ;;  %v1058_v61 = vpop.f32.mrb[7].mxu1 }
  0xe6   :  { %v923_v62 = vpack.c.bf16 %v516_v56, %v516_v56  ;;  %v517_v63 = vmax.f32 %v327_v57, 0.0  ;;  %v949_v0 = vpack.c.bf16 %v542_v59, %v542_v59  ;;  %v543_v1 = vmax.f32 %v431_v60, 0.0 }
  0xe8   :  { %767 = vst.msk [vmem:[%s1564_s3 + $0x8] sm:$0xf] %vm764_vm2, %v923_v62  ;;  %v924_v2 = vpack.c.bf16 %v517_v63, %v517_v63  ;;  %793 = vst.msk [vmem:[%s1564_s3 + $0x70] sm:$0xf] %vm764_vm2, %v949_v0  ;;  %v950_v3 = vpack.c.bf16 %v543_v1, %v543_v1 }
  0xe9   :  { %v331_v4 = vpop.f32.mrb[8].mxu0  ;;  %v435_v5 = vpop.f32.mrb[8].mxu1 }
  0xea   :  { %768 = vst.msk [vmem:[%s1564_s3 + $0xc] sm:$0xf] %vm764_vm2, %v924_v2  ;;  %794 = vst.msk [vmem:[%s1564_s3 + $0x74] sm:$0xf] %vm764_vm2, %v950_v3  ;;  %v332_v6 = vadd.f32 %v1309_v27, %v331_v4  ;;  %v1009_v7 = vpop.f32.mrb[9].mxu0  ;;  %v436_v8 = vadd.f32 %v1309_v27, %v435_v5  ;;  %v1061_v9 = vpop.f32.mrb[9].mxu1 }
  0xeb   :  { %v334_v10 = vpop.f32.mrb[10].mxu0  ;;  %v438_v11 = vpop.f32.mrb[10].mxu1 }
  0xec   :  { %v518_v12 = vmax.f32 %v332_v6, 0.0  ;;  %v335_v13 = vadd.f32 %v1309_v27, %v334_v10  ;;  %v1010_v14 = vpop.f32.mrb[11].mxu0  ;;  %v544_v15 = vmax.f32 %v436_v8, 0.0  ;;  %v439_v16 = vadd.f32 %v1309_v27, %v438_v11  ;;  %v1062_v17 = vpop.f32.mrb[11].mxu1 }
  0xee   :  { %v925_v18 = vpack.c.bf16 %v518_v12, %v518_v12  ;;  %v519_v19 = vmax.f32 %v335_v13, 0.0  ;;  %v951_v20 = vpack.c.bf16 %v544_v15, %v544_v15  ;;  %v545_v21 = vmax.f32 %v439_v16, 0.0 }
  0xf0   :  { %769 = vst.msk [vmem:[%s1564_s3 + $0x10] sm:$0xf] %vm764_vm2, %v925_v18  ;;  %v926_v22 = vpack.c.bf16 %v519_v19, %v519_v19  ;;  %795 = vst.msk [vmem:[%s1564_s3 + $0x78] sm:$0xf] %vm764_vm2, %v951_v20  ;;  %v952_v23 = vpack.c.bf16 %v545_v21, %v545_v21 }
  0xf1   :  { %v339_v24 = vpop.f32.mrb[12].mxu0  ;;  %v443_v25 = vpop.f32.mrb[12].mxu1 }
  0xf2   :  { %770 = vst.msk [vmem:[%s1564_s3 + $0x14] sm:$0xf] %vm764_vm2, %v926_v22  ;;  %796 = vst.msk [vmem:[%s1564_s3 + $0x7c] sm:$0xf] %vm764_vm2, %v952_v23  ;;  %v340_v26 = vadd.f32 %v1309_v27, %v339_v24  ;;  %v1013_v28 = vpop.f32.mrb[13].mxu0  ;;  %v444_v29 = vadd.f32 %v1309_v27, %v443_v25  ;;  %v1065_v30 = vpop.f32.mrb[13].mxu1 }
  0xf3   :  { %v342_v31 = vpop.f32.mrb[14].mxu0  ;;  %v446_v32 = vpop.f32.mrb[14].mxu1 }
  0xf4   :  { %v520_v33 = vmax.f32 %v340_v26, 0.0  ;;  %v343_v34 = vadd.f32 %v1309_v27, %v342_v31  ;;  %v1014_v35 = vpop.f32.mrb[15].mxu0  ;;  %v546_v36 = vmax.f32 %v444_v29, 0.0  ;;  %v447_v37 = vadd.f32 %v1309_v27, %v446_v32  ;;  %v1066_v38 = vpop.f32.mrb[15].mxu1 }
  0xf6   :  { %v927_v39 = vpack.c.bf16 %v520_v33, %v520_v33  ;;  %v521_v40 = vmax.f32 %v343_v34, 0.0  ;;  %v953_v41 = vpack.c.bf16 %v546_v36, %v546_v36  ;;  %v547_v42 = vmax.f32 %v447_v37, 0.0 }
  0xf8   :  { %771 = vst.msk [vmem:[%s1564_s3 + $0x18] sm:$0xf] %vm764_vm2, %v927_v39  ;;  %v928_v43 = vpack.c.bf16 %v521_v40, %v521_v40  ;;  %797 = vst.msk [vmem:[%s1564_s3 + $0x80] sm:$0xf] %vm764_vm2, %v953_v41  ;;  %v954_v44 = vpack.c.bf16 %v547_v42, %v547_v42 }
  0xf9   :  { %v347_v45 = vpop.f32.mrb[16].mxu0  ;;  %v451_v46 = vpop.f32.mrb[16].mxu1 }
  0xfa   :  { %772 = vst.msk [vmem:[%s1564_s3 + $0x1c] sm:$0xf] %vm764_vm2, %v928_v43  ;;  %798 = vst.msk [vmem:[%s1564_s3 + $0x84] sm:$0xf] %vm764_vm2, %v954_v44  ;;  %v348_v47 = vadd.f32 %v1309_v27, %v347_v45  ;;  %v1017_v48 = vpop.f32.mrb[17].mxu0  ;;  %v452_v49 = vadd.f32 %v1309_v27, %v451_v46  ;;  %v1069_v50 = vpop.f32.mrb[17].mxu1 }
  0xfb   :  { %v350_v51 = vpop.f32.mrb[18].mxu0  ;;  %v454_v52 = vpop.f32.mrb[18].mxu1 }
  0xfc   :  { %v522_v53 = vmax.f32 %v348_v47, 0.0  ;;  %v351_v54 = vadd.f32 %v1309_v27, %v350_v51  ;;  %v1018_v55 = vpop.f32.mrb[19].mxu0  ;;  %v548_v56 = vmax.f32 %v452_v49, 0.0  ;;  %v455_v57 = vadd.f32 %v1309_v27, %v454_v52  ;;  %v1070_v58 = vpop.f32.mrb[19].mxu1 }
  0xfe   :  { %v929_v59 = vpack.c.bf16 %v522_v53, %v522_v53  ;;  %v523_v60 = vmax.f32 %v351_v54, 0.0  ;;  %v955_v61 = vpack.c.bf16 %v548_v56, %v548_v56  ;;  %v549_v62 = vmax.f32 %v455_v57, 0.0 }
 0x100   :  { %773 = vst.msk [vmem:[%s1564_s3 + $0x20] sm:$0xf] %vm764_vm2, %v929_v59  ;;  %v930_v63 = vpack.c.bf16 %v523_v60, %v523_v60  ;;  %799 = vst.msk [vmem:[%s1564_s3 + $0x88] sm:$0xf] %vm764_vm2, %v955_v61  ;;  %v956_v0 = vpack.c.bf16 %v549_v62, %v549_v62 }
 0x101   :  { %v355_v1 = vpop.f32.mrb[20].mxu0  ;;  %v459_v2 = vpop.f32.mrb[20].mxu1 }
 0x102   :  { %774 = vst.msk [vmem:[%s1564_s3 + $0x24] sm:$0xf] %vm764_vm2, %v930_v63  ;;  %800 = vst.msk [vmem:[%s1564_s3 + $0x8c] sm:$0xf] %vm764_vm2, %v956_v0  ;;  %v356_v3 = vadd.f32 %v1309_v27, %v355_v1  ;;  %v1021_v4 = vpop.f32.mrb[21].mxu0  ;;  %v460_v5 = vadd.f32 %v1309_v27, %v459_v2  ;;  %v1073_v6 = vpop.f32.mrb[21].mxu1 }
 0x103   :  { %v358_v7 = vpop.f32.mrb[22].mxu0  ;;  %v462_v8 = vpop.f32.mrb[22].mxu1 }
 0x104   :  { %v524_v9 = vmax.f32 %v356_v3, 0.0  ;;  %v359_v10 = vadd.f32 %v1309_v27, %v358_v7  ;;  %v1022_v11 = vpop.f32.mrb[23].mxu0  ;;  %v550_v12 = vmax.f32 %v460_v5, 0.0  ;;  %v463_v13 = vadd.f32 %v1309_v27, %v462_v8  ;;  %v1074_v14 = vpop.f32.mrb[23].mxu1 }
 0x106   :  { %v931_v15 = vpack.c.bf16 %v524_v9, %v524_v9  ;;  %v525_v16 = vmax.f32 %v359_v10, 0.0  ;;  %v957_v17 = vpack.c.bf16 %v550_v12, %v550_v12  ;;  %v551_v18 = vmax.f32 %v463_v13, 0.0 }
 0x108   :  { %775 = vst.msk [vmem:[%s1564_s3 + $0x28] sm:$0xf] %vm764_vm2, %v931_v15  ;;  %v932_v19 = vpack.c.bf16 %v525_v16, %v525_v16  ;;  %801 = vst.msk [vmem:[%s1564_s3 + $0x90] sm:$0xf] %vm764_vm2, %v957_v17  ;;  %v958_v20 = vpack.c.bf16 %v551_v18, %v551_v18 }
 0x109   :  { %v363_v21 = vpop.f32.mrb[24].mxu0  ;;  %v467_v22 = vpop.f32.mrb[24].mxu1 }
 0x10a   :  { %776 = vst.msk [vmem:[%s1564_s3 + $0x2c] sm:$0xf] %vm764_vm2, %v932_v19  ;;  %802 = vst.msk [vmem:[%s1564_s3 + $0x94] sm:$0xf] %vm764_vm2, %v958_v20  ;;  %v364_v23 = vadd.f32 %v1309_v27, %v363_v21  ;;  %v1025_v24 = vpop.f32.mrb[25].mxu0  ;;  %v468_v25 = vadd.f32 %v1309_v27, %v467_v22  ;;  %v1077_v26 = vpop.f32.mrb[25].mxu1 }
 0x10b   :  { %v366_v28 = vpop.f32.mrb[26].mxu0  ;;  %v470_v29 = vpop.f32.mrb[26].mxu1 }
 0x10c   :  { %v526_v30 = vmax.f32 %v364_v23, 0.0  ;;  %v367_v31 = vadd.f32 %v1309_v27, %v366_v28  ;;  %v1026_v32 = vpop.f32.mrb[27].mxu0  ;;  %v552_v33 = vmax.f32 %v468_v25, 0.0  ;;  %v471_v34 = vadd.f32 %v1309_v27, %v470_v29  ;;  %v1078_v35 = vpop.f32.mrb[27].mxu1 }
 0x10e   :  { %v933_v36 = vpack.c.bf16 %v526_v30, %v526_v30  ;;  %v527_v37 = vmax.f32 %v367_v31, 0.0  ;;  %v959_v38 = vpack.c.bf16 %v552_v33, %v552_v33  ;;  %v553_v39 = vmax.f32 %v471_v34, 0.0 }
 0x110   :  { %777 = vst.msk [vmem:[%s1564_s3 + $0x30] sm:$0xf] %vm764_vm2, %v933_v36  ;;  %v934_v40 = vpack.c.bf16 %v527_v37, %v527_v37  ;;  %803 = vst.msk [vmem:[%s1564_s3 + $0x98] sm:$0xf] %vm764_vm2, %v959_v38  ;;  %v960_v41 = vpack.c.bf16 %v553_v39, %v553_v39 }
 0x111   :  { %v371_v42 = vpop.f32.mrb[28].mxu0  ;;  %v475_v43 = vpop.f32.mrb[28].mxu1 }
 0x112   :  { %778 = vst.msk [vmem:[%s1564_s3 + $0x34] sm:$0xf] %vm764_vm2, %v934_v40  ;;  %804 = vst.msk [vmem:[%s1564_s3 + $0x9c] sm:$0xf] %vm764_vm2, %v960_v41  ;;  %v372_v44 = vadd.f32 %v1309_v27, %v371_v42  ;;  %v1029_v45 = vpop.f32.mrb[29].mxu0  ;;  %v476_v46 = vadd.f32 %v1309_v27, %v475_v43  ;;  %v1081_v47 = vpop.f32.mrb[29].mxu1 }
 0x113   :  { %v374_v48 = vpop.f32.mrb[30].mxu0  ;;  %v478_v49 = vpop.f32.mrb[30].mxu1 }
 0x114   :  { %v528_v50 = vmax.f32 %v372_v44, 0.0  ;;  %v375_v51 = vadd.f32 %v1309_v27, %v374_v48  ;;  %v1030_v52 = vpop.f32.mrb[31].mxu0  ;;  %v554_v53 = vmax.f32 %v476_v46, 0.0  ;;  %v479_v54 = vadd.f32 %v1309_v27, %v478_v49  ;;  %v1082_v55 = vpop.f32.mrb[31].mxu1 }
 0x116   :  { %v935_v56 = vpack.c.bf16 %v528_v50, %v528_v50  ;;  %v529_v57 = vmax.f32 %v375_v51, 0.0  ;;  %v961_v58 = vpack.c.bf16 %v554_v53, %v554_v53  ;;  %v555_v59 = vmax.f32 %v479_v54, 0.0 }
 0x118   :  { %779 = vst.msk [vmem:[%s1564_s3 + $0x38] sm:$0xf] %vm764_vm2, %v935_v56  ;;  %v936_v60 = vpack.c.bf16 %v529_v57, %v529_v57  ;;  %805 = vst.msk [vmem:[%s1564_s3 + $0xa0] sm:$0xf] %vm764_vm2, %v961_v58  ;;  %v962_v61 = vpack.c.bf16 %v555_v59, %v555_v59 }
 0x119   :  { %v379_v62 = vpop.f32.mrb[32].mxu0  ;;  %v483_v63 = vpop.f32.mrb[32].mxu1 }
 0x11a   :  { %780 = vst.msk [vmem:[%s1564_s3 + $0x3c] sm:$0xf] %vm764_vm2, %v936_v60  ;;  %806 = vst.msk [vmem:[%s1564_s3 + $0xa4] sm:$0xf] %vm764_vm2, %v962_v61  ;;  %v380_v0 = vadd.f32 %v1309_v27, %v379_v62  ;;  %v1033_v1 = vpop.f32.mrb[33].mxu0  ;;  %v484_v2 = vadd.f32 %v1309_v27, %v483_v63  ;;  %v1085_v3 = vpop.f32.mrb[33].mxu1 }
 0x11b   :  { %v382_v4 = vpop.f32.mrb[34].mxu0  ;;  %v486_v5 = vpop.f32.mrb[34].mxu1 }
 0x11c   :  { %v530_v6 = vmax.f32 %v380_v0, 0.0  ;;  %v383_v7 = vadd.f32 %v1309_v27, %v382_v4  ;;  %v1034_v8 = vpop.f32.mrb[35].mxu0  ;;  %v556_v9 = vmax.f32 %v484_v2, 0.0  ;;  %v487_v10 = vadd.f32 %v1309_v27, %v486_v5  ;;  %v1086_v11 = vpop.f32.mrb[35].mxu1 }
 0x11e   :  { %v937_v12 = vpack.c.bf16 %v530_v6, %v530_v6  ;;  %v531_v13 = vmax.f32 %v383_v7, 0.0  ;;  %v963_v14 = vpack.c.bf16 %v556_v9, %v556_v9  ;;  %v557_v15 = vmax.f32 %v487_v10, 0.0 }
 0x120   :  { %781 = vst.msk [vmem:[%s1564_s3 + $0x40] sm:$0xf] %vm764_vm2, %v937_v12  ;;  %v938_v16 = vpack.c.bf16 %v531_v13, %v531_v13  ;;  %807 = vst.msk [vmem:[%s1564_s3 + $0xa8] sm:$0xf] %vm764_vm2, %v963_v14  ;;  %v964_v17 = vpack.c.bf16 %v557_v15, %v557_v15 }
 0x121   :  { %v387_v18 = vpop.f32.mrb[36].mxu0  ;;  %v491_v19 = vpop.f32.mrb[36].mxu1 }
 0x122   :  { %782 = vst.msk [vmem:[%s1564_s3 + $0x44] sm:$0xf] %vm764_vm2, %v938_v16  ;;  %808 = vst.msk [vmem:[%s1564_s3 + $0xac] sm:$0xf] %vm764_vm2, %v964_v17  ;;  %v388_v20 = vadd.f32 %v1309_v27, %v387_v18  ;;  %v1037_v21 = vpop.f32.mrb[37].mxu0  ;;  %v492_v22 = vadd.f32 %v1309_v27, %v491_v19  ;;  %v1089_v23 = vpop.f32.mrb[37].mxu1 }
 0x123   :  { %v390_v24 = vpop.f32.mrb[38].mxu0  ;;  %v494_v25 = vpop.f32.mrb[38].mxu1 }
 0x124   :  { %v532_v26 = vmax.f32 %v388_v20, 0.0  ;;  %v391_v28 = vadd.f32 %v1309_v27, %v390_v24  ;;  %v1038_v29 = vpop.f32.mrb[39].mxu0  ;;  %v558_v30 = vmax.f32 %v492_v22, 0.0  ;;  %v495_v31 = vadd.f32 %v1309_v27, %v494_v25  ;;  %v1090_v32 = vpop.f32.mrb[39].mxu1 }
 0x126   :  { %v939_v33 = vpack.c.bf16 %v532_v26, %v532_v26  ;;  %v533_v34 = vmax.f32 %v391_v28, 0.0  ;;  %v965_v35 = vpack.c.bf16 %v558_v30, %v558_v30  ;;  %v559_v36 = vmax.f32 %v495_v31, 0.0 }
 0x128   :  { %783 = vst.msk [vmem:[%s1564_s3 + $0x48] sm:$0xf] %vm764_vm2, %v939_v33  ;;  %v940_v37 = vpack.c.bf16 %v533_v34, %v533_v34  ;;  %809 = vst.msk [vmem:[%s1564_s3 + $0xb0] sm:$0xf] %vm764_vm2, %v965_v35  ;;  %v966_v38 = vpack.c.bf16 %v559_v36, %v559_v36 }
 0x129   :  { %v395_v39 = vpop.f32.mrb[40].mxu0  ;;  %v499_v40 = vpop.f32.mrb[40].mxu1 }
 0x12a   :  { %784 = vst.msk [vmem:[%s1564_s3 + $0x4c] sm:$0xf] %vm764_vm2, %v940_v37  ;;  %810 = vst.msk [vmem:[%s1564_s3 + $0xb4] sm:$0xf] %vm764_vm2, %v966_v38  ;;  %v396_v41 = vadd.f32 %v1309_v27, %v395_v39  ;;  %v1041_v42 = vpop.f32.mrb[41].mxu0  ;;  %v500_v43 = vadd.f32 %v1309_v27, %v499_v40  ;;  %v1093_v44 = vpop.f32.mrb[41].mxu1 }
 0x12b   :  { %v398_v45 = vpop.f32.mrb[42].mxu0  ;;  %v502_v46 = vpop.f32.mrb[42].mxu1 }
 0x12c   :  { %v534_v47 = vmax.f32 %v396_v41, 0.0  ;;  %v399_v48 = vadd.f32 %v1309_v27, %v398_v45  ;;  %v1042_v49 = vpop.f32.mrb[43].mxu0  ;;  %v560_v50 = vmax.f32 %v500_v43, 0.0  ;;  %v503_v51 = vadd.f32 %v1309_v27, %v502_v46  ;;  %v1094_v52 = vpop.f32.mrb[43].mxu1 }
 0x12e   :  { %v941_v53 = vpack.c.bf16 %v534_v47, %v534_v47  ;;  %v535_v54 = vmax.f32 %v399_v48, 0.0  ;;  %v967_v55 = vpack.c.bf16 %v560_v50, %v560_v50  ;;  %v561_v56 = vmax.f32 %v503_v51, 0.0 }
 0x130   :  { %785 = vst.msk [vmem:[%s1564_s3 + $0x50] sm:$0xf] %vm764_vm2, %v941_v53  ;;  %v942_v57 = vpack.c.bf16 %v535_v54, %v535_v54  ;;  %811 = vst.msk [vmem:[%s1564_s3 + $0xb8] sm:$0xf] %vm764_vm2, %v967_v55  ;;  %v968_v58 = vpack.c.bf16 %v561_v56, %v561_v56 }
 0x131   :  { %v403_v59 = vpop.f32.mrb[44].mxu0  ;;  %v507_v60 = vpop.f32.mrb[44].mxu1 }
 0x132   :  { %786 = vst.msk [vmem:[%s1564_s3 + $0x54] sm:$0xf] %vm764_vm2, %v942_v57  ;;  %812 = vst.msk [vmem:[%s1564_s3 + $0xbc] sm:$0xf] %vm764_vm2, %v968_v58  ;;  %v404_v61 = vadd.f32 %v1309_v27, %v403_v59  ;;  %v1045_v62 = vpop.f32.mrb[45].mxu0  ;;  %v508_v63 = vadd.f32 %v1309_v27, %v507_v60  ;;  %v1097_v0 = vpop.f32.mrb[45].mxu1 }
 0x133   :  { %v406_v1 = vpop.f32.mrb[46].mxu0  ;;  %v510_v2 = vpop.f32.mrb[46].mxu1 }
 0x134   :  { %v536_v3 = vmax.f32 %v404_v61, 0.0  ;;  %v407_v4 = vadd.f32 %v1309_v27, %v406_v1  ;;  %v1046_v5 = vpop.f32.mrb[47].mxu0  ;;  %v562_v6 = vmax.f32 %v508_v63, 0.0  ;;  %v511_v7 = vadd.f32 %v1309_v27, %v510_v2  ;;  %v1098_v8 = vpop.f32.mrb[47].mxu1 }
 0x136   :  { %v943_v9 = vpack.c.bf16 %v536_v3, %v536_v3  ;;  %v537_v10 = vmax.f32 %v407_v4, 0.0  ;;  %v969_v11 = vpack.c.bf16 %v562_v6, %v562_v6  ;;  %v563_v12 = vmax.f32 %v511_v7, 0.0 }
 0x138   :  { %787 = vst.msk [vmem:[%s1564_s3 + $0x58] sm:$0xf] %vm764_vm2, %v943_v9  ;;  %v944_v13 = vpack.c.bf16 %v537_v10, %v537_v10  ;;  %813 = vst.msk [vmem:[%s1564_s3 + $0xc0] sm:$0xf] %vm764_vm2, %v969_v11  ;;  %v970_v14 = vpack.c.bf16 %v563_v12, %v563_v12 }
 0x139   :  { %v411_v15 = vpop.f32.mrb[48].mxu0 }
 0x13a   :  { %788 = vst.msk [vmem:[%s1564_s3 + $0x5c] sm:$0xf] %vm764_vm2, %v944_v13  ;;  %814 = vst.msk [vmem:[%s1564_s3 + $0xc4] sm:$0xf] %vm764_vm2, %v970_v14  ;;  %v412_v16 = vadd.f32 %v1309_v27, %v411_v15  ;;  %v1049_v17 = vpop.f32.mrb[49].mxu0 }
 0x13b   :  { %v414_v18 = vpop.f32.mrb[50].mxu0 }
 0x13c   :  { %v538_v19 = vmax.f32 %v412_v16, 0.0  ;;  %v415_v20 = vadd.f32 %v1309_v27, %v414_v18  ;;  %v1050_v21 = vpop.f32.mrb[51].mxu0 }
 0x13e   :  { %v945_v22 = vpack.c.bf16 %v538_v19, %v538_v19  ;;  %v539_v23 = vmax.f32 %v415_v20, 0.0 }
 0x140   :  { %789 = vst.msk [vmem:[%s1564_s3 + $0x60] sm:$0xf] %vm764_vm2, %v945_v22  ;;  %v946_v24 = vpack.c.bf16 %v539_v23, %v539_v23 }
 0x142   :  { %790 = vst.msk [vmem:[%s1564_s3 + $0x64] sm:$0xf] %vm764_vm2, %v946_v24 }

// kernel: cnn_autoencoder_forward.6
= control target key start
LH: loop header
LB: loop body
LE: loop exit
PB: predicated region body
PF: predicated region fallthrough
CT: control target
= control target key end

     0   :  { %v810_v1 = vmov 0.0   ;;  %vm811_vm0 = vmmov 0   ;;  %vm299_vm1 = vcmask 261120   ;;  %vm569_vm2 = vcmask 519168   ;;  %s1047_s1 = inlined_call_operand.vmem [shape: bf16[288,64], index: 1, kind: input, shape index: {}]   ;;  %s1048_s0 = inlined_call_operand.vmem [shape: bf16[112,288], index: 0, kind: input, shape index: {}]   ;;  %s1049_s2 = inlined_call_operand.vmem [shape: f32[1,64], index: 2, kind: input, shape index: {}]   ;;  %s1050_s3 = inlined_call_operand.vmem [shape: bf16[112,64], index: 3, kind: output, shape index: {}]  }
   0x1   :  { %v764_v0 = vld [vmem:[%s1047_s1 + $0x40] sm:$0xff]   ;;  %730 = vmatprep.subr.bf16.mxu1 %v810_v1  ;;  %734 = vmatprep.mubr.msk.bf16.mxu1 %vm811_vm0, %v810_v1  ;;  %v766_v3 = vld [vmem:[%s1047_s1 + $0x48] sm:$0xff]   ;;  %v768_v5 = vld [vmem:[%s1047_s1 + $0x50] sm:$0xff]  }
   0x2   :  { %v765_v2 = vld [vmem:[%s1047_s1] sm:$0xff]   ;;  %663 = vmatprep.subr.bf16.mxu0 %v764_v0  ;;  %v767_v4 = vld [vmem:[%s1047_s1 + $0x8] sm:$0xff]   ;;  %v769_v6 = vld [vmem:[%s1047_s1 + $0x10] sm:$0xff]  }
   0x3   :  { %664 = vmatpush3.bf16.msra.mxu0 %v765_v2  ;;  %v770_v7 = vld [vmem:[%s1047_s1 + $0x58] sm:$0xff]   ;;  %v772_v9 = vld [vmem:[%s1047_s1 + $0x60] sm:$0xff]   ;;  %v774_v12 = vld [vmem:[%s1047_s1 + $0x68] sm:$0xff]  }
   0x4   :  { %665 = vmatprep.subr.bf16.mxu0 %v766_v3  ;;  %v771_v8 = vld [vmem:[%s1047_s1 + $0x18] sm:$0xff]   ;;  %v778_v10 = vld [vmem:[%s1047_s1 + $0x80] sm:$0xff]   ;;  %v775_v13 = vld [vmem:[%s1047_s1 + $0x28] sm:$0xff]  }
   0x5   :  { %v773_v11 = vld [vmem:[%s1047_s1 + $0x20] sm:$0xff]   ;;  %731 = vmatpush3.bf16.msra.mxu1 %v778_v10  ;;  %v776_v14 = vld [vmem:[%s1047_s1 + $0x70] sm:$0xff]   ;;  %v784_v16 = vld [vmem:[%s1047_s1 + $0x88] sm:$0xff]  }
   0x6   :  { %732 = vmatprep.subr.bf16.mxu1 %v810_v1  ;;  %v783_v15 = vld [vmem:[%s1048_s0 + $0x4] ss:$12 sps:$4 sm:$0xff]   ;;  %v785_v17 = vld [vmem:[%s1048_s0 + $0x8] ss:$12 sps:$4 sm:$0xff]   ;;  %v779_v19 = vld [vmem:[%s1047_s1 + $0x78] sm:$0xff]  }
   0x7   :  { %666 = vmatpush3.bf16.msra.mxu0 %v767_v4  ;;  %353 = vmatprep.mubr.bf16.mxu0 %v783_v15  ;;  %v777_v18 = vld [vmem:[%s1047_s1 + $0x30] sm:$0xff]   ;;  %v780_v20 = vld [vmem:[%s1047_s1 + $0x38] sm:$0xff]   ;;  %v789_v21 = vld [vmem:[%s1048_s0 + $0x20] ss:$12 sps:$4 sm:$0xff]  }
   0x8   :  { %667 = vmatprep.subr.bf16.mxu0 %v768_v5  ;;  %v781_v22 = vld [vmem:[%s1048_s0] ss:$12 sps:$4 sm:$0xff]   ;;  %v786_v23 = vld [vmem:[%s1048_s0 + $0x1c] ss:$12 sps:$4 sm:$0xff]   ;;  %v793_v24 = vld [vmem:[%s1048_s0 + $0x38] ss:$12 sps:$4 sm:$0xff]  }
   0x9   :  { %733 = vmatpush3.bf16.msra.mxu1 %v784_v16  ;;  %v788_v25 = vld [vmem:[%s1048_s0 + $0x18] ss:$12 sps:$4 sm:$0xff]   ;;  %v790_v26 = vld [vmem:[%s1048_s0 + $0x34] ss:$12 sps:$4 sm:$0xff]   ;;  %v797_v27 = vld [vmem:[%s1048_s0 + $0x50] ss:$12 sps:$4 sm:$0xff]  }
   0xa   :  { %v792_v28 = vld [vmem:[%s1048_s0 + $0x30] ss:$12 sps:$4 sm:$0xff]   ;;  %v794_v29 = vld [vmem:[%s1048_s0 + $0x4c] ss:$12 sps:$4 sm:$0xff]   ;;  %v801_v30 = vld [vmem:[%s1048_s0 + $0x68] ss:$12 sps:$4 sm:$0xff]  }
   0xb   :  { %668 = vmatpush3.bf16.msra.mxu0 %v769_v6  ;;  %v796_v31 = vld [vmem:[%s1048_s0 + $0x48] ss:$12 sps:$4 sm:$0xff]   ;;  %v798_v32 = vld [vmem:[%s1048_s0 + $0x64] ss:$12 sps:$4 sm:$0xff]   ;;  %v805_v33 = vld [vmem:[%s1048_s0 + $0x80] ss:$12 sps:$4 sm:$0xff]  }
   0xc   :  { %669 = vmatprep.subr.bf16.mxu0 %v770_v7  ;;  %735 = vmatmul.mubr.msk.bf16.vlgmr.msra.gmra.mrb[0].mxu1 %vm299_vm1, %v785_v17  ;;  %v800_v34 = vld [vmem:[%s1048_s0 + $0x60] ss:$12 sps:$4 sm:$0xff]   ;;  %v802_v35 = vld [vmem:[%s1048_s0 + $0x7c] ss:$12 sps:$4 sm:$0xff]   ;;  %v809_v36 = vld [vmem:[%s1048_s0 + $0x98] ss:$12 sps:$4 sm:$0xff]  }
   0xd   :  { %738 = vmatprep.mubr.msk.bf16.mxu1 %vm811_vm0, %v810_v1  ;;  %v804_v37 = vld [vmem:[%s1048_s0 + $0x78] ss:$12 sps:$4 sm:$0xff]   ;;  %v806_v38 = vld [vmem:[%s1048_s0 + $0x94] ss:$12 sps:$4 sm:$0xff]   ;;  %v808_v39 = vld [vmem:[%s1048_s0 + $0x90] ss:$12 sps:$4 sm:$0xff]  }
   0xe   :  { %v975_v49 = vld [vmem:[%s1049_s2] ss:$0 sm:$0xff] }
   0xf   :  { %670 = vmatpush3.bf16.msra.mxu0 %v771_v8 }
  0x10   :  { %671 = vmatprep.subr.bf16.mxu0 %v772_v9 }
  0x13   :  { %672 = vmatpush3.bf16.msra.mxu0 %v773_v11 }
  0x14   :  { %673 = vmatprep.subr.bf16.mxu0 %v774_v12  ;;  %739 = vmatmul.mubr.msk.bf16.gmra.mrb[4].mxu1 %vm299_vm1, %v789_v21 }
  0x15   :  { %742 = vmatprep.mubr.msk.bf16.mxu1 %vm811_vm0, %v810_v1 }
  0x17   :  { %674 = vmatpush3.bf16.msra.mxu0 %v775_v13 }
  0x18   :  { %675 = vmatprep.subr.bf16.mxu0 %v776_v14 }
  0x1b   :  { %676 = vmatpush3.bf16.msra.mxu0 %v777_v18 }
  0x1c   :  { %677 = vmatprep.subr.bf16.mxu0 %v779_v19  ;;  %743 = vmatmul.mubr.msk.bf16.gmra.mrb[8].mxu1 %vm299_vm1, %v793_v24 }
  0x1d   :  { %746 = vmatprep.mubr.msk.bf16.mxu1 %vm811_vm0, %v810_v1 }
  0x1f   :  { %678 = vmatpush3.bf16.msra.mxu0 %v780_v20 }
  0x22   :  { %354 = vmatmul.mubr.bf16.vlgmr.msra.gmra.mrb[0].mxu0 %v781_v22 }
  0x23   :  { %361 = vmatprep.mubr.bf16.mxu0 %v786_v23 }
  0x24   :  { %747 = vmatmul.mubr.msk.bf16.gmra.mrb[12].mxu1 %vm299_vm1, %v797_v27 }
  0x25   :  { %750 = vmatprep.mubr.msk.bf16.mxu1 %vm811_vm0, %v810_v1 }
  0x2a   :  { %362 = vmatmul.mubr.bf16.gmra.mrb[4].mxu0 %v788_v25 }
  0x2b   :  { %369 = vmatprep.mubr.bf16.mxu0 %v790_v26 }
  0x2c   :  { %751 = vmatmul.mubr.msk.bf16.gmra.mrb[16].mxu1 %vm299_vm1, %v801_v30 }
  0x2d   :  { %754 = vmatprep.mubr.msk.bf16.mxu1 %vm811_vm0, %v810_v1 }
  0x32   :  { %370 = vmatmul.mubr.bf16.gmra.mrb[8].mxu0 %v792_v28 }
  0x33   :  { %377 = vmatprep.mubr.bf16.mxu0 %v794_v29 }
  0x34   :  { %755 = vmatmul.mubr.msk.bf16.gmra.mrb[20].mxu1 %vm299_vm1, %v805_v33 }
  0x35   :  { %758 = vmatprep.mubr.msk.bf16.mxu1 %vm811_vm0, %v810_v1 }
  0x3a   :  { %378 = vmatmul.mubr.bf16.gmra.mrb[12].mxu0 %v796_v31 }
  0x3b   :  { %385 = vmatprep.mubr.bf16.mxu0 %v798_v32 }
  0x3c   :  { %759 = vmatmul.mubr.msk.bf16.gmra.mrb[24].mxu1 %vm299_vm1, %v809_v36 }
  0x42   :  { %386 = vmatmul.mubr.bf16.gmra.mrb[16].mxu0 %v800_v34 }
  0x43   :  { %393 = vmatprep.mubr.bf16.mxu0 %v802_v35 }
  0x4a   :  { %394 = vmatmul.mubr.bf16.gmra.mrb[20].mxu0 %v804_v37 }
  0x4b   :  { %401 = vmatprep.mubr.bf16.mxu0 %v806_v38 }
  0x52   :  { %402 = vmatmul.mubr.bf16.gmra.mrb[24].mxu0 %v808_v39 }
  0xdf   :  { %v444_v40 = vpop.f32.mrb[0].mxu1 }
  0xe0   :  { %v736_v41 = vpop.f32.mrb[1].mxu1 }
  0xe1   :  { %v447_v42 = vpop.f32.mrb[2].mxu1 }
  0xe2   :  { %v737_v43 = vpop.f32.mrb[3].mxu1 }
  0xe7   :  { %v452_v44 = vpop.f32.mrb[4].mxu1 }
  0xe8   :  { %v740_v45 = vpop.f32.mrb[5].mxu1 }
  0xe9   :  { %v455_v47 = vpop.f32.mrb[6].mxu1 }
  0xea   :  { %v741_v50 = vpop.f32.mrb[7].mxu1 }
  0xef   :  { %v460_v58 = vpop.f32.mrb[8].mxu1 }
  0xf0   :  { %v744_v59 = vpop.f32.mrb[9].mxu1 }
  0xf1   :  { %v463_v63 = vpop.f32.mrb[10].mxu1 }
  0xf2   :  { %v745_v1 = vpop.f32.mrb[11].mxu1 }
  0xf5   :  { %v679_v46 = vpop.f32.mrb[0].mxu0 }
  0xf6   :  { %v680_v48 = vpop.f32.mrb[1].mxu0 }
  0xf7   :  { %v681_v51 = vadd.f32 %v680_v48, %v679_v46  ;;  %v682_v52 = vpop.f32.mrb[2].mxu0  ;;  %v468_v12 = vpop.f32.mrb[12].mxu1 }
  0xf8   :  { %v683_v53 = vpop.f32.mrb[3].mxu0  ;;  %v748_v13 = vpop.f32.mrb[13].mxu1 }
  0xf9   :  { %v356_v54 = vadd.f32 %v681_v51, %v975_v49  ;;  %v684_v55 = vadd.f32 %v683_v53, %v682_v52  ;;  %v471_v17 = vpop.f32.mrb[14].mxu1 }
  0xfa   :  { %v749_v19 = vpop.f32.mrb[15].mxu1 }
  0xfb   :  { %v445_v56 = vadd.f32 %v444_v40, %v356_v54  ;;  %v359_v57 = vadd.f32 %v684_v55, %v975_v49 }
  0xfd   :  { %v499_v60 = vmax.f32 %v445_v56, 0.0  ;;  %v448_v61 = vadd.f32 %v447_v42, %v359_v57  ;;  %v685_v62 = vpop.f32.mrb[4].mxu0 }
  0xfe   :  { %v686_v0 = vpop.f32.mrb[5].mxu0 }
  0xff   :  { %v649_v2 = vpack.c.bf16 %v499_v60, %v499_v60  ;;  %v500_v3 = vmax.f32 %v448_v61, 0.0  ;;  %v687_v4 = vadd.f32 %v686_v0, %v685_v62  ;;  %v688_v5 = vpop.f32.mrb[6].mxu0  ;;  %v476_v30 = vpop.f32.mrb[16].mxu1 }
 0x100   :  { %v689_v6 = vpop.f32.mrb[7].mxu0  ;;  %v752_v31 = vpop.f32.mrb[17].mxu1 }
 0x101   :  { %570 = vst.msk [vmem:[%s1050_s3] sm:$0xf] %vm569_vm2, %v649_v2  ;;  %v650_v7 = vpack.c.bf16 %v500_v3, %v500_v3  ;;  %v364_v8 = vadd.f32 %v687_v4, %v975_v49  ;;  %v690_v9 = vadd.f32 %v689_v6, %v688_v5  ;;  %v479_v35 = vpop.f32.mrb[18].mxu1 }
 0x102   :  { %v753_v37 = vpop.f32.mrb[19].mxu1 }
 0x103   :  { %571 = vst.msk [vmem:[%s1050_s3 + $0x4] sm:$0xf] %vm569_vm2, %v650_v7  ;;  %v453_v10 = vadd.f32 %v452_v44, %v364_v8  ;;  %v367_v11 = vadd.f32 %v690_v9, %v975_v49 }
 0x105   :  { %v501_v14 = vmax.f32 %v453_v10, 0.0  ;;  %v456_v15 = vadd.f32 %v455_v47, %v367_v11  ;;  %v691_v16 = vpop.f32.mrb[8].mxu0 }
 0x106   :  { %v692_v18 = vpop.f32.mrb[9].mxu0 }
 0x107   :  { %v651_v20 = vpack.c.bf16 %v501_v14, %v501_v14  ;;  %v502_v21 = vmax.f32 %v456_v15, 0.0  ;;  %v693_v22 = vadd.f32 %v692_v18, %v691_v16  ;;  %v694_v23 = vpop.f32.mrb[10].mxu0  ;;  %v484_v48 = vpop.f32.mrb[20].mxu1 }
 0x108   :  { %v695_v24 = vpop.f32.mrb[11].mxu0  ;;  %v756_v50 = vpop.f32.mrb[21].mxu1 }
 0x109   :  { %572 = vst.msk [vmem:[%s1050_s3 + $0x8] sm:$0xf] %vm569_vm2, %v651_v20  ;;  %v652_v25 = vpack.c.bf16 %v502_v21, %v502_v21  ;;  %v372_v26 = vadd.f32 %v693_v22, %v975_v49  ;;  %v696_v27 = vadd.f32 %v695_v24, %v694_v23  ;;  %v487_v54 = vpop.f32.mrb[22].mxu1 }
 0x10a   :  { %v757_v56 = vpop.f32.mrb[23].mxu1 }
 0x10b   :  { %573 = vst.msk [vmem:[%s1050_s3 + $0xc] sm:$0xf] %vm569_vm2, %v652_v25  ;;  %v461_v28 = vadd.f32 %v460_v58, %v372_v26  ;;  %v375_v29 = vadd.f32 %v696_v27, %v975_v49 }
 0x10d   :  { %v503_v32 = vmax.f32 %v461_v28, 0.0  ;;  %v464_v33 = vadd.f32 %v463_v63, %v375_v29  ;;  %v697_v34 = vpop.f32.mrb[12].mxu0 }
 0x10e   :  { %v698_v36 = vpop.f32.mrb[13].mxu0 }
 0x10f   :  { %v653_v38 = vpack.c.bf16 %v503_v32, %v503_v32  ;;  %v504_v39 = vmax.f32 %v464_v33, 0.0  ;;  %v699_v40 = vadd.f32 %v698_v36, %v697_v34  ;;  %v700_v41 = vpop.f32.mrb[14].mxu0  ;;  %v492_v3 = vpop.f32.mrb[24].mxu1 }
 0x110   :  { %v701_v42 = vpop.f32.mrb[15].mxu0  ;;  %v760_v4 = vpop.f32.mrb[25].mxu1 }
 0x111   :  { %574 = vst.msk [vmem:[%s1050_s3 + $0x10] sm:$0xf] %vm569_vm2, %v653_v38  ;;  %v654_v43 = vpack.c.bf16 %v504_v39, %v504_v39  ;;  %v380_v44 = vadd.f32 %v699_v40, %v975_v49  ;;  %v702_v45 = vadd.f32 %v701_v42, %v700_v41  ;;  %v495_v8 = vpop.f32.mrb[26].mxu1 }
 0x112   :  { %v761_v10 = vpop.f32.mrb[27].mxu1 }
 0x113   :  { %575 = vst.msk [vmem:[%s1050_s3 + $0x14] sm:$0xf] %vm569_vm2, %v654_v43  ;;  %v469_v46 = vadd.f32 %v468_v12, %v380_v44  ;;  %v383_v47 = vadd.f32 %v702_v45, %v975_v49 }
 0x115   :  { %v505_v51 = vmax.f32 %v469_v46, 0.0  ;;  %v472_v52 = vadd.f32 %v471_v17, %v383_v47  ;;  %v703_v53 = vpop.f32.mrb[16].mxu0 }
 0x116   :  { %v704_v55 = vpop.f32.mrb[17].mxu0 }
 0x117   :  { %v655_v57 = vpack.c.bf16 %v505_v51, %v505_v51  ;;  %v506_v58 = vmax.f32 %v472_v52, 0.0  ;;  %v705_v59 = vadd.f32 %v704_v55, %v703_v53  ;;  %v706_v60 = vpop.f32.mrb[18].mxu0 }
 0x118   :  { %v707_v61 = vpop.f32.mrb[19].mxu0 }
 0x119   :  { %576 = vst.msk [vmem:[%s1050_s3 + $0x18] sm:$0xf] %vm569_vm2, %v655_v57  ;;  %v656_v62 = vpack.c.bf16 %v506_v58, %v506_v58  ;;  %v388_v63 = vadd.f32 %v705_v59, %v975_v49  ;;  %v708_v0 = vadd.f32 %v707_v61, %v706_v60 }
 0x11b   :  { %577 = vst.msk [vmem:[%s1050_s3 + $0x1c] sm:$0xf] %vm569_vm2, %v656_v62  ;;  %v477_v1 = vadd.f32 %v476_v30, %v388_v63  ;;  %v391_v2 = vadd.f32 %v708_v0, %v975_v49 }
 0x11d   :  { %v507_v5 = vmax.f32 %v477_v1, 0.0  ;;  %v480_v6 = vadd.f32 %v479_v35, %v391_v2  ;;  %v709_v7 = vpop.f32.mrb[20].mxu0 }
 0x11e   :  { %v710_v9 = vpop.f32.mrb[21].mxu0 }
 0x11f   :  { %v657_v11 = vpack.c.bf16 %v507_v5, %v507_v5  ;;  %v508_v12 = vmax.f32 %v480_v6, 0.0  ;;  %v711_v13 = vadd.f32 %v710_v9, %v709_v7  ;;  %v712_v14 = vpop.f32.mrb[22].mxu0 }
 0x120   :  { %v713_v15 = vpop.f32.mrb[23].mxu0 }
 0x121   :  { %578 = vst.msk [vmem:[%s1050_s3 + $0x20] sm:$0xf] %vm569_vm2, %v657_v11  ;;  %v658_v16 = vpack.c.bf16 %v508_v12, %v508_v12  ;;  %v396_v17 = vadd.f32 %v711_v13, %v975_v49  ;;  %v714_v18 = vadd.f32 %v713_v15, %v712_v14 }
 0x123   :  { %579 = vst.msk [vmem:[%s1050_s3 + $0x24] sm:$0xf] %vm569_vm2, %v658_v16  ;;  %v485_v19 = vadd.f32 %v484_v48, %v396_v17  ;;  %v399_v20 = vadd.f32 %v714_v18, %v975_v49 }
 0x125   :  { %v509_v21 = vmax.f32 %v485_v19, 0.0  ;;  %v488_v22 = vadd.f32 %v487_v54, %v399_v20  ;;  %v715_v23 = vpop.f32.mrb[24].mxu0 }
 0x126   :  { %v716_v24 = vpop.f32.mrb[25].mxu0 }
 0x127   :  { %v659_v25 = vpack.c.bf16 %v509_v21, %v509_v21  ;;  %v510_v26 = vmax.f32 %v488_v22, 0.0  ;;  %v717_v27 = vadd.f32 %v716_v24, %v715_v23  ;;  %v718_v28 = vpop.f32.mrb[26].mxu0 }
 0x128   :  { %v719_v29 = vpop.f32.mrb[27].mxu0 }
 0x129   :  { %580 = vst.msk [vmem:[%s1050_s3 + $0x28] sm:$0xf] %vm569_vm2, %v659_v25  ;;  %v660_v30 = vpack.c.bf16 %v510_v26, %v510_v26  ;;  %v404_v31 = vadd.f32 %v717_v27, %v975_v49  ;;  %v720_v32 = vadd.f32 %v719_v29, %v718_v28 }
 0x12b   :  { %581 = vst.msk [vmem:[%s1050_s3 + $0x2c] sm:$0xf] %vm569_vm2, %v660_v30  ;;  %v493_v33 = vadd.f32 %v492_v3, %v404_v31  ;;  %v407_v34 = vadd.f32 %v720_v32, %v975_v49 }
 0x12d   :  { %v511_v35 = vmax.f32 %v493_v33, 0.0  ;;  %v496_v36 = vadd.f32 %v495_v8, %v407_v34 }
 0x12f   :  { %v661_v37 = vpack.c.bf16 %v511_v35, %v511_v35  ;;  %v512_v38 = vmax.f32 %v496_v36, 0.0 }
 0x131   :  { %582 = vst.msk [vmem:[%s1050_s3 + $0x30] sm:$0xf] %vm569_vm2, %v661_v37  ;;  %v662_v39 = vpack.c.bf16 %v512_v38, %v512_v38 }
 0x133   :  { %583 = vst.msk [vmem:[%s1050_s3 + $0x34] sm:$0xf] %vm569_vm2, %v662_v39 }

// kernel: cnn_autoencoder_forward.8
= control target key start
LH: loop header
LB: loop body
LE: loop exit
PB: predicated region body
PF: predicated region fallthrough
CT: control target
= control target key end

     0   :  { %s772_s1 = inlined_call_operand.vmem [shape: bf16[256,128], index: 1, kind: input, shape index: {}]   ;;  %s773_s0 = inlined_call_operand.vmem [shape: bf16[112,256], index: 0, kind: input, shape index: {}]   ;;  %s774_s2 = inlined_call_operand.vmem [shape: f32[1,128], index: 2, kind: input, shape index: {}]   ;;  %s775_s3 = inlined_call_operand.vmem [shape: bf16[112,128], index: 3, kind: output, shape index: {}]  }
   0x1   :  { %v585_v0 = vld [vmem:[%s772_s1 + $0x40] sm:$0xff]   ;;  %v587_v2 = vld [vmem:[%s772_s1 + $0x48] sm:$0xff]   ;;  %v589_v4 = vld [vmem:[%s772_s1 + $0x50] sm:$0xff]  }
   0x2   :  { %v586_v1 = vld [vmem:[%s772_s1] sm:$0xff]   ;;  %511 = vmatprep.subr.bf16.mxu0 %v585_v0  ;;  %569 = vmatprep.subr.bf16.mxu1 %v585_v0  ;;  %v588_v3 = vld [vmem:[%s772_s1 + $0x8] sm:$0xff]   ;;  %v590_v5 = vld [vmem:[%s772_s1 + $0x10] sm:$0xff]  }
   0x3   :  { %512 = vmatpush3.bf16.msra.mxu0 %v586_v1  ;;  %577 = vmatpush3.bf16.msra.mxu1 %v586_v1  ;;  %v591_v6 = vld [vmem:[%s772_s1 + $0x58] sm:$0xff]   ;;  %v593_v8 = vld [vmem:[%s772_s1 + $0x60] sm:$0xff]   ;;  %v595_v10 = vld [vmem:[%s772_s1 + $0x68] sm:$0xff]  }
   0x4   :  { %513 = vmatprep.subr.bf16.mxu0 %v587_v2  ;;  %570 = vmatprep.subr.bf16.mxu1 %v587_v2  ;;  %v592_v7 = vld [vmem:[%s772_s1 + $0x18] sm:$0xff]   ;;  %v594_v9 = vld [vmem:[%s772_s1 + $0x20] sm:$0xff]   ;;  %v596_v13 = vld [vmem:[%s772_s1 + $0x28] sm:$0xff]  }
   0x5   :  { %v603_v11 = vld [vmem:[%s773_s0 + $0x4] ss:$8 sps:$4 sm:$0xff]   ;;  %v597_v14 = vld [vmem:[%s772_s1 + $0x70] sm:$0xff]   ;;  %v599_v16 = vld [vmem:[%s772_s1 + $0x78] sm:$0xff]  }
   0x6   :  { %v606_v12 = vld [vmem:[%s773_s0 + $0x44] ss:$8 sps:$4 sm:$0xff]   ;;  %266 = vmatprep.mubr.bf16.mxu0 %v603_v11  ;;  %v598_v15 = vld [vmem:[%s772_s1 + $0x30] sm:$0xff]   ;;  %v600_v17 = vld [vmem:[%s772_s1 + $0x38] sm:$0xff]  }
   0x7   :  { %514 = vmatpush3.bf16.msra.mxu0 %v588_v3  ;;  %578 = vmatpush3.bf16.msra.mxu1 %v588_v3  ;;  %v601_v18 = vld [vmem:[%s773_s0] ss:$8 sps:$4 sm:$0xff]   ;;  %v607_v20 = vld [vmem:[%s773_s0 + $0x14] ss:$8 sps:$4 sm:$0xff]   ;;  %v609_v22 = vld [vmem:[%s773_s0 + $0x10] ss:$8 sps:$4 sm:$0xff]  }
   0x8   :  { %515 = vmatprep.subr.bf16.mxu0 %v589_v4  ;;  %571 = vmatprep.subr.bf16.mxu1 %v589_v4  ;;  %v604_v19 = vld [vmem:[%s773_s0 + $0x40] ss:$8 sps:$4 sm:$0xff]   ;;  %v610_v21 = vld [vmem:[%s773_s0 + $0x54] ss:$8 sps:$4 sm:$0xff]   ;;  %v612_v23 = vld [vmem:[%s773_s0 + $0x50] ss:$8 sps:$4 sm:$0xff]  }
   0x9   :  { %298 = vmatprep.mubr.bf16.mxu1 %v606_v12  ;;  %v613_v24 = vld [vmem:[%s773_s0 + $0x24] ss:$8 sps:$4 sm:$0xff]   ;;  %v615_v26 = vld [vmem:[%s773_s0 + $0x20] ss:$8 sps:$4 sm:$0xff]   ;;  %v619_v28 = vld [vmem:[%s773_s0 + $0x34] ss:$8 sps:$4 sm:$0xff]  }
   0xa   :  { %v616_v25 = vld [vmem:[%s773_s0 + $0x64] ss:$8 sps:$4 sm:$0xff]   ;;  %v618_v27 = vld [vmem:[%s773_s0 + $0x60] ss:$8 sps:$4 sm:$0xff]   ;;  %v621_v29 = vld [vmem:[%s773_s0 + $0x30] ss:$8 sps:$4 sm:$0xff]  }
   0xb   :  { %516 = vmatpush3.bf16.msra.mxu0 %v590_v5  ;;  %579 = vmatpush3.bf16.msra.mxu1 %v590_v5  ;;  %v735_v32 = vld [vmem:[%s774_s2] ss:$0 sm:$0xff] }
   0xc   :  { %517 = vmatprep.subr.bf16.mxu0 %v591_v6  ;;  %572 = vmatprep.subr.bf16.mxu1 %v591_v6 }
   0xf   :  { %518 = vmatpush3.bf16.msra.mxu0 %v592_v7  ;;  %580 = vmatpush3.bf16.msra.mxu1 %v592_v7 }
  0x10   :  { %519 = vmatprep.subr.bf16.mxu0 %v593_v8  ;;  %573 = vmatprep.subr.bf16.mxu1 %v593_v8 }
  0x13   :  { %520 = vmatpush3.bf16.msra.mxu0 %v594_v9  ;;  %581 = vmatpush3.bf16.msra.mxu1 %v594_v9 }
  0x14   :  { %521 = vmatprep.subr.bf16.mxu0 %v595_v10  ;;  %574 = vmatprep.subr.bf16.mxu1 %v595_v10 }
  0x17   :  { %522 = vmatpush3.bf16.msra.mxu0 %v596_v13  ;;  %582 = vmatpush3.bf16.msra.mxu1 %v596_v13 }
  0x18   :  { %523 = vmatprep.subr.bf16.mxu0 %v597_v14  ;;  %575 = vmatprep.subr.bf16.mxu1 %v597_v14 }
  0x1b   :  { %524 = vmatpush3.bf16.msra.mxu0 %v598_v15  ;;  %583 = vmatpush3.bf16.msra.mxu1 %v598_v15 }
  0x1c   :  { %525 = vmatprep.subr.bf16.mxu0 %v599_v16  ;;  %576 = vmatprep.subr.bf16.mxu1 %v599_v16 }
  0x1f   :  { %526 = vmatpush3.bf16.msra.mxu0 %v600_v17  ;;  %584 = vmatpush3.bf16.msra.mxu1 %v600_v17 }
  0x22   :  { %267 = vmatmul.mubr.bf16.vlgmr.msra.gmra.mrb[0].mxu0 %v601_v18  ;;  %299 = vmatmul.mubr.bf16.vlgmr.msra.gmra.mrb[0].mxu1 %v604_v19 }
  0x23   :  { %274 = vmatprep.mubr.bf16.mxu0 %v607_v20  ;;  %306 = vmatprep.mubr.bf16.mxu1 %v610_v21 }
  0x2a   :  { %275 = vmatmul.mubr.bf16.gmra.mrb[4].mxu0 %v609_v22  ;;  %307 = vmatmul.mubr.bf16.gmra.mrb[4].mxu1 %v612_v23 }
  0x2b   :  { %282 = vmatprep.mubr.bf16.mxu0 %v613_v24  ;;  %314 = vmatprep.mubr.bf16.mxu1 %v616_v25 }
  0x32   :  { %283 = vmatmul.mubr.bf16.gmra.mrb[8].mxu0 %v615_v26  ;;  %315 = vmatmul.mubr.bf16.gmra.mrb[8].mxu1 %v618_v27 }
  0x33   :  { %290 = vmatprep.mubr.bf16.mxu0 %v619_v28 }
  0x3a   :  { %291 = vmatmul.mubr.bf16.gmra.mrb[12].mxu0 %v621_v29 }
  0xf5   :  { %v527_v30 = vpop.f32.mrb[0].mxu0  ;;  %v551_v31 = vpop.f32.mrb[0].mxu1 }
  0xf6   :  { %v528_v33 = vpop.f32.mrb[1].mxu0  ;;  %v552_v34 = vpop.f32.mrb[1].mxu1 }
  0xf7   :  { %v529_v35 = vadd.f32 %v528_v33, %v527_v30  ;;  %v530_v36 = vpop.f32.mrb[2].mxu0  ;;  %v553_v37 = vadd.f32 %v552_v34, %v551_v31  ;;  %v554_v38 = vpop.f32.mrb[2].mxu1 }
  0xf8   :  { %v531_v39 = vpop.f32.mrb[3].mxu0  ;;  %v555_v40 = vpop.f32.mrb[3].mxu1 }
  0xf9   :  { %v269_v41 = vadd.f32 %v529_v35, %v735_v32  ;;  %v532_v42 = vadd.f32 %v531_v39, %v530_v36  ;;  %v301_v43 = vadd.f32 %v553_v37, %v735_v32  ;;  %v556_v44 = vadd.f32 %v555_v40, %v554_v38 }
  0xfb   :  { %v272_v45 = vadd.f32 %v532_v42, %v735_v32  ;;  %v331_v46 = vmax.f32 %v301_v43, 0.0  ;;  %v304_v47 = vadd.f32 %v556_v44, %v735_v32  ;;  %v323_v48 = vmax.f32 %v269_v41, 0.0 }
  0xfd   :  { %v324_v49 = vmax.f32 %v272_v45, 0.0  ;;  %v533_v50 = vpop.f32.mrb[4].mxu0  ;;  %v332_v51 = vmax.f32 %v304_v47, 0.0  ;;  %v557_v52 = vpop.f32.mrb[4].mxu1 }
  0xfe   :  { %v534_v53 = vpop.f32.mrb[5].mxu0  ;;  %v558_v54 = vpop.f32.mrb[5].mxu1 }
  0xff   :  { %v473_v55 = vpack.c.bf16 %v324_v49, %v323_v48  ;;  %v493_v56 = vpack.c.bf16 %v332_v51, %v331_v46  ;;  %v535_v57 = vadd.f32 %v534_v53, %v533_v50  ;;  %v536_v58 = vpop.f32.mrb[6].mxu0  ;;  %v559_v59 = vadd.f32 %v558_v54, %v557_v52  ;;  %v560_v60 = vpop.f32.mrb[6].mxu1 }
 0x100   :  { %v537_v61 = vpop.f32.mrb[7].mxu0  ;;  %v561_v62 = vpop.f32.mrb[7].mxu1 }
 0x101   :  { %474 = vst [vmem:[%s775_s3] sm:$0xff] %v473_v55   ;;  %508 = vst [vmem:[%s775_s3 + $0x20] sm:$0xff] %v493_v56   ;;  %v277_v63 = vadd.f32 %v535_v57, %v735_v32  ;;  %v538_v0 = vadd.f32 %v537_v61, %v536_v58  ;;  %v309_v1 = vadd.f32 %v559_v59, %v735_v32 }
 0x102   :  { %v562_v2 = vadd.f32 %v561_v62, %v560_v60 }
 0x103   :  { %v280_v3 = vadd.f32 %v538_v0, %v735_v32  ;;  %v333_v4 = vmax.f32 %v309_v1, 0.0  ;;  %v325_v6 = vmax.f32 %v277_v63, 0.0 }
 0x104   :  { %v312_v5 = vadd.f32 %v562_v2, %v735_v32 }
 0x105   :  { %v326_v7 = vmax.f32 %v280_v3, 0.0  ;;  %v539_v8 = vpop.f32.mrb[8].mxu0  ;;  %v563_v10 = vpop.f32.mrb[8].mxu1 }
 0x106   :  { %v334_v9 = vmax.f32 %v312_v5, 0.0  ;;  %v540_v11 = vpop.f32.mrb[9].mxu0  ;;  %v564_v12 = vpop.f32.mrb[9].mxu1 }
 0x107   :  { %v478_v13 = vpack.c.bf16 %v326_v7, %v325_v6  ;;  %v541_v15 = vadd.f32 %v540_v11, %v539_v8  ;;  %v542_v16 = vpop.f32.mrb[10].mxu0  ;;  %v565_v17 = vadd.f32 %v564_v12, %v563_v10  ;;  %v566_v18 = vpop.f32.mrb[10].mxu1 }
 0x108   :  { %v498_v14 = vpack.c.bf16 %v334_v9, %v333_v4  ;;  %v543_v19 = vpop.f32.mrb[11].mxu0  ;;  %v567_v20 = vpop.f32.mrb[11].mxu1 }
 0x109   :  { %505 = vst [vmem:[%s775_s3 + $0x8] sm:$0xff] %v478_v13   ;;  %v285_v21 = vadd.f32 %v541_v15, %v735_v32  ;;  %v544_v22 = vadd.f32 %v543_v19, %v542_v16  ;;  %v317_v23 = vadd.f32 %v565_v17, %v735_v32  ;;  %v568_v24 = vadd.f32 %v567_v20, %v566_v18 }
 0x10a   :  { %509 = vst [vmem:[%s775_s3 + $0x28] sm:$0xff] %v498_v14  }
 0x10b   :  { %v288_v25 = vadd.f32 %v544_v22, %v735_v32  ;;  %v335_v26 = vmax.f32 %v317_v23, 0.0  ;;  %v320_v27 = vadd.f32 %v568_v24, %v735_v32  ;;  %v327_v28 = vmax.f32 %v285_v21, 0.0 }
 0x10d   :  { %v328_v29 = vmax.f32 %v288_v25, 0.0  ;;  %v545_v30 = vpop.f32.mrb[12].mxu0  ;;  %v336_v31 = vmax.f32 %v320_v27, 0.0 }
 0x10e   :  { %v546_v33 = vpop.f32.mrb[13].mxu0 }
 0x10f   :  { %v483_v34 = vpack.c.bf16 %v328_v29, %v327_v28  ;;  %v503_v35 = vpack.c.bf16 %v336_v31, %v335_v26  ;;  %v547_v36 = vadd.f32 %v546_v33, %v545_v30  ;;  %v548_v37 = vpop.f32.mrb[14].mxu0 }
 0x110   :  { %v549_v38 = vpop.f32.mrb[15].mxu0 }
 0x111   :  { %506 = vst [vmem:[%s775_s3 + $0x10] sm:$0xff] %v483_v34   ;;  %510 = vst [vmem:[%s775_s3 + $0x30] sm:$0xff] %v503_v35   ;;  %v293_v39 = vadd.f32 %v547_v36, %v735_v32  ;;  %v550_v40 = vadd.f32 %v549_v38, %v548_v37 }
 0x113   :  { %v296_v41 = vadd.f32 %v550_v40, %v735_v32  ;;  %v329_v42 = vmax.f32 %v293_v39, 0.0 }
 0x115   :  { %v330_v43 = vmax.f32 %v296_v41, 0.0 }
 0x117   :  { %v488_v44 = vpack.c.bf16 %v330_v43, %v329_v42 }
 0x119   :  { %507 = vst [vmem:[%s775_s3 + $0x18] sm:$0xff] %v488_v44  }

// kernel: cnn_autoencoder_forward.7
= control target key start
LH: loop header
LB: loop body
LE: loop exit
PB: predicated region body
PF: predicated region fallthrough
CT: control target
= control target key end

     0   :  { %vm5743_vm0 = vmmov 0   ;;  %vm1747_vm1 = vcmask 523264   ;;  %vm4405_vm2 = vcmask 519168   ;;  %s7214_s1 = inlined_call_operand.vmem [shape: bf16[3136,128], index: 1, kind: input, shape index: {}]   ;;  %s7215_s0 = inlined_call_operand.vmem [shape: bf16[16,3136], index: 0, kind: input, shape index: {}]   ;;  %s7216_s2 = inlined_call_operand.vmem [shape: f32[1,128], index: 2, kind: input, shape index: {}]   ;;  %s7217_s3 = inlined_call_operand.vmem [shape: bf16[128,3136], index: 3, kind: input, shape index: {}]   ;;  %s7218_s4 = inlined_call_operand.vmem [shape: f32[1,3136], index: 4, kind: input, shape index: {}]   ;;  %s7219_s5 = inlined_call_operand.vmem [shape: bf16[16,3136], index: 5, kind: output, shape index: {}]  }
   0x1   :  { %v5213_v0 = vld [vmem:[%s7214_s1 + $0x40] sm:$0xff]   ;;  %v5217_v4 = vld [vmem:[%s7214_s1 + $0x48] sm:$0xff]   ;;  %v5221_v8 = vld [vmem:[%s7214_s1 + $0x50] sm:$0xff]  }
   0x2   :  { %v5214_v1 = vld [vmem:[%s7214_s1] sm:$0xff]   ;;  %4900 = vmatprep.subr.bf16.mxu0 %v5213_v0  ;;  %v5218_v5 = vld [vmem:[%s7214_s1 + $0x8] sm:$0xff]   ;;  %v5222_v9 = vld [vmem:[%s7214_s1 + $0x10] sm:$0xff]  }
   0x3   :  { %v5215_v2 = vld [vmem:[%s7214_s1 + $0xc0] sm:$0xff]   ;;  %4901 = vmatpush3.bf16.msra.mxu0 %v5214_v1  ;;  %v5219_v6 = vld [vmem:[%s7214_s1 + $0xc8] sm:$0xff]   ;;  %v5223_v10 = vld [vmem:[%s7214_s1 + $0xd0] sm:$0xff]  }
   0x4   :  { %v5216_v3 = vld [vmem:[%s7214_s1 + $0x80] sm:$0xff]   ;;  %4922 = vmatprep.subr.bf16.mxu1 %v5215_v2  ;;  %4902 = vmatprep.subr.bf16.mxu0 %v5217_v4  ;;  %v5220_v7 = vld [vmem:[%s7214_s1 + $0x88] sm:$0xff]   ;;  %v5224_v11 = vld [vmem:[%s7214_s1 + $0x90] sm:$0xff]  }
   0x5   :  { %4923 = vmatpush3.bf16.msra.mxu1 %v5216_v3  ;;  %v5225_v12 = vld [vmem:[%s7214_s1 + $0x58] sm:$0xff]   ;;  %v5229_v16 = vld [vmem:[%s7214_s1 + $0x60] sm:$0xff]   ;;  %v5233_v20 = vld [vmem:[%s7214_s1 + $0x68] sm:$0xff]  }
   0x6   :  { %4924 = vmatprep.subr.bf16.mxu1 %v5219_v6  ;;  %v5226_v13 = vld [vmem:[%s7214_s1 + $0x18] sm:$0xff]   ;;  %v5230_v17 = vld [vmem:[%s7214_s1 + $0x20] sm:$0xff]   ;;  %v5234_v21 = vld [vmem:[%s7214_s1 + $0x28] sm:$0xff]  }
   0x7   :  { %4903 = vmatpush3.bf16.msra.mxu0 %v5218_v5  ;;  %v5227_v14 = vld [vmem:[%s7214_s1 + $0xd8] sm:$0xff]   ;;  %v5231_v18 = vld [vmem:[%s7214_s1 + $0xe0] sm:$0xff]   ;;  %v5235_v22 = vld [vmem:[%s7214_s1 + $0xe8] sm:$0xff]  }
   0x8   :  { %4904 = vmatprep.subr.bf16.mxu0 %v5221_v8  ;;  %v5228_v15 = vld [vmem:[%s7214_s1 + $0x98] sm:$0xff]   ;;  %v5232_v19 = vld [vmem:[%s7214_s1 + $0xa0] sm:$0xff]   ;;  %v5236_v23 = vld [vmem:[%s7214_s1 + $0xa8] sm:$0xff]  }
   0x9   :  { %4925 = vmatpush3.bf16.msra.mxu1 %v5220_v7  ;;  %v5237_v24 = vld [vmem:[%s7214_s1 + $0x70] sm:$0xff]   ;;  %v5241_v28 = vld [vmem:[%s7214_s1 + $0x78] sm:$0xff]   ;;  %v5244_v31 = vld [vmem:[%s7215_s0] ss:$100 sps:$4 sm:$0xff]  }
   0xa   :  { %4926 = vmatprep.subr.bf16.mxu1 %v5223_v10  ;;  %v5238_v25 = vld [vmem:[%s7214_s1 + $0x30] sm:$0xff]   ;;  %v5242_v29 = vld [vmem:[%s7214_s1 + $0x38] sm:$0xff]   ;;  %v5246_v32 = vld [vmem:[%s7215_s0 + $0x4] ss:$100 sps:$4 sm:$0xff]  }
   0xb   :  { %4905 = vmatpush3.bf16.msra.mxu0 %v5222_v9  ;;  %v5239_v26 = vld [vmem:[%s7214_s1 + $0xf0] sm:$0xff]   ;;  %v5243_v30 = vld [vmem:[%s7214_s1 + $0xf8] sm:$0xff]   ;;  %1783 = vmatprep.mubr.bf16.mxu0 %v5246_v32  ;;  %v5248_v34 = vld [vmem:[%s7214_s1 + $0x140] sm:$0xff]  }
   0xc   :  { %4906 = vmatprep.subr.bf16.mxu0 %v5225_v12  ;;  %v5240_v27 = vld [vmem:[%s7214_s1 + $0xb0] sm:$0xff]   ;;  %v5247_v33 = vld [vmem:[%s7214_s1 + $0xb8] sm:$0xff]   ;;  %v5249_v35 = vld [vmem:[%s7215_s0 + $0x8] ss:$100 sps:$4 sm:$0xff]  }
   0xd   :  { %4927 = vmatpush3.bf16.msra.mxu1 %v5224_v11  ;;  %v5251_v36 = vld [vmem:[%s7215_s0 + $0xc] ss:$100 sps:$4 sm:$0xff]   ;;  %v5252_v37 = vld [vmem:[%s7214_s1 + $0x100] sm:$0xff]   ;;  %v5263_v48 = vld [vmem:[%s7214_s1 + $0x158] sm:$0xff]  }
   0xe   :  { %4928 = vmatprep.subr.bf16.mxu1 %v5227_v14  ;;  %1824 = vmatprep.mubr.bf16.mxu1 %v5251_v36  ;;  %v5253_v38 = vld [vmem:[%s7214_s1 + $0x1c0] sm:$0xff]   ;;  %v5255_v40 = vld [vmem:[%s7214_s1 + $0x148] sm:$0xff]   ;;  %v5259_v44 = vld [vmem:[%s7214_s1 + $0x150] sm:$0xff]  }
   0xf   :  { %4907 = vmatpush3.bf16.msra.mxu0 %v5226_v13  ;;  %v5254_v39 = vld [vmem:[%s7214_s1 + $0x180] sm:$0xff]   ;;  %v5256_v41 = vld [vmem:[%s7214_s1 + $0x108] sm:$0xff]   ;;  %v5260_v45 = vld [vmem:[%s7214_s1 + $0x110] sm:$0xff]  }
  0x10   :  { %4908 = vmatprep.subr.bf16.mxu0 %v5229_v16  ;;  %v5257_v42 = vld [vmem:[%s7214_s1 + $0x1c8] sm:$0xff]   ;;  %v5261_v46 = vld [vmem:[%s7214_s1 + $0x1d0] sm:$0xff]   ;;  %v5264_v49 = vld [vmem:[%s7214_s1 + $0x118] sm:$0xff]  }
  0x11   :  { %4929 = vmatpush3.bf16.msra.mxu1 %v5228_v15  ;;  %v5258_v43 = vld [vmem:[%s7214_s1 + $0x188] sm:$0xff]   ;;  %v5262_v47 = vld [vmem:[%s7214_s1 + $0x190] sm:$0xff]   ;;  %v5265_v50 = vld [vmem:[%s7214_s1 + $0x1d8] sm:$0xff]  }
  0x12   :  { %4930 = vmatprep.subr.bf16.mxu1 %v5231_v18  ;;  %v5266_v51 = vld [vmem:[%s7214_s1 + $0x198] sm:$0xff]   ;;  %v5267_v52 = vld [vmem:[%s7214_s1 + $0x160] sm:$0xff]   ;;  %v5271_v56 = vld [vmem:[%s7214_s1 + $0x168] sm:$0xff]  }
  0x13   :  { %4909 = vmatpush3.bf16.msra.mxu0 %v5230_v17  ;;  %v5268_v53 = vld [vmem:[%s7214_s1 + $0x120] sm:$0xff]   ;;  %v5272_v57 = vld [vmem:[%s7214_s1 + $0x128] sm:$0xff]   ;;  %v5275_v60 = vld [vmem:[%s7214_s1 + $0x170] sm:$0xff]  }
  0x14   :  { %4910 = vmatprep.subr.bf16.mxu0 %v5233_v20  ;;  %v5269_v54 = vld [vmem:[%s7214_s1 + $0x1e0] sm:$0xff]   ;;  %v5273_v58 = vld [vmem:[%s7214_s1 + $0x1e8] sm:$0xff]   ;;  %v5276_v61 = vld [vmem:[%s7214_s1 + $0x130] sm:$0xff]  }
  0x15   :  { %4931 = vmatpush3.bf16.msra.mxu1 %v5232_v19  ;;  %v5270_v55 = vld [vmem:[%s7214_s1 + $0x1a0] sm:$0xff]   ;;  %v5274_v59 = vld [vmem:[%s7214_s1 + $0x1a8] sm:$0xff]   ;;  %v5277_v62 = vld [vmem:[%s7214_s1 + $0x1f0] sm:$0xff]  }
  0x16   :  { %4932 = vmatprep.subr.bf16.mxu1 %v5235_v22  ;;  %v5278_v63 = vld [vmem:[%s7214_s1 + $0x1b0] sm:$0xff]   ;;  %v5279_v0 = vld [vmem:[%s7214_s1 + $0x178] sm:$0xff]   ;;  %v5286_v6 = vld [vmem:[%s7214_s1 + $0x240] sm:$0xff]  }
  0x17   :  { %4911 = vmatpush3.bf16.msra.mxu0 %v5234_v21  ;;  %v5280_v1 = vld [vmem:[%s7214_s1 + $0x138] sm:$0xff]   ;;  %v5282_v3 = vld [vmem:[%s7215_s0 + $0x10] ss:$100 sps:$4 sm:$0xff]   ;;  %v5290_v9 = vld [vmem:[%s7214_s1 + $0x200] sm:$0xff]  }
  0x18   :  { %4912 = vmatprep.subr.bf16.mxu0 %v5237_v24  ;;  %v5281_v2 = vld [vmem:[%s7214_s1 + $0x1f8] sm:$0xff]   ;;  %v5291_v10 = vld [vmem:[%s7214_s1 + $0x2c0] sm:$0xff]   ;;  %v5293_v12 = vld [vmem:[%s7214_s1 + $0x248] sm:$0xff]  }
  0x19   :  { %4933 = vmatpush3.bf16.msra.mxu1 %v5236_v23  ;;  %v5284_v4 = vld [vmem:[%s7215_s0 + $0x14] ss:$100 sps:$4 sm:$0xff]   ;;  %v5289_v8 = vld [vmem:[%s7215_s0 + $0x1c] ss:$100 sps:$4 sm:$0xff]   ;;  %v5294_v13 = vld [vmem:[%s7214_s1 + $0x208] sm:$0xff]  }
  0x1a   :  { %4934 = vmatprep.subr.bf16.mxu1 %v5239_v26  ;;  %v5285_v5 = vld [vmem:[%s7214_s1 + $0x1b8] sm:$0xff]   ;;  %v5292_v11 = vld [vmem:[%s7214_s1 + $0x280] sm:$0xff]   ;;  %v5295_v14 = vld [vmem:[%s7214_s1 + $0x2c8] sm:$0xff]  }
  0x1b   :  { %4913 = vmatpush3.bf16.msra.mxu0 %v5238_v25  ;;  %v5287_v7 = vld [vmem:[%s7215_s0 + $0x18] ss:$100 sps:$4 sm:$0xff]   ;;  %v5296_v15 = vld [vmem:[%s7214_s1 + $0x288] sm:$0xff]   ;;  %v5297_v16 = vld [vmem:[%s7214_s1 + $0x250] sm:$0xff]  }
  0x1c   :  { %4914 = vmatprep.subr.bf16.mxu0 %v5241_v28  ;;  %v5298_v17 = vld [vmem:[%s7214_s1 + $0x210] sm:$0xff]   ;;  %v5301_v20 = vld [vmem:[%s7214_s1 + $0x258] sm:$0xff]   ;;  %v5305_v24 = vld [vmem:[%s7214_s1 + $0x260] sm:$0xff]  }
  0x1d   :  { %4935 = vmatpush3.bf16.msra.mxu1 %v5240_v27  ;;  %v5299_v18 = vld [vmem:[%s7214_s1 + $0x2d0] sm:$0xff]   ;;  %v5302_v21 = vld [vmem:[%s7214_s1 + $0x218] sm:$0xff]   ;;  %v5306_v25 = vld [vmem:[%s7214_s1 + $0x220] sm:$0xff]  }
  0x1e   :  { %4936 = vmatprep.subr.bf16.mxu1 %v5243_v30  ;;  %v5300_v19 = vld [vmem:[%s7214_s1 + $0x290] sm:$0xff]   ;;  %v5303_v22 = vld [vmem:[%s7214_s1 + $0x2d8] sm:$0xff]   ;;  %v5307_v26 = vld [vmem:[%s7214_s1 + $0x2e0] sm:$0xff]  }
  0x1f   :  { %4915 = vmatpush3.bf16.msra.mxu0 %v5242_v29  ;;  %v5304_v23 = vld [vmem:[%s7214_s1 + $0x298] sm:$0xff]   ;;  %v5308_v27 = vld [vmem:[%s7214_s1 + $0x2a0] sm:$0xff]   ;;  %v5309_v28 = vld [vmem:[%s7214_s1 + $0x268] sm:$0xff]  }
  0x20   :  { %4944 = vmatprep.subr.bf16.mxu0 %v5248_v34  ;;  %v5310_v29 = vld [vmem:[%s7214_s1 + $0x228] sm:$0xff]   ;;  %v5313_v32 = vld [vmem:[%s7214_s1 + $0x270] sm:$0xff]   ;;  %v5317_v36 = vld [vmem:[%s7214_s1 + $0x278] sm:$0xff]  }
  0x21   :  { %4937 = vmatpush3.bf16.msra.mxu1 %v5247_v33  ;;  %v5311_v30 = vld [vmem:[%s7214_s1 + $0x2e8] sm:$0xff]   ;;  %v5314_v33 = vld [vmem:[%s7214_s1 + $0x230] sm:$0xff]  }
  0x22   :  { %1784 = vmatmul.mubr.bf16.vlgmr.msra.gmra.mrb[0].mxu0 %v5244_v31  ;;  %4966 = vmatprep.subr.bf16.mxu1 %v5253_v38  ;;  %v5312_v31 = vld [vmem:[%s7214_s1 + $0x2a8] sm:$0xff]   ;;  %v5315_v34 = vld [vmem:[%s7214_s1 + $0x2f0] sm:$0xff]   ;;  %v5319_v38 = vld [vmem:[%s7214_s1 + $0x2f8] sm:$0xff]  }
  0x23   :  { %4945 = vmatpush3.bf16.msra.mxu0 %v5252_v37  ;;  %1865 = vmatprep.mubr.bf16.mxu0 %v5284_v4  ;;  %v5318_v37 = vld [vmem:[%s7214_s1 + $0x238] sm:$0xff]   ;;  %v5351_v4 = vld [vmem:[%s7214_s1 + $0x370] sm:$0xff]  }
  0x24   :  { %1825 = vmatmul.mubr.bf16.vlgmr.msra.gmra.mrb[0].mxu1 %v5249_v35  ;;  %4946 = vmatprep.subr.bf16.mxu0 %v5255_v40  ;;  %v5316_v35 = vld [vmem:[%s7214_s1 + $0x2b0] sm:$0xff]   ;;  %v5322_v40 = vld [vmem:[%s7215_s0 + $0x24] ss:$100 sps:$4 sm:$0xff]  }
  0x25   :  { %4967 = vmatpush3.bf16.msra.mxu1 %v5254_v39  ;;  %1906 = vmatprep.mubr.bf16.mxu1 %v5289_v8  ;;  %v5320_v39 = vld [vmem:[%s7215_s0 + $0x20] ss:$100 sps:$4 sm:$0xff]   ;;  %v5355_v8 = vld [vmem:[%s7214_s1 + $0x378] sm:$0xff]  }
  0x26   :  { %4968 = vmatprep.subr.bf16.mxu1 %v5257_v42  ;;  %v5324_v42 = vld [vmem:[%s7214_s1 + $0x340] sm:$0xff]  }
  0x27   :  { %4947 = vmatpush3.bf16.msra.mxu0 %v5256_v41  ;;  %v5323_v41 = vld [vmem:[%s7214_s1 + $0x2b8] sm:$0xff]  }
  0x28   :  { %4948 = vmatprep.subr.bf16.mxu0 %v5259_v44  ;;  %v5327_v44 = vld [vmem:[%s7215_s0 + $0x2c] ss:$100 sps:$4 sm:$0xff]  }
  0x29   :  { %4969 = vmatpush3.bf16.msra.mxu1 %v5258_v43  ;;  %v5325_v43 = vld [vmem:[%s7215_s0 + $0x28] ss:$100 sps:$4 sm:$0xff]  }
  0x2a   :  { %4970 = vmatprep.subr.bf16.mxu1 %v5261_v46  ;;  %v5329_v46 = vld [vmem:[%s7214_s1 + $0x3c0] sm:$0xff]  }
  0x2b   :  { %4949 = vmatpush3.bf16.msra.mxu0 %v5260_v45  ;;  %v5328_v45 = vld [vmem:[%s7214_s1 + $0x300] sm:$0xff]  }
  0x2c   :  { %4950 = vmatprep.subr.bf16.mxu0 %v5263_v48  ;;  %v5331_v48 = vld [vmem:[%s7214_s1 + $0x348] sm:$0xff]  }
  0x2d   :  { %4971 = vmatpush3.bf16.msra.mxu1 %v5262_v47  ;;  %v5330_v47 = vld [vmem:[%s7214_s1 + $0x380] sm:$0xff]  }
  0x2e   :  { %4972 = vmatprep.subr.bf16.mxu1 %v5265_v50  ;;  %v5333_v50 = vld [vmem:[%s7214_s1 + $0x3c8] sm:$0xff]  }
  0x2f   :  { %4951 = vmatpush3.bf16.msra.mxu0 %v5264_v49  ;;  %v5332_v49 = vld [vmem:[%s7214_s1 + $0x308] sm:$0xff]  }
  0x30   :  { %4952 = vmatprep.subr.bf16.mxu0 %v5267_v52  ;;  %v5335_v52 = vld [vmem:[%s7214_s1 + $0x350] sm:$0xff]  }
  0x31   :  { %4973 = vmatpush3.bf16.msra.mxu1 %v5266_v51  ;;  %v5334_v51 = vld [vmem:[%s7214_s1 + $0x388] sm:$0xff]  }
  0x32   :  { %4974 = vmatprep.subr.bf16.mxu1 %v5269_v54  ;;  %v5337_v54 = vld [vmem:[%s7214_s1 + $0x3d0] sm:$0xff]  }
  0x33   :  { %4953 = vmatpush3.bf16.msra.mxu0 %v5268_v53  ;;  %v5336_v53 = vld [vmem:[%s7214_s1 + $0x310] sm:$0xff]  }
  0x34   :  { %4954 = vmatprep.subr.bf16.mxu0 %v5271_v56  ;;  %v5339_v56 = vld [vmem:[%s7214_s1 + $0x358] sm:$0xff]  }
  0x35   :  { %4975 = vmatpush3.bf16.msra.mxu1 %v5270_v55  ;;  %v5338_v55 = vld [vmem:[%s7214_s1 + $0x390] sm:$0xff]  }
  0x36   :  { %4976 = vmatprep.subr.bf16.mxu1 %v5273_v58  ;;  %v5341_v58 = vld [vmem:[%s7214_s1 + $0x3d8] sm:$0xff]  }
  0x37   :  { %4955 = vmatpush3.bf16.msra.mxu0 %v5272_v57  ;;  %v5340_v57 = vld [vmem:[%s7214_s1 + $0x318] sm:$0xff]  }
  0x38   :  { %4956 = vmatprep.subr.bf16.mxu0 %v5275_v60  ;;  %v5343_v60 = vld [vmem:[%s7214_s1 + $0x360] sm:$0xff]  }
  0x39   :  { %4977 = vmatpush3.bf16.msra.mxu1 %v5274_v59  ;;  %v5342_v59 = vld [vmem:[%s7214_s1 + $0x398] sm:$0xff]  }
  0x3a   :  { %4978 = vmatprep.subr.bf16.mxu1 %v5277_v62  ;;  %v5345_v62 = vld [vmem:[%s7214_s1 + $0x3e0] sm:$0xff]  }
  0x3b   :  { %4957 = vmatpush3.bf16.msra.mxu0 %v5276_v61  ;;  %v5344_v61 = vld [vmem:[%s7214_s1 + $0x320] sm:$0xff]  }
  0x3c   :  { %4958 = vmatprep.subr.bf16.mxu0 %v5279_v0  ;;  %v5347_v0 = vld [vmem:[%s7214_s1 + $0x368] sm:$0xff]  }
  0x3d   :  { %4979 = vmatpush3.bf16.msra.mxu1 %v5278_v63  ;;  %v5346_v63 = vld [vmem:[%s7214_s1 + $0x3a0] sm:$0xff]  }
  0x3e   :  { %4980 = vmatprep.subr.bf16.mxu1 %v5281_v2  ;;  %v5349_v2 = vld [vmem:[%s7214_s1 + $0x3e8] sm:$0xff]  }
  0x3f   :  { %4959 = vmatpush3.bf16.msra.mxu0 %v5280_v1  ;;  %v5348_v1 = vld [vmem:[%s7214_s1 + $0x328] sm:$0xff]  }
  0x40   :  { %4988 = vmatprep.subr.bf16.mxu0 %v5286_v6  ;;  %v5353_v6 = vld [vmem:[%s7214_s1 + $0x3f0] sm:$0xff]  }
  0x41   :  { %4981 = vmatpush3.bf16.msra.mxu1 %v5285_v5  ;;  %v5352_v5 = vld [vmem:[%s7214_s1 + $0x330] sm:$0xff]  }
  0x42   :  { %1866 = vmatmul.mubr.bf16.vlgmr.msra.gmra.mrb[4].mxu0 %v5282_v3  ;;  %5010 = vmatprep.subr.bf16.mxu1 %v5291_v10  ;;  %v5350_v3 = vld [vmem:[%s7214_s1 + $0x3a8] sm:$0xff]   ;;  %v5357_v10 = vld [vmem:[%s7214_s1 + $0x3f8] sm:$0xff]  }
  0x43   :  { %4989 = vmatpush3.bf16.msra.mxu0 %v5290_v9  ;;  %1947 = vmatprep.mubr.bf16.mxu0 %v5322_v40  ;;  %v5356_v9 = vld [vmem:[%s7214_s1 + $0x338] sm:$0xff]   ;;  %v5389_v40 = vld [vmem:[%s7214_s1 + $0x470] sm:$0xff]  }
  0x44   :  { %1907 = vmatmul.mubr.bf16.vlgmr.msra.gmra.mrb[4].mxu1 %v5287_v7  ;;  %4990 = vmatprep.subr.bf16.mxu0 %v5293_v12  ;;  %v5354_v7 = vld [vmem:[%s7214_s1 + $0x3b0] sm:$0xff]  }
  0x45   :  { %5011 = vmatpush3.bf16.msra.mxu1 %v5292_v11  ;;  %1988 = vmatprep.mubr.bf16.mxu1 %v5327_v44  ;;  %v5358_v11 = vld [vmem:[%s7215_s0 + $0x30] ss:$100 sps:$4 sm:$0xff]   ;;  %v5393_v44 = vld [vmem:[%s7214_s1 + $0x478] sm:$0xff]  }
  0x46   :  { %5012 = vmatprep.subr.bf16.mxu1 %v5295_v14  ;;  %v5360_v12 = vld [vmem:[%s7215_s0 + $0x34] ss:$100 sps:$4 sm:$0xff]   ;;  %v5362_v14 = vld [vmem:[%s7214_s1 + $0x440] sm:$0xff]  }
  0x47   :  { %4991 = vmatpush3.bf16.msra.mxu0 %v5294_v13  ;;  %v5361_v13 = vld [vmem:[%s7214_s1 + $0x3b8] sm:$0xff]  }
  0x48   :  { %4992 = vmatprep.subr.bf16.mxu0 %v5297_v16  ;;  %v5365_v16 = vld [vmem:[%s7215_s0 + $0x3c] ss:$100 sps:$4 sm:$0xff]  }
  0x49   :  { %5013 = vmatpush3.bf16.msra.mxu1 %v5296_v15  ;;  %v5363_v15 = vld [vmem:[%s7215_s0 + $0x38] ss:$100 sps:$4 sm:$0xff]  }
  0x4a   :  { %5014 = vmatprep.subr.bf16.mxu1 %v5299_v18  ;;  %v5367_v18 = vld [vmem:[%s7214_s1 + $0x4c0] sm:$0xff]  }
  0x4b   :  { %4993 = vmatpush3.bf16.msra.mxu0 %v5298_v17  ;;  %v5366_v17 = vld [vmem:[%s7214_s1 + $0x400] sm:$0xff]  }
  0x4c   :  { %4994 = vmatprep.subr.bf16.mxu0 %v5301_v20  ;;  %v5369_v20 = vld [vmem:[%s7214_s1 + $0x448] sm:$0xff]  }
  0x4d   :  { %5015 = vmatpush3.bf16.msra.mxu1 %v5300_v19  ;;  %v5368_v19 = vld [vmem:[%s7214_s1 + $0x480] sm:$0xff]  }
  0x4e   :  { %5016 = vmatprep.subr.bf16.mxu1 %v5303_v22  ;;  %v5371_v22 = vld [vmem:[%s7214_s1 + $0x4c8] sm:$0xff]  }
  0x4f   :  { %4995 = vmatpush3.bf16.msra.mxu0 %v5302_v21  ;;  %v5370_v21 = vld [vmem:[%s7214_s1 + $0x408] sm:$0xff]  }
  0x50   :  { %4996 = vmatprep.subr.bf16.mxu0 %v5305_v24  ;;  %v5373_v24 = vld [vmem:[%s7214_s1 + $0x450] sm:$0xff]  }
  0x51   :  { %5017 = vmatpush3.bf16.msra.mxu1 %v5304_v23  ;;  %v5372_v23 = vld [vmem:[%s7214_s1 + $0x488] sm:$0xff]  }
  0x52   :  { %5018 = vmatprep.subr.bf16.mxu1 %v5307_v26  ;;  %v5375_v26 = vld [vmem:[%s7214_s1 + $0x4d0] sm:$0xff]  }
  0x53   :  { %4997 = vmatpush3.bf16.msra.mxu0 %v5306_v25  ;;  %v5374_v25 = vld [vmem:[%s7214_s1 + $0x410] sm:$0xff]  }
  0x54   :  { %4998 = vmatprep.subr.bf16.mxu0 %v5309_v28  ;;  %v5377_v28 = vld [vmem:[%s7214_s1 + $0x458] sm:$0xff]  }
  0x55   :  { %5019 = vmatpush3.bf16.msra.mxu1 %v5308_v27  ;;  %v5376_v27 = vld [vmem:[%s7214_s1 + $0x490] sm:$0xff]  }
  0x56   :  { %5020 = vmatprep.subr.bf16.mxu1 %v5311_v30  ;;  %v5379_v30 = vld [vmem:[%s7214_s1 + $0x4d8] sm:$0xff]  }
  0x57   :  { %4999 = vmatpush3.bf16.msra.mxu0 %v5310_v29  ;;  %v5378_v29 = vld [vmem:[%s7214_s1 + $0x418] sm:$0xff]  }
  0x58   :  { %5000 = vmatprep.subr.bf16.mxu0 %v5313_v32  ;;  %v5381_v32 = vld [vmem:[%s7214_s1 + $0x460] sm:$0xff]  }
  0x59   :  { %5021 = vmatpush3.bf16.msra.mxu1 %v5312_v31  ;;  %v5380_v31 = vld [vmem:[%s7214_s1 + $0x498] sm:$0xff]  }
  0x5a   :  { %5022 = vmatprep.subr.bf16.mxu1 %v5315_v34  ;;  %v5383_v34 = vld [vmem:[%s7214_s1 + $0x4e0] sm:$0xff]  }
  0x5b   :  { %5001 = vmatpush3.bf16.msra.mxu0 %v5314_v33  ;;  %v5382_v33 = vld [vmem:[%s7214_s1 + $0x420] sm:$0xff]  }
  0x5c   :  { %5002 = vmatprep.subr.bf16.mxu0 %v5317_v36  ;;  %v5385_v36 = vld [vmem:[%s7214_s1 + $0x468] sm:$0xff]  }
  0x5d   :  { %5023 = vmatpush3.bf16.msra.mxu1 %v5316_v35  ;;  %v5384_v35 = vld [vmem:[%s7214_s1 + $0x4a0] sm:$0xff]  }
  0x5e   :  { %5024 = vmatprep.subr.bf16.mxu1 %v5319_v38  ;;  %v5387_v38 = vld [vmem:[%s7214_s1 + $0x4e8] sm:$0xff]  }
  0x5f   :  { %5003 = vmatpush3.bf16.msra.mxu0 %v5318_v37  ;;  %v5386_v37 = vld [vmem:[%s7214_s1 + $0x428] sm:$0xff]  }
  0x60   :  { %5032 = vmatprep.subr.bf16.mxu0 %v5324_v42  ;;  %v5391_v42 = vld [vmem:[%s7214_s1 + $0x4f0] sm:$0xff]  }
  0x61   :  { %5025 = vmatpush3.bf16.msra.mxu1 %v5323_v41  ;;  %v5390_v41 = vld [vmem:[%s7214_s1 + $0x430] sm:$0xff]  }
  0x62   :  { %1948 = vmatmul.mubr.bf16.vlgmr.msra.gmra.mrb[8].mxu0 %v5320_v39  ;;  %5054 = vmatprep.subr.bf16.mxu1 %v5329_v46  ;;  %v5388_v39 = vld [vmem:[%s7214_s1 + $0x4a8] sm:$0xff]   ;;  %v5395_v46 = vld [vmem:[%s7214_s1 + $0x4f8] sm:$0xff]  }
  0x63   :  { %5033 = vmatpush3.bf16.msra.mxu0 %v5328_v45  ;;  %2029 = vmatprep.mubr.bf16.mxu0 %v5360_v12  ;;  %v5394_v45 = vld [vmem:[%s7214_s1 + $0x438] sm:$0xff]   ;;  %v5427_v12 = vld [vmem:[%s7214_s1 + $0x570] sm:$0xff]  }
  0x64   :  { %1989 = vmatmul.mubr.bf16.vlgmr.msra.gmra.mrb[8].mxu1 %v5325_v43  ;;  %5034 = vmatprep.subr.bf16.mxu0 %v5331_v48  ;;  %v5392_v43 = vld [vmem:[%s7214_s1 + $0x4b0] sm:$0xff]   ;;  %v5398_v48 = vld [vmem:[%s7215_s0 + $0x44] ss:$100 sps:$4 sm:$0xff]  }
  0x65   :  { %5055 = vmatpush3.bf16.msra.mxu1 %v5330_v47  ;;  %2070 = vmatprep.mubr.bf16.mxu1 %v5365_v16  ;;  %v5396_v47 = vld [vmem:[%s7215_s0 + $0x40] ss:$100 sps:$4 sm:$0xff]   ;;  %v5431_v16 = vld [vmem:[%s7214_s1 + $0x578] sm:$0xff]  }
  0x66   :  { %5056 = vmatprep.subr.bf16.mxu1 %v5333_v50  ;;  %v5400_v50 = vld [vmem:[%s7214_s1 + $0x540] sm:$0xff]  }
  0x67   :  { %5035 = vmatpush3.bf16.msra.mxu0 %v5332_v49  ;;  %v5399_v49 = vld [vmem:[%s7214_s1 + $0x4b8] sm:$0xff]  }
  0x68   :  { %5036 = vmatprep.subr.bf16.mxu0 %v5335_v52  ;;  %v5403_v52 = vld [vmem:[%s7215_s0 + $0x4c] ss:$100 sps:$4 sm:$0xff]  }
  0x69   :  { %5057 = vmatpush3.bf16.msra.mxu1 %v5334_v51  ;;  %v5401_v51 = vld [vmem:[%s7215_s0 + $0x48] ss:$100 sps:$4 sm:$0xff]  }
  0x6a   :  { %5058 = vmatprep.subr.bf16.mxu1 %v5337_v54  ;;  %v5405_v54 = vld [vmem:[%s7214_s1 + $0x5c0] sm:$0xff]  }
  0x6b   :  { %5037 = vmatpush3.bf16.msra.mxu0 %v5336_v53  ;;  %v5404_v53 = vld [vmem:[%s7214_s1 + $0x500] sm:$0xff]  }
  0x6c   :  { %5038 = vmatprep.subr.bf16.mxu0 %v5339_v56  ;;  %v5407_v56 = vld [vmem:[%s7214_s1 + $0x548] sm:$0xff]  }
  0x6d   :  { %5059 = vmatpush3.bf16.msra.mxu1 %v5338_v55  ;;  %v5406_v55 = vld [vmem:[%s7214_s1 + $0x580] sm:$0xff]  }
  0x6e   :  { %5060 = vmatprep.subr.bf16.mxu1 %v5341_v58  ;;  %v5409_v58 = vld [vmem:[%s7214_s1 + $0x5c8] sm:$0xff]  }
  0x6f   :  { %5039 = vmatpush3.bf16.msra.mxu0 %v5340_v57  ;;  %v5408_v57 = vld [vmem:[%s7214_s1 + $0x508] sm:$0xff]  }
  0x70   :  { %5040 = vmatprep.subr.bf16.mxu0 %v5343_v60  ;;  %v5411_v60 = vld [vmem:[%s7214_s1 + $0x550] sm:$0xff]  }
  0x71   :  { %5061 = vmatpush3.bf16.msra.mxu1 %v5342_v59  ;;  %v5410_v59 = vld [vmem:[%s7214_s1 + $0x588] sm:$0xff]  }
  0x72   :  { %5062 = vmatprep.subr.bf16.mxu1 %v5345_v62  ;;  %v5413_v62 = vld [vmem:[%s7214_s1 + $0x5d0] sm:$0xff]  }
  0x73   :  { %5041 = vmatpush3.bf16.msra.mxu0 %v5344_v61  ;;  %v5412_v61 = vld [vmem:[%s7214_s1 + $0x510] sm:$0xff]  }
  0x74   :  { %5042 = vmatprep.subr.bf16.mxu0 %v5347_v0  ;;  %v5415_v0 = vld [vmem:[%s7214_s1 + $0x558] sm:$0xff]  }
  0x75   :  { %5063 = vmatpush3.bf16.msra.mxu1 %v5346_v63  ;;  %v5414_v63 = vld [vmem:[%s7214_s1 + $0x590] sm:$0xff]  }
  0x76   :  { %5064 = vmatprep.subr.bf16.mxu1 %v5349_v2  ;;  %v5417_v2 = vld [vmem:[%s7214_s1 + $0x5d8] sm:$0xff]  }
  0x77   :  { %5043 = vmatpush3.bf16.msra.mxu0 %v5348_v1  ;;  %v5416_v1 = vld [vmem:[%s7214_s1 + $0x518] sm:$0xff]  }
  0x78   :  { %5044 = vmatprep.subr.bf16.mxu0 %v5351_v4  ;;  %v5419_v4 = vld [vmem:[%s7214_s1 + $0x560] sm:$0xff]  }
  0x79   :  { %5065 = vmatpush3.bf16.msra.mxu1 %v5350_v3  ;;  %v5418_v3 = vld [vmem:[%s7214_s1 + $0x598] sm:$0xff]  }
  0x7a   :  { %5066 = vmatprep.subr.bf16.mxu1 %v5353_v6  ;;  %v5421_v6 = vld [vmem:[%s7214_s1 + $0x5e0] sm:$0xff]  }
  0x7b   :  { %5045 = vmatpush3.bf16.msra.mxu0 %v5352_v5  ;;  %v5420_v5 = vld [vmem:[%s7214_s1 + $0x520] sm:$0xff]  }
  0x7c   :  { %5046 = vmatprep.subr.bf16.mxu0 %v5355_v8  ;;  %v5423_v8 = vld [vmem:[%s7214_s1 + $0x568] sm:$0xff]  }
  0x7d   :  { %5067 = vmatpush3.bf16.msra.mxu1 %v5354_v7  ;;  %v5422_v7 = vld [vmem:[%s7214_s1 + $0x5a0] sm:$0xff]  }
  0x7e   :  { %5068 = vmatprep.subr.bf16.mxu1 %v5357_v10  ;;  %v5425_v10 = vld [vmem:[%s7214_s1 + $0x5e8] sm:$0xff]  }
  0x7f   :  { %5047 = vmatpush3.bf16.msra.mxu0 %v5356_v9  ;;  %v5424_v9 = vld [vmem:[%s7214_s1 + $0x528] sm:$0xff]  }
  0x80   :  { %5076 = vmatprep.subr.bf16.mxu0 %v5362_v14  ;;  %v5429_v14 = vld [vmem:[%s7214_s1 + $0x5f0] sm:$0xff]  }
  0x81   :  { %5069 = vmatpush3.bf16.msra.mxu1 %v5361_v13  ;;  %v5428_v13 = vld [vmem:[%s7214_s1 + $0x530] sm:$0xff]  }
  0x82   :  { %2030 = vmatmul.mubr.bf16.vlgmr.msra.gmra.mrb[12].mxu0 %v5358_v11  ;;  %5098 = vmatprep.subr.bf16.mxu1 %v5367_v18  ;;  %v5426_v11 = vld [vmem:[%s7214_s1 + $0x5a8] sm:$0xff]   ;;  %v5433_v18 = vld [vmem:[%s7214_s1 + $0x5f8] sm:$0xff]  }
  0x83   :  { %5077 = vmatpush3.bf16.msra.mxu0 %v5366_v17  ;;  %2111 = vmatprep.mubr.bf16.mxu0 %v5398_v48  ;;  %v5432_v17 = vld [vmem:[%s7214_s1 + $0x538] sm:$0xff]   ;;  %v5448_v48 = vld [vmem:[%s7217_s3 + $0x4] ss:$100 sps:$4 sm:$0xff]  }
  0x84   :  { %2071 = vmatmul.mubr.bf16.vlgmr.msra.gmra.mrb[12].mxu1 %v5363_v15  ;;  %5078 = vmatprep.subr.bf16.mxu0 %v5369_v20  ;;  %v5430_v15 = vld [vmem:[%s7214_s1 + $0x5b0] sm:$0xff]  }
  0x85   :  { %5099 = vmatpush3.bf16.msra.mxu1 %v5368_v19  ;;  %2152 = vmatprep.mubr.bf16.mxu1 %v5403_v52  ;;  %v5434_v19 = vld [vmem:[%s7215_s0 + $0x50] ss:$100 sps:$4 sm:$0xff]  }
  0x86   :  { %5100 = vmatprep.subr.bf16.mxu1 %v5371_v22  ;;  %v5436_v20 = vld [vmem:[%s7215_s0 + $0x54] ss:$100 sps:$4 sm:$0xff]   ;;  %v5742_v22 = vmov 0.0   ;;  %v5454_v52 = vld [vmem:[%s7217_s3 + $0xcc] ss:$100 sps:$4 sm:$0xff]  }
  0x87   :  { %5079 = vmatpush3.bf16.msra.mxu0 %v5370_v21  ;;  %v5437_v21 = vld [vmem:[%s7214_s1 + $0x5b8] sm:$0xff]  }
  0x88   :  { %5080 = vmatprep.subr.bf16.mxu0 %v5373_v24  ;;  %v5440_v24 = vld [vmem:[%s7215_s0 + $0x5c] ss:$100 sps:$4 sm:$0xff]  }
  0x89   :  { %5101 = vmatpush3.bf16.msra.mxu1 %v5372_v23  ;;  %v5438_v23 = vld [vmem:[%s7215_s0 + $0x58] ss:$100 sps:$4 sm:$0xff]  }
  0x8a   :  { %5102 = vmatprep.subr.bf16.mxu1 %v5375_v26  ;;  %v5442_v26 = vld [vmem:[%s7214_s1 + $0x608] sm:$0xff]  }
  0x8b   :  { %5081 = vmatpush3.bf16.msra.mxu0 %v5374_v25  ;;  %v5441_v25 = vld [vmem:[%s7214_s1 + $0x600] sm:$0xff]  }
  0x8c   :  { %5082 = vmatprep.subr.bf16.mxu0 %v5377_v28  ;;  %v5444_v28 = vld [vmem:[%s7214_s1 + $0x618] sm:$0xff]  }
  0x8d   :  { %5103 = vmatpush3.bf16.msra.mxu1 %v5376_v27  ;;  %v5443_v27 = vld [vmem:[%s7214_s1 + $0x610] sm:$0xff]  }
  0x8e   :  { %5104 = vmatprep.subr.bf16.mxu1 %v5379_v30 }
  0x8f   :  { %5083 = vmatpush3.bf16.msra.mxu0 %v5378_v29  ;;  %v5445_v29 = vld [vmem:[%s7215_s0 + $0x60] ss:$100 sps:$4 sm:$0xff]  }
  0x90   :  { %5084 = vmatprep.subr.bf16.mxu0 %v5381_v32 }
  0x91   :  { %5105 = vmatpush3.bf16.msra.mxu1 %v5380_v31  ;;  %v4424_v31 = vld [vmem:[%s7216_s2] ss:$0 sm:$0xff] }
  0x92   :  { %5106 = vmatprep.subr.bf16.mxu1 %v5383_v34 }
  0x93   :  { %5085 = vmatpush3.bf16.msra.mxu0 %v5382_v33 }
  0x94   :  { %5086 = vmatprep.subr.bf16.mxu0 %v5385_v36 }
  0x95   :  { %5107 = vmatpush3.bf16.msra.mxu1 %v5384_v35 }
  0x96   :  { %5108 = vmatprep.subr.bf16.mxu1 %v5387_v38 }
  0x97   :  { %5087 = vmatpush3.bf16.msra.mxu0 %v5386_v37 }
  0x98   :  { %5088 = vmatprep.subr.bf16.mxu0 %v5389_v40 }
  0x99   :  { %5109 = vmatpush3.bf16.msra.mxu1 %v5388_v39 }
  0x9a   :  { %5110 = vmatprep.subr.bf16.mxu1 %v5391_v42 }
  0x9b   :  { %5089 = vmatpush3.bf16.msra.mxu0 %v5390_v41 }
  0x9c   :  { %5090 = vmatprep.subr.bf16.mxu0 %v5393_v44 }
  0x9d   :  { %5111 = vmatpush3.bf16.msra.mxu1 %v5392_v43 }
  0x9e   :  { %5112 = vmatprep.subr.bf16.mxu1 %v5395_v46 }
  0x9f   :  { %5091 = vmatpush3.bf16.msra.mxu0 %v5394_v45 }
  0xa0   :  { %5120 = vmatprep.subr.bf16.mxu0 %v5400_v50  ;;  %v5451_v50 = vld [vmem:[%s7217_s3 + $0xc] ss:$100 sps:$4 sm:$0xff]  }
  0xa1   :  { %5113 = vmatpush3.bf16.msra.mxu1 %v5399_v49  ;;  %v5449_v49 = vld [vmem:[%s7217_s3 + $0x8] ss:$100 sps:$4 sm:$0xff]  }
  0xa2   :  { %2112 = vmatmul.mubr.bf16.vlgmr.msra.gmra.mrb[16].mxu0 %v5396_v47  ;;  %5142 = vmatprep.subr.bf16.mxu1 %v5405_v54  ;;  %v5446_v47 = vld [vmem:[%s7217_s3] ss:$100 sps:$4 sm:$0xff]   ;;  %v5457_v54 = vld [vmem:[%s7217_s3 + $0xd4] ss:$100 sps:$4 sm:$0xff]  }
  0xa3   :  { %5121 = vmatpush3.bf16.msra.mxu0 %v5404_v53  ;;  %2193 = vmatprep.mubr.bf16.mxu0 %v5436_v20  ;;  %v5455_v53 = vld [vmem:[%s7217_s3 + $0xd0] ss:$100 sps:$4 sm:$0xff]   ;;  %v5476_v20 = vld [vmem:[%s7217_s3 + $0x3e8] ss:$100 sps:$4 sm:$0xff]  }
  0xa4   :  { %2153 = vmatmul.mubr.bf16.vlgmr.msra.gmra.mrb[16].mxu1 %v5401_v51  ;;  %5122 = vmatprep.subr.bf16.mxu0 %v5407_v56  ;;  %v5452_v51 = vld [vmem:[%s7217_s3 + $0xc8] ss:$100 sps:$4 sm:$0xff]   ;;  %v5460_v56 = vld [vmem:[%s7217_s3 + $0x194] ss:$100 sps:$4 sm:$0xff]  }
  0xa5   :  { %5143 = vmatpush3.bf16.msra.mxu1 %v5406_v55  ;;  %2234 = vmatprep.mubr.bf16.mxu1 %v5440_v24  ;;  %v5458_v55 = vld [vmem:[%s7217_s3 + $0x190] ss:$100 sps:$4 sm:$0xff]  }
  0xa6   :  { %5144 = vmatprep.subr.bf16.mxu1 %v5409_v58  ;;  %v5463_v58 = vld [vmem:[%s7217_s3 + $0x19c] ss:$100 sps:$4 sm:$0xff]   ;;  %v5484_v24 = vld [vmem:[%s7217_s3 + $0x4b4] ss:$100 sps:$4 sm:$0xff]  }
  0xa7   :  { %5123 = vmatpush3.bf16.msra.mxu0 %v5408_v57  ;;  %v5461_v57 = vld [vmem:[%s7217_s3 + $0x198] ss:$100 sps:$4 sm:$0xff]  }
  0xa8   :  { %5124 = vmatprep.subr.bf16.mxu0 %v5411_v60 }
  0xa9   :  { %5145 = vmatpush3.bf16.msra.mxu1 %v5410_v59 }
  0xaa   :  { %5146 = vmatprep.subr.bf16.mxu1 %v5413_v62 }
  0xab   :  { %5125 = vmatpush3.bf16.msra.mxu0 %v5412_v61 }
  0xac   :  { %5126 = vmatprep.subr.bf16.mxu0 %v5415_v0 }
  0xad   :  { %5147 = vmatpush3.bf16.msra.mxu1 %v5414_v63 }
  0xae   :  { %5148 = vmatprep.subr.bf16.mxu1 %v5417_v2 }
  0xaf   :  { %5127 = vmatpush3.bf16.msra.mxu0 %v5416_v1 }
  0xb0   :  { %5128 = vmatprep.subr.bf16.mxu0 %v5419_v4 }
  0xb1   :  { %5149 = vmatpush3.bf16.msra.mxu1 %v5418_v3 }
  0xb2   :  { %5150 = vmatprep.subr.bf16.mxu1 %v5421_v6 }
  0xb3   :  { %5129 = vmatpush3.bf16.msra.mxu0 %v5420_v5 }
  0xb4   :  { %5130 = vmatprep.subr.bf16.mxu0 %v5423_v8 }
  0xb5   :  { %5151 = vmatpush3.bf16.msra.mxu1 %v5422_v7 }
  0xb6   :  { %5152 = vmatprep.subr.bf16.mxu1 %v5425_v10 }
  0xb7   :  { %5131 = vmatpush3.bf16.msra.mxu0 %v5424_v9 }
  0xb8   :  { %5132 = vmatprep.subr.bf16.mxu0 %v5427_v12  ;;  %v5469_v12 = vld [vmem:[%s7217_s3 + $0x264] ss:$100 sps:$4 sm:$0xff]  }
  0xb9   :  { %5153 = vmatpush3.bf16.msra.mxu1 %v5426_v11  ;;  %v5466_v11 = vld [vmem:[%s7217_s3 + $0x25c] ss:$100 sps:$4 sm:$0xff]  }
  0xba   :  { %5154 = vmatprep.subr.bf16.mxu1 %v5429_v14  ;;  %v5467_v14 = vld [vmem:[%s7217_s3 + $0x260] ss:$100 sps:$4 sm:$0xff]  }
  0xbb   :  { %5133 = vmatpush3.bf16.msra.mxu0 %v5428_v13  ;;  %v5464_v13 = vld [vmem:[%s7217_s3 + $0x258] ss:$100 sps:$4 sm:$0xff]  }
  0xbc   :  { %5134 = vmatprep.subr.bf16.mxu0 %v5431_v16  ;;  %v5475_v16 = vld [vmem:[%s7217_s3 + $0x32c] ss:$100 sps:$4 sm:$0xff]  }
  0xbd   :  { %5155 = vmatpush3.bf16.msra.mxu1 %v5430_v15  ;;  %v5472_v15 = vld [vmem:[%s7217_s3 + $0x324] ss:$100 sps:$4 sm:$0xff]  }
  0xbe   :  { %5156 = vmatprep.subr.bf16.mxu1 %v5433_v18  ;;  %v5473_v18 = vld [vmem:[%s7217_s3 + $0x328] ss:$100 sps:$4 sm:$0xff]  }
  0xbf   :  { %5135 = vmatpush3.bf16.msra.mxu0 %v5432_v17  ;;  %v5470_v17 = vld [vmem:[%s7217_s3 + $0x320] ss:$100 sps:$4 sm:$0xff]  }
  0xc0   :  { %5178 = vmatprep.subr.bf16.mxu0 %v5742_v22 }
  0xc1   :  { %5157 = vmatpush3.bf16.msra.mxu1 %v5437_v21  ;;  %v5479_v21 = vld [vmem:[%s7217_s3 + $0x3f0] ss:$100 sps:$4 sm:$0xff]  }
  0xc2   :  { %2194 = vmatmul.mubr.bf16.vlgmr.msra.gmra.mrb[20].mxu0 %v5434_v19  ;;  %3634 = vmatprep.subr.bf16.mxu1 %v5448_v48  ;;  %v5478_v19 = vld [vmem:[%s7217_s3 + $0x3ec] ss:$100 sps:$4 sm:$0xff]  }
  0xc3   :  { %5186 = vmatprep.mubr.msk.bf16.mxu0 %vm5743_vm0, %v5742_v22  ;;  %5179 = vmatpush3.bf16.msra.mxu0 %v5441_v25  ;;  %v5487_v25 = vld [vmem:[%s7217_s3 + $0x4bc] ss:$100 sps:$4 sm:$0xff]  }
  0xc4   :  { %2235 = vmatmul.mubr.bf16.vlgmr.msra.gmra.mrb[20].mxu1 %v5438_v23  ;;  %5180 = vmatprep.subr.bf16.mxu0 %v5742_v22  ;;  %v5481_v23 = vld [vmem:[%s7217_s3 + $0x3f4] ss:$100 sps:$4 sm:$0xff]  }
  0xc5   :  { %3635 = vmatpush1.bf16.msra.mxu1 %v5446_v47 }
  0xc6   :  { %3636 = vmatprep.subr.bf16.mxu1 %v5454_v52 }
  0xc7   :  { %5181 = vmatpush3.bf16.msra.mxu0 %v5442_v26  ;;  %v5482_v26 = vld [vmem:[%s7217_s3 + $0x4b0] ss:$100 sps:$4 sm:$0xff]  }
  0xc8   :  { %5182 = vmatprep.subr.bf16.mxu0 %v5742_v22 }
  0xc9   :  { %3637 = vmatpush1.bf16.msra.mxu1 %v5452_v51 }
  0xca   :  { %3638 = vmatprep.subr.bf16.mxu1 %v5460_v56 }
  0xcb   :  { %5183 = vmatpush3.bf16.msra.mxu0 %v5443_v27  ;;  %v5485_v27 = vld [vmem:[%s7217_s3 + $0x4b8] ss:$100 sps:$4 sm:$0xff]  }
  0xcc   :  { %5184 = vmatprep.subr.bf16.mxu0 %v5742_v22 }
  0xcd   :  { %3639 = vmatpush1.bf16.msra.mxu1 %v5458_v55 }
  0xce   :  { %3640 = vmatprep.subr.bf16.mxu1 %v5466_v11 }
  0xcf   :  { %5185 = vmatpush3.bf16.msra.mxu0 %v5444_v28  ;;  %v5490_v28 = vld [vmem:[%s7217_s3 + $0x57c] ss:$100 sps:$4 sm:$0xff]  }
  0xd0   :  { %3677 = vmatprep.subr.bf16.mxu0 %v5451_v50 }
  0xd1   :  { %3641 = vmatpush1.bf16.msra.mxu1 %v5464_v13 }
  0xd2   :  { %5187 = vmatmul.mubr.msk.bf16.vlgmr.msra.gmra.mrb[24].mxu0 %vm1747_vm1, %v5445_v29  ;;  %3642 = vmatprep.subr.bf16.mxu1 %v5472_v15  ;;  %v5493_v29 = vld [vmem:[%s7217_s3 + $0x584] ss:$100 sps:$4 sm:$0xff]  }
  0xd3   :  { %3678 = vmatpush1.bf16.msra.mxu0 %v5449_v49 }
  0xd4   :  { %3679 = vmatprep.subr.bf16.mxu0 %v5457_v54 }
  0xd5   :  { %3643 = vmatpush1.bf16.msra.mxu1 %v5470_v17 }
  0xd6   :  { %3644 = vmatprep.subr.bf16.mxu1 %v5478_v19 }
  0xd7   :  { %3680 = vmatpush1.bf16.msra.mxu0 %v5455_v53 }
  0xd8   :  { %3681 = vmatprep.subr.bf16.mxu0 %v5463_v58 }
  0xd9   :  { %3645 = vmatpush1.bf16.msra.mxu1 %v5476_v20 }
  0xda   :  { %3646 = vmatprep.subr.bf16.mxu1 %v5484_v24 }
  0xdb   :  { %3682 = vmatpush1.bf16.msra.mxu0 %v5461_v57 }
  0xdc   :  { %3683 = vmatprep.subr.bf16.mxu0 %v5469_v12 }
  0xdd   :  { %3647 = vmatpush1.bf16.msra.mxu1 %v5482_v26 }
  0xde   :  { %3648 = vmatprep.subr.bf16.mxu1 %v5490_v28 }
  0xdf   :  { %3684 = vmatpush1.bf16.msra.mxu0 %v5467_v14 }
  0xe0   :  { %3685 = vmatprep.subr.bf16.mxu0 %v5475_v16 }
  0xe3   :  { %3686 = vmatpush1.bf16.msra.mxu0 %v5473_v18 }
  0xe4   :  { %3687 = vmatprep.subr.bf16.mxu0 %v5481_v23 }
  0xe7   :  { %3688 = vmatpush1.bf16.msra.mxu0 %v5479_v21 }
  0xe8   :  { %3689 = vmatprep.subr.bf16.mxu0 %v5487_v25 }
  0xeb   :  { %3690 = vmatpush1.bf16.msra.mxu0 %v5485_v27 }
  0xec   :  { %3691 = vmatprep.subr.bf16.mxu0 %v5493_v29 }
  0xf5   :  { %v4916_v30 = vpop.f32.mrb[0].mxu0 }
  0xf6   :  { %v4917_v32 = vpop.f32.mrb[1].mxu0 }
  0xf7   :  { %v4918_v33 = vadd.f32 %v4917_v32, %v4916_v30  ;;  %v4919_v34 = vpop.f32.mrb[2].mxu0  ;;  %v4938_v35 = vpop.f32.mrb[0].mxu1  ;;  %v5488_v30 = vld [vmem:[%s7217_s3 + $0x578] ss:$100 sps:$4 sm:$0xff]  }
  0xf8   :  { %v4920_v36 = vpop.f32.mrb[3].mxu0  ;;  %v4939_v39 = vpop.f32.mrb[1].mxu1  ;;  %3649 = vmatpush1.bf16.msra.mxu1 %v5488_v30  ;;  %v5496_v32 = vld [vmem:[%s7217_s3 + $0x14] ss:$100 sps:$4 sm:$0xff]  }
  0xf9   :  { %v1786_v37 = vadd.f32 %v4918_v33, %v4424_v31  ;;  %v4921_v38 = vadd.f32 %v4920_v36, %v4919_v34  ;;  %v4940_v40 = vadd.f32 %v4939_v39, %v4938_v35  ;;  %v4941_v41 = vpop.f32.mrb[2].mxu1  ;;  %v5499_v33 = vld [vmem:[%s7217_s3 + $0x1c] ss:$100 sps:$4 sm:$0xff]   ;;  %v5744_v34 = vmov 0   ;;  %3720 = vmatprep.subr.bf16.mxu1 %v5496_v32 }
  0xfa   :  { %v4942_v43 = vpop.f32.mrb[3].mxu1  ;;  %3666 = vmatprep.mubr.bf16.mxu1 %v5744_v34  ;;  %3709 = vmatprep.mubr.bf16.mxu0 %v5744_v34 }
  0xfb   :  { %v1789_v42 = vadd.f32 %v4921_v38, %v4424_v31  ;;  %v1827_v44 = vadd.f32 %v4940_v40, %v1786_v37  ;;  %v4943_v45 = vadd.f32 %v4942_v43, %v4941_v41  ;;  %v5491_v31 = vld [vmem:[%s7217_s3 + $0x580] ss:$100 sps:$4 sm:$0xff]  }
  0xfc   :  { %3692 = vmatpush1.bf16.msra.mxu0 %v5491_v31 }
  0xfd   :  { %v1830_v46 = vadd.f32 %v4943_v45, %v1789_v42  ;;  %3763 = vmatprep.subr.bf16.mxu0 %v5499_v33 }
 0x115   :  { %v4960_v59 = vpop.f32.mrb[4].mxu0 }
 0x116   :  { %v4961_v60 = vpop.f32.mrb[5].mxu0 }
 0x117   :  { %v4962_v61 = vadd.f32 %v4961_v60, %v4960_v59  ;;  %v4963_v62 = vpop.f32.mrb[6].mxu0  ;;  %v4982_v1 = vpop.f32.mrb[4].mxu1 }
 0x118   :  { %v4964_v63 = vpop.f32.mrb[7].mxu0  ;;  %v4983_v3 = vpop.f32.mrb[5].mxu1 }
 0x119   :  { %v1868_v0 = vadd.f32 %v4962_v61, %v1827_v44  ;;  %v4965_v2 = vadd.f32 %v4964_v63, %v4963_v62  ;;  %v4984_v5 = vadd.f32 %v4983_v3, %v4982_v1  ;;  %v4985_v6 = vpop.f32.mrb[6].mxu1 }
 0x11a   :  { %v4986_v7 = vpop.f32.mrb[7].mxu1 }
 0x11b   :  { %v1871_v4 = vadd.f32 %v4965_v2, %v1830_v46  ;;  %v1909_v8 = vadd.f32 %v4984_v5, %v1868_v0  ;;  %v4987_v9 = vadd.f32 %v4986_v7, %v4985_v6 }
 0x11d   :  { %v1912_v10 = vadd.f32 %v4987_v9, %v1871_v4 }
 0x135   :  { %v5004_v35 = vpop.f32.mrb[8].mxu0 }
 0x136   :  { %v5005_v36 = vpop.f32.mrb[9].mxu0 }
 0x137   :  { %v5006_v37 = vadd.f32 %v5005_v36, %v5004_v35  ;;  %v5007_v38 = vpop.f32.mrb[10].mxu0  ;;  %v5026_v39 = vpop.f32.mrb[8].mxu1 }
 0x138   :  { %v5008_v40 = vpop.f32.mrb[11].mxu0  ;;  %v5027_v43 = vpop.f32.mrb[9].mxu1 }
 0x139   :  { %v1950_v41 = vadd.f32 %v5006_v37, %v1909_v8  ;;  %v5009_v42 = vadd.f32 %v5008_v40, %v5007_v38  ;;  %v5028_v44 = vadd.f32 %v5027_v43, %v5026_v39  ;;  %v5029_v45 = vpop.f32.mrb[10].mxu1  ;;  %v5494_v43 = vld [vmem:[%s7217_s3 + $0x10] ss:$100 sps:$4 sm:$0xff]  }
 0x13a   :  { %v5030_v47 = vpop.f32.mrb[11].mxu1 }
 0x13b   :  { %v1953_v46 = vadd.f32 %v5009_v42, %v1912_v10  ;;  %v1991_v48 = vadd.f32 %v5028_v44, %v1950_v41  ;;  %v5031_v49 = vadd.f32 %v5030_v47, %v5029_v45  ;;  %v5497_v44 = vld [vmem:[%s7217_s3 + $0x18] ss:$100 sps:$4 sm:$0xff]   ;;  %v5505_v47 = vld [vmem:[%s7217_s3 + $0xe4] ss:$100 sps:$4 sm:$0xff]  }
 0x13d   :  { %v1994_v50 = vadd.f32 %v5031_v49, %v1953_v46  ;;  %v5502_v46 = vld [vmem:[%s7217_s3 + $0xdc] ss:$100 sps:$4 sm:$0xff]  }
 0x13e   :  { %v5503_v49 = vld [vmem:[%s7217_s3 + $0xe0] ss:$100 sps:$4 sm:$0xff]  }
 0x155   :  { %v5048_v51 = vpop.f32.mrb[12].mxu0 }
 0x156   :  { %v5049_v52 = vpop.f32.mrb[13].mxu0 }
 0x157   :  { %v5050_v53 = vadd.f32 %v5049_v52, %v5048_v51  ;;  %v5051_v54 = vpop.f32.mrb[14].mxu0  ;;  %v5070_v55 = vpop.f32.mrb[12].mxu1  ;;  %v5511_v51 = vld [vmem:[%s7217_s3 + $0x1ac] ss:$100 sps:$4 sm:$0xff]   ;;  %v5506_v52 = vld [vmem:[%s7217_s3 + $0x1a0] ss:$100 sps:$4 sm:$0xff]  }
 0x158   :  { %v5052_v56 = vpop.f32.mrb[15].mxu0  ;;  %v5071_v59 = vpop.f32.mrb[13].mxu1 }
 0x159   :  { %v2032_v57 = vadd.f32 %v5050_v53, %v1991_v48  ;;  %v5053_v58 = vadd.f32 %v5052_v56, %v5051_v54  ;;  %v5072_v60 = vadd.f32 %v5071_v59, %v5070_v55  ;;  %v5073_v61 = vpop.f32.mrb[14].mxu1  ;;  %v5500_v48 = vld [vmem:[%s7217_s3 + $0xd8] ss:$100 sps:$4 sm:$0xff]   ;;  %v5509_v53 = vld [vmem:[%s7217_s3 + $0x1a8] ss:$100 sps:$4 sm:$0xff]  }
 0x15a   :  { %v5074_v63 = vpop.f32.mrb[15].mxu1  ;;  %v5514_v54 = vld [vmem:[%s7217_s3 + $0x26c] ss:$100 sps:$4 sm:$0xff]   ;;  %v5517_v55 = vld [vmem:[%s7217_s3 + $0x274] ss:$100 sps:$4 sm:$0xff]  }
 0x15b   :  { %v2035_v62 = vadd.f32 %v5053_v58, %v1994_v50  ;;  %v2073_v0 = vadd.f32 %v5072_v60, %v2032_v57  ;;  %v5075_v1 = vadd.f32 %v5074_v63, %v5073_v61  ;;  %v5508_v50 = vld [vmem:[%s7217_s3 + $0x1a4] ss:$100 sps:$4 sm:$0xff]   ;;  %v5515_v57 = vld [vmem:[%s7217_s3 + $0x270] ss:$100 sps:$4 sm:$0xff]   ;;  %v5523_v59 = vld [vmem:[%s7217_s3 + $0x33c] ss:$100 sps:$4 sm:$0xff]  }
 0x15c   :  { %v5512_v56 = vld [vmem:[%s7217_s3 + $0x268] ss:$100 sps:$4 sm:$0xff]   ;;  %v5520_v58 = vld [vmem:[%s7217_s3 + $0x334] ss:$100 sps:$4 sm:$0xff]  }
 0x15d   :  { %v2076_v2 = vadd.f32 %v5075_v1, %v2035_v62  ;;  %v5518_v60 = vld [vmem:[%s7217_s3 + $0x330] ss:$100 sps:$4 sm:$0xff]   ;;  %v5521_v61 = vld [vmem:[%s7217_s3 + $0x338] ss:$100 sps:$4 sm:$0xff]   ;;  %v5529_v63 = vld [vmem:[%s7217_s3 + $0x404] ss:$100 sps:$4 sm:$0xff]  }
 0x15e   :  { %v5526_v62 = vld [vmem:[%s7217_s3 + $0x3fc] ss:$100 sps:$4 sm:$0xff]  }
 0x15f   :  { %v5527_v1 = vld [vmem:[%s7217_s3 + $0x400] ss:$100 sps:$4 sm:$0xff]  }
 0x175   :  { %v5092_v3 = vpop.f32.mrb[16].mxu0 }
 0x176   :  { %v5093_v4 = vpop.f32.mrb[17].mxu0 }
 0x177   :  { %v5094_v5 = vadd.f32 %v5093_v4, %v5092_v3  ;;  %v5095_v6 = vpop.f32.mrb[18].mxu0  ;;  %v5114_v9 = vpop.f32.mrb[16].mxu1  ;;  %v5535_v3 = vld [vmem:[%s7217_s3 + $0x4cc] ss:$100 sps:$4 sm:$0xff]   ;;  %v5530_v4 = vld [vmem:[%s7217_s3 + $0x4c0] ss:$100 sps:$4 sm:$0xff]  }
 0x178   :  { %v5096_v7 = vpop.f32.mrb[19].mxu0  ;;  %v5115_v11 = vpop.f32.mrb[17].mxu1 }
 0x179   :  { %v2114_v8 = vadd.f32 %v5094_v5, %v2073_v0  ;;  %v5097_v10 = vadd.f32 %v5096_v7, %v5095_v6  ;;  %v5116_v13 = vadd.f32 %v5115_v11, %v5114_v9  ;;  %v5117_v14 = vpop.f32.mrb[18].mxu1  ;;  %v5524_v0 = vld [vmem:[%s7217_s3 + $0x3f8] ss:$100 sps:$4 sm:$0xff]   ;;  %v5533_v5 = vld [vmem:[%s7217_s3 + $0x4c8] ss:$100 sps:$4 sm:$0xff]  }
 0x17a   :  { %v5118_v15 = vpop.f32.mrb[19].mxu1  ;;  %v5538_v6 = vld [vmem:[%s7217_s3 + $0x58c] ss:$100 sps:$4 sm:$0xff]   ;;  %v5541_v7 = vld [vmem:[%s7217_s3 + $0x594] ss:$100 sps:$4 sm:$0xff]  }
 0x17b   :  { %v2117_v12 = vadd.f32 %v5097_v10, %v2076_v2  ;;  %v2155_v16 = vadd.f32 %v5116_v13, %v2114_v8  ;;  %v5119_v17 = vadd.f32 %v5118_v15, %v5117_v14  ;;  %v5532_v2 = vld [vmem:[%s7217_s3 + $0x4c4] ss:$100 sps:$4 sm:$0xff]   ;;  %v5539_v9 = vld [vmem:[%s7217_s3 + $0x590] ss:$100 sps:$4 sm:$0xff]  }
 0x17c   :  { %v5536_v8 = vld [vmem:[%s7217_s3 + $0x588] ss:$100 sps:$4 sm:$0xff]   ;;  %v5553_v15 = vld [vmem:[%s7217_s3 + $0xf4] ss:$100 sps:$4 sm:$0xff]  }
 0x17d   :  { %v2158_v18 = vadd.f32 %v5119_v17, %v2117_v12  ;;  %v5544_v10 = vld [vmem:[%s7217_s3 + $0x24] ss:$100 sps:$4 sm:$0xff]   ;;  %v5547_v11 = vld [vmem:[%s7217_s3 + $0x2c] ss:$100 sps:$4 sm:$0xff]  }
 0x17e   :  { %v5542_v12 = vld [vmem:[%s7217_s3 + $0x20] ss:$100 sps:$4 sm:$0xff]   ;;  %v5545_v13 = vld [vmem:[%s7217_s3 + $0x28] ss:$100 sps:$4 sm:$0xff]   ;;  %v5551_v17 = vld [vmem:[%s7217_s3 + $0xf0] ss:$100 sps:$4 sm:$0xff]  }
 0x17f   :  { %v5550_v14 = vld [vmem:[%s7217_s3 + $0xec] ss:$100 sps:$4 sm:$0xff]  }
 0x195   :  { %v5136_v19 = vpop.f32.mrb[20].mxu0 }
 0x196   :  { %v5137_v20 = vpop.f32.mrb[21].mxu0 }
 0x197   :  { %v5138_v21 = vadd.f32 %v5137_v20, %v5136_v19  ;;  %v5139_v23 = vpop.f32.mrb[22].mxu0  ;;  %v5158_v24 = vpop.f32.mrb[20].mxu1  ;;  %v5559_v19 = vld [vmem:[%s7217_s3 + $0x1bc] ss:$100 sps:$4 sm:$0xff]   ;;  %v5554_v20 = vld [vmem:[%s7217_s3 + $0x1b0] ss:$100 sps:$4 sm:$0xff]  }
 0x198   :  { %v5140_v25 = vpop.f32.mrb[23].mxu0  ;;  %v5159_v28 = vpop.f32.mrb[21].mxu1 }
 0x199   :  { %v2196_v26 = vadd.f32 %v5138_v21, %v2155_v16  ;;  %v5141_v27 = vadd.f32 %v5140_v25, %v5139_v23  ;;  %v5160_v29 = vadd.f32 %v5159_v28, %v5158_v24  ;;  %v5161_v30 = vpop.f32.mrb[22].mxu1  ;;  %v5548_v16 = vld [vmem:[%s7217_s3 + $0xe8] ss:$100 sps:$4 sm:$0xff]   ;;  %v5557_v21 = vld [vmem:[%s7217_s3 + $0x1b8] ss:$100 sps:$4 sm:$0xff]  }
 0x19a   :  { %v5162_v32 = vpop.f32.mrb[23].mxu1  ;;  %v5562_v23 = vld [vmem:[%s7217_s3 + $0x27c] ss:$100 sps:$4 sm:$0xff]   ;;  %v5565_v24 = vld [vmem:[%s7217_s3 + $0x284] ss:$100 sps:$4 sm:$0xff]  }
 0x19b   :  { %v2199_v31 = vadd.f32 %v5141_v27, %v2158_v18  ;;  %v5163_v33 = vadd.f32 %v5162_v32, %v5161_v30  ;;  %v2237_v35 = vadd.f32 %v5160_v29, %v2196_v26  ;;  %v5556_v18 = vld [vmem:[%s7217_s3 + $0x1b4] ss:$100 sps:$4 sm:$0xff]   ;;  %v5563_v26 = vld [vmem:[%s7217_s3 + $0x280] ss:$100 sps:$4 sm:$0xff]   ;;  %v5571_v28 = vld [vmem:[%s7217_s3 + $0x34c] ss:$100 sps:$4 sm:$0xff]  }
 0x19c   :  { %v5560_v25 = vld [vmem:[%s7217_s3 + $0x278] ss:$100 sps:$4 sm:$0xff]   ;;  %v5568_v27 = vld [vmem:[%s7217_s3 + $0x344] ss:$100 sps:$4 sm:$0xff]  }
 0x19d   :  { %v2240_v36 = vadd.f32 %v5163_v33, %v2199_v31  ;;  %v5566_v29 = vld [vmem:[%s7217_s3 + $0x340] ss:$100 sps:$4 sm:$0xff]   ;;  %v5569_v30 = vld [vmem:[%s7217_s3 + $0x348] ss:$100 sps:$4 sm:$0xff]   ;;  %v5577_v32 = vld [vmem:[%s7217_s3 + $0x414] ss:$100 sps:$4 sm:$0xff]  }
 0x19e   :  { %v5574_v31 = vld [vmem:[%s7217_s3 + $0x40c] ss:$100 sps:$4 sm:$0xff]  }
 0x19f   :  { %v5572_v33 = vld [vmem:[%s7217_s3 + $0x408] ss:$100 sps:$4 sm:$0xff]  }
 0x1a5   :  { %v2277_v37 = vpop.f32.mrb[24].mxu0 }
 0x1a6   :  { %v2278_v38 = vadd.f32 %v2277_v37, %v2237_v35  ;;  %v5188_v39 = vpop.f32.mrb[25].mxu0  ;;  %v5575_v35 = vld [vmem:[%s7217_s3 + $0x410] ss:$100 sps:$4 sm:$0xff]   ;;  %v5583_v37 = vld [vmem:[%s7217_s3 + $0x4dc] ss:$100 sps:$4 sm:$0xff]  }
 0x1a7   :  { %v2280_v40 = vpop.f32.mrb[26].mxu0  ;;  %v5581_v39 = vld [vmem:[%s7217_s3 + $0x4d8] ss:$100 sps:$4 sm:$0xff]  }
 0x1a8   :  { %v2281_v41 = vadd.f32 %v2280_v40, %v2240_v36  ;;  %v5189_v42 = vpop.f32.mrb[27].mxu0  ;;  %v5580_v36 = vld [vmem:[%s7217_s3 + $0x4d4] ss:$100 sps:$4 sm:$0xff]   ;;  %v5586_v40 = vld [vmem:[%s7217_s3 + $0x59c] ss:$100 sps:$4 sm:$0xff]  }
 0x1a9   :  { %v5584_v42 = vld [vmem:[%s7217_s3 + $0x598] ss:$100 sps:$4 sm:$0xff]  }
 0x1aa   :  { %v6557_v45 = vpack.c.bf16 %v2281_v41, %v2278_v38  ;;  %v5578_v38 = vld [vmem:[%s7217_s3 + $0x4d0] ss:$100 sps:$4 sm:$0xff]   ;;  %v5589_v41 = vld [vmem:[%s7217_s3 + $0x5a4] ss:$100 sps:$4 sm:$0xff]  }
 0x1ac   :  { %3667 = vmatmul.mubr.bf16.vlgmr.msra.gmra.mrb[24].mxu1 %v6557_v45  ;;  %3710 = vmatmul.mubr.bf16.vlgmr.msra.gmra.mrb[28].mxu0 %v6557_v45 }
 0x1ad   :  { %3721 = vmatpush1.bf16.msra.mxu1 %v5494_v43  ;;  %3764 = vmatpush1.bf16.msra.mxu0 %v5497_v44  ;;  %v5587_v43 = vld [vmem:[%s7217_s3 + $0x5a0] ss:$100 sps:$4 sm:$0xff]   ;;  %v5592_v44 = vld [vmem:[%s7217_s3 + $0x34] ss:$100 sps:$4 sm:$0xff]  }
 0x1ae   :  { %3722 = vmatprep.subr.bf16.mxu1 %v5502_v46  ;;  %3765 = vmatprep.subr.bf16.mxu0 %v5505_v47  ;;  %v5595_v46 = vld [vmem:[%s7217_s3 + $0x3c] ss:$100 sps:$4 sm:$0xff]   ;;  %v5590_v47 = vld [vmem:[%s7217_s3 + $0x30] ss:$100 sps:$4 sm:$0xff]  }
 0x1af   :  { %3752 = vmatprep.mubr.bf16.mxu1 %v5744_v34  ;;  %3795 = vmatprep.mubr.bf16.mxu0 %v5744_v34 }
 0x1b1   :  { %3723 = vmatpush1.bf16.msra.mxu1 %v5500_v48  ;;  %3766 = vmatpush1.bf16.msra.mxu0 %v5503_v49  ;;  %v5593_v48 = vld [vmem:[%s7217_s3 + $0x38] ss:$100 sps:$4 sm:$0xff]  }
 0x1b2   :  { %3724 = vmatprep.subr.bf16.mxu1 %v5508_v50  ;;  %3767 = vmatprep.subr.bf16.mxu0 %v5511_v51  ;;  %v5598_v49 = vld [vmem:[%s7217_s3 + $0xfc] ss:$100 sps:$4 sm:$0xff]   ;;  %v5601_v50 = vld [vmem:[%s7217_s3 + $0x104] ss:$100 sps:$4 sm:$0xff]  }
 0x1b3   :  { %v5596_v51 = vld [vmem:[%s7217_s3 + $0xf8] ss:$100 sps:$4 sm:$0xff]  }
 0x1b5   :  { %3725 = vmatpush1.bf16.msra.mxu1 %v5506_v52  ;;  %3768 = vmatpush1.bf16.msra.mxu0 %v5509_v53  ;;  %v5599_v52 = vld [vmem:[%s7217_s3 + $0x100] ss:$100 sps:$4 sm:$0xff]  }
 0x1b6   :  { %3726 = vmatprep.subr.bf16.mxu1 %v5514_v54  ;;  %3769 = vmatprep.subr.bf16.mxu0 %v5517_v55  ;;  %v5604_v53 = vld [vmem:[%s7217_s3 + $0x1c4] ss:$100 sps:$4 sm:$0xff]   ;;  %v5607_v54 = vld [vmem:[%s7217_s3 + $0x1cc] ss:$100 sps:$4 sm:$0xff]  }
 0x1b7   :  { %v5602_v55 = vld [vmem:[%s7217_s3 + $0x1c0] ss:$100 sps:$4 sm:$0xff]  }
 0x1b9   :  { %3727 = vmatpush1.bf16.msra.mxu1 %v5512_v56  ;;  %3770 = vmatpush1.bf16.msra.mxu0 %v5515_v57  ;;  %v5605_v56 = vld [vmem:[%s7217_s3 + $0x1c8] ss:$100 sps:$4 sm:$0xff]  }
 0x1ba   :  { %3728 = vmatprep.subr.bf16.mxu1 %v5520_v58  ;;  %3771 = vmatprep.subr.bf16.mxu0 %v5523_v59  ;;  %v5610_v57 = vld [vmem:[%s7217_s3 + $0x28c] ss:$100 sps:$4 sm:$0xff]   ;;  %v5613_v58 = vld [vmem:[%s7217_s3 + $0x294] ss:$100 sps:$4 sm:$0xff]  }
 0x1bb   :  { %v5608_v59 = vld [vmem:[%s7217_s3 + $0x288] ss:$100 sps:$4 sm:$0xff]  }
 0x1bd   :  { %3729 = vmatpush1.bf16.msra.mxu1 %v5518_v60  ;;  %3772 = vmatpush1.bf16.msra.mxu0 %v5521_v61  ;;  %v5611_v60 = vld [vmem:[%s7217_s3 + $0x290] ss:$100 sps:$4 sm:$0xff]  }
 0x1be   :  { %3730 = vmatprep.subr.bf16.mxu1 %v5526_v62  ;;  %3773 = vmatprep.subr.bf16.mxu0 %v5529_v63  ;;  %v5616_v61 = vld [vmem:[%s7217_s3 + $0x354] ss:$100 sps:$4 sm:$0xff]   ;;  %v5619_v62 = vld [vmem:[%s7217_s3 + $0x35c] ss:$100 sps:$4 sm:$0xff]  }
 0x1bf   :  { %v5614_v63 = vld [vmem:[%s7217_s3 + $0x350] ss:$100 sps:$4 sm:$0xff]  }
 0x1c1   :  { %3731 = vmatpush1.bf16.msra.mxu1 %v5524_v0  ;;  %3774 = vmatpush1.bf16.msra.mxu0 %v5527_v1  ;;  %v5617_v0 = vld [vmem:[%s7217_s3 + $0x358] ss:$100 sps:$4 sm:$0xff]  }
 0x1c2   :  { %3732 = vmatprep.subr.bf16.mxu1 %v5532_v2  ;;  %3775 = vmatprep.subr.bf16.mxu0 %v5535_v3  ;;  %v5622_v1 = vld [vmem:[%s7217_s3 + $0x41c] ss:$100 sps:$4 sm:$0xff]   ;;  %v5625_v2 = vld [vmem:[%s7217_s3 + $0x424] ss:$100 sps:$4 sm:$0xff]  }
 0x1c3   :  { %v5620_v3 = vld [vmem:[%s7217_s3 + $0x418] ss:$100 sps:$4 sm:$0xff]  }
 0x1c5   :  { %3733 = vmatpush1.bf16.msra.mxu1 %v5530_v4  ;;  %3776 = vmatpush1.bf16.msra.mxu0 %v5533_v5  ;;  %v5623_v4 = vld [vmem:[%s7217_s3 + $0x420] ss:$100 sps:$4 sm:$0xff]  }
 0x1c6   :  { %3734 = vmatprep.subr.bf16.mxu1 %v5538_v6  ;;  %3777 = vmatprep.subr.bf16.mxu0 %v5541_v7  ;;  %v5628_v5 = vld [vmem:[%s7217_s3 + $0x4e4] ss:$100 sps:$4 sm:$0xff]   ;;  %v5631_v6 = vld [vmem:[%s7217_s3 + $0x4ec] ss:$100 sps:$4 sm:$0xff]  }
 0x1c7   :  { %v5626_v7 = vld [vmem:[%s7217_s3 + $0x4e0] ss:$100 sps:$4 sm:$0xff]  }
 0x1c9   :  { %3735 = vmatpush1.bf16.msra.mxu1 %v5536_v8  ;;  %3778 = vmatpush1.bf16.msra.mxu0 %v5539_v9  ;;  %v5629_v8 = vld [vmem:[%s7217_s3 + $0x4e8] ss:$100 sps:$4 sm:$0xff]  }
 0x1ca   :  { %3806 = vmatprep.subr.bf16.mxu1 %v5544_v10  ;;  %3849 = vmatprep.subr.bf16.mxu0 %v5547_v11  ;;  %v5634_v9 = vld [vmem:[%s7217_s3 + $0x5ac] ss:$100 sps:$4 sm:$0xff]   ;;  %v5637_v10 = vld [vmem:[%s7217_s3 + $0x5b4] ss:$100 sps:$4 sm:$0xff]  }
 0x1cb   :  { %v5632_v11 = vld [vmem:[%s7217_s3 + $0x5a8] ss:$100 sps:$4 sm:$0xff]  }
 0x1cc   :  { %3753 = vmatmul.mubr.bf16.vlgmr.msra.gmra.mrb[28].mxu1 %v6557_v45  ;;  %3796 = vmatmul.mubr.bf16.vlgmr.msra.gmra.mrb[32].mxu0 %v6557_v45 }
 0x1cd   :  { %3807 = vmatpush1.bf16.msra.mxu1 %v5542_v12  ;;  %3850 = vmatpush1.bf16.msra.mxu0 %v5545_v13  ;;  %v5635_v12 = vld [vmem:[%s7217_s3 + $0x5b0] ss:$100 sps:$4 sm:$0xff]   ;;  %v5640_v13 = vld [vmem:[%s7217_s3 + $0x44] ss:$100 sps:$4 sm:$0xff]  }
 0x1ce   :  { %3808 = vmatprep.subr.bf16.mxu1 %v5550_v14  ;;  %3851 = vmatprep.subr.bf16.mxu0 %v5553_v15  ;;  %v5643_v14 = vld [vmem:[%s7217_s3 + $0x4c] ss:$100 sps:$4 sm:$0xff]   ;;  %v5638_v15 = vld [vmem:[%s7217_s3 + $0x40] ss:$100 sps:$4 sm:$0xff]  }
 0x1cf   :  { %3838 = vmatprep.mubr.bf16.mxu1 %v5744_v34  ;;  %3881 = vmatprep.mubr.bf16.mxu0 %v5744_v34 }
 0x1d1   :  { %3809 = vmatpush1.bf16.msra.mxu1 %v5548_v16  ;;  %3852 = vmatpush1.bf16.msra.mxu0 %v5551_v17  ;;  %v5641_v16 = vld [vmem:[%s7217_s3 + $0x48] ss:$100 sps:$4 sm:$0xff]  }
 0x1d2   :  { %3810 = vmatprep.subr.bf16.mxu1 %v5556_v18  ;;  %3853 = vmatprep.subr.bf16.mxu0 %v5559_v19  ;;  %v5646_v17 = vld [vmem:[%s7217_s3 + $0x10c] ss:$100 sps:$4 sm:$0xff]   ;;  %v5649_v18 = vld [vmem:[%s7217_s3 + $0x114] ss:$100 sps:$4 sm:$0xff]  }
 0x1d3   :  { %v5644_v19 = vld [vmem:[%s7217_s3 + $0x108] ss:$100 sps:$4 sm:$0xff]  }
 0x1d5   :  { %3811 = vmatpush1.bf16.msra.mxu1 %v5554_v20  ;;  %3854 = vmatpush1.bf16.msra.mxu0 %v5557_v21  ;;  %v5647_v20 = vld [vmem:[%s7217_s3 + $0x110] ss:$100 sps:$4 sm:$0xff]  }
 0x1d6   :  { %3812 = vmatprep.subr.bf16.mxu1 %v5562_v23  ;;  %3855 = vmatprep.subr.bf16.mxu0 %v5565_v24  ;;  %v5652_v21 = vld [vmem:[%s7217_s3 + $0x1d4] ss:$100 sps:$4 sm:$0xff]   ;;  %v5655_v23 = vld [vmem:[%s7217_s3 + $0x1dc] ss:$100 sps:$4 sm:$0xff]  }
 0x1d7   :  { %v5650_v24 = vld [vmem:[%s7217_s3 + $0x1d0] ss:$100 sps:$4 sm:$0xff]  }
 0x1d9   :  { %3813 = vmatpush1.bf16.msra.mxu1 %v5560_v25  ;;  %3856 = vmatpush1.bf16.msra.mxu0 %v5563_v26  ;;  %v5653_v25 = vld [vmem:[%s7217_s3 + $0x1d8] ss:$100 sps:$4 sm:$0xff]  }
 0x1da   :  { %3814 = vmatprep.subr.bf16.mxu1 %v5568_v27  ;;  %3857 = vmatprep.subr.bf16.mxu0 %v5571_v28  ;;  %v5658_v26 = vld [vmem:[%s7217_s3 + $0x29c] ss:$100 sps:$4 sm:$0xff]   ;;  %v5661_v27 = vld [vmem:[%s7217_s3 + $0x2a4] ss:$100 sps:$4 sm:$0xff]  }
 0x1db   :  { %v5656_v28 = vld [vmem:[%s7217_s3 + $0x298] ss:$100 sps:$4 sm:$0xff]  }
 0x1dd   :  { %3815 = vmatpush1.bf16.msra.mxu1 %v5566_v29  ;;  %3858 = vmatpush1.bf16.msra.mxu0 %v5569_v30  ;;  %v5659_v29 = vld [vmem:[%s7217_s3 + $0x2a0] ss:$100 sps:$4 sm:$0xff]  }
 0x1de   :  { %3816 = vmatprep.subr.bf16.mxu1 %v5574_v31  ;;  %3859 = vmatprep.subr.bf16.mxu0 %v5577_v32  ;;  %v5664_v30 = vld [vmem:[%s7217_s3 + $0x364] ss:$100 sps:$4 sm:$0xff]   ;;  %v5667_v31 = vld [vmem:[%s7217_s3 + $0x36c] ss:$100 sps:$4 sm:$0xff]  }
 0x1df   :  { %v5662_v32 = vld [vmem:[%s7217_s3 + $0x360] ss:$100 sps:$4 sm:$0xff]  }
 0x1e1   :  { %3817 = vmatpush1.bf16.msra.mxu1 %v5572_v33  ;;  %3860 = vmatpush1.bf16.msra.mxu0 %v5575_v35  ;;  %v5665_v33 = vld [vmem:[%s7217_s3 + $0x368] ss:$100 sps:$4 sm:$0xff]  }
 0x1e2   :  { %3818 = vmatprep.subr.bf16.mxu1 %v5580_v36  ;;  %3861 = vmatprep.subr.bf16.mxu0 %v5583_v37  ;;  %v5670_v35 = vld [vmem:[%s7217_s3 + $0x42c] ss:$100 sps:$4 sm:$0xff]   ;;  %v5673_v36 = vld [vmem:[%s7217_s3 + $0x434] ss:$100 sps:$4 sm:$0xff]  }
 0x1e3   :  { %v5668_v37 = vld [vmem:[%s7217_s3 + $0x428] ss:$100 sps:$4 sm:$0xff]  }
 0x1e5   :  { %3819 = vmatpush1.bf16.msra.mxu1 %v5578_v38  ;;  %3862 = vmatpush1.bf16.msra.mxu0 %v5581_v39  ;;  %v5671_v38 = vld [vmem:[%s7217_s3 + $0x430] ss:$100 sps:$4 sm:$0xff]  }
 0x1e6   :  { %3820 = vmatprep.subr.bf16.mxu1 %v5586_v40  ;;  %3863 = vmatprep.subr.bf16.mxu0 %v5589_v41  ;;  %v5676_v39 = vld [vmem:[%s7217_s3 + $0x4f4] ss:$100 sps:$4 sm:$0xff]   ;;  %v5679_v40 = vld [vmem:[%s7217_s3 + $0x4fc] ss:$100 sps:$4 sm:$0xff]  }
 0x1e7   :  { %v5674_v41 = vld [vmem:[%s7217_s3 + $0x4f0] ss:$100 sps:$4 sm:$0xff]  }
 0x1e9   :  { %3821 = vmatpush1.bf16.msra.mxu1 %v5584_v42  ;;  %3864 = vmatpush1.bf16.msra.mxu0 %v5587_v43  ;;  %v5677_v42 = vld [vmem:[%s7217_s3 + $0x4f8] ss:$100 sps:$4 sm:$0xff]  }
 0x1ea   :  { %3892 = vmatprep.subr.bf16.mxu1 %v5592_v44  ;;  %3935 = vmatprep.subr.bf16.mxu0 %v5595_v46  ;;  %v5682_v43 = vld [vmem:[%s7217_s3 + $0x5bc] ss:$100 sps:$4 sm:$0xff]   ;;  %v5685_v44 = vld [vmem:[%s7217_s3 + $0x5c4] ss:$100 sps:$4 sm:$0xff]  }
 0x1eb   :  { %v5680_v46 = vld [vmem:[%s7217_s3 + $0x5b8] ss:$100 sps:$4 sm:$0xff]  }
 0x1ec   :  { %3839 = vmatmul.mubr.bf16.vlgmr.msra.gmra.mrb[32].mxu1 %v6557_v45  ;;  %3882 = vmatmul.mubr.bf16.vlgmr.msra.gmra.mrb[36].mxu0 %v6557_v45 }
 0x1ed   :  { %3893 = vmatpush1.bf16.msra.mxu1 %v5590_v47  ;;  %3936 = vmatpush1.bf16.msra.mxu0 %v5593_v48  ;;  %v5683_v47 = vld [vmem:[%s7217_s3 + $0x5c0] ss:$100 sps:$4 sm:$0xff]   ;;  %v5688_v48 = vld [vmem:[%s7217_s3 + $0x54] ss:$100 sps:$4 sm:$0xff]  }
 0x1ee   :  { %3894 = vmatprep.subr.bf16.mxu1 %v5598_v49  ;;  %3937 = vmatprep.subr.bf16.mxu0 %v5601_v50  ;;  %v5691_v49 = vld [vmem:[%s7217_s3 + $0x5c] ss:$100 sps:$4 sm:$0xff]   ;;  %v5686_v50 = vld [vmem:[%s7217_s3 + $0x50] ss:$100 sps:$4 sm:$0xff]  }
 0x1ef   :  { %3924 = vmatprep.mubr.bf16.mxu1 %v5744_v34  ;;  %3967 = vmatprep.mubr.bf16.mxu0 %v5744_v34 }
 0x1f1   :  { %3895 = vmatpush1.bf16.msra.mxu1 %v5596_v51  ;;  %3938 = vmatpush1.bf16.msra.mxu0 %v5599_v52  ;;  %v5689_v51 = vld [vmem:[%s7217_s3 + $0x58] ss:$100 sps:$4 sm:$0xff]  }
 0x1f2   :  { %3896 = vmatprep.subr.bf16.mxu1 %v5604_v53  ;;  %3939 = vmatprep.subr.bf16.mxu0 %v5607_v54  ;;  %v5694_v52 = vld [vmem:[%s7217_s3 + $0x11c] ss:$100 sps:$4 sm:$0xff]   ;;  %v5697_v53 = vld [vmem:[%s7217_s3 + $0x124] ss:$100 sps:$4 sm:$0xff]  }
 0x1f3   :  { %v5692_v54 = vld [vmem:[%s7217_s3 + $0x118] ss:$100 sps:$4 sm:$0xff]  }
 0x1f5   :  { %3897 = vmatpush1.bf16.msra.mxu1 %v5602_v55  ;;  %3940 = vmatpush1.bf16.msra.mxu0 %v5605_v56  ;;  %v5695_v55 = vld [vmem:[%s7217_s3 + $0x120] ss:$100 sps:$4 sm:$0xff]  }
 0x1f6   :  { %3898 = vmatprep.subr.bf16.mxu1 %v5610_v57  ;;  %3941 = vmatprep.subr.bf16.mxu0 %v5613_v58  ;;  %v5700_v56 = vld [vmem:[%s7217_s3 + $0x1e4] ss:$100 sps:$4 sm:$0xff]   ;;  %v5703_v57 = vld [vmem:[%s7217_s3 + $0x1ec] ss:$100 sps:$4 sm:$0xff]  }
 0x1f7   :  { %v5698_v58 = vld [vmem:[%s7217_s3 + $0x1e0] ss:$100 sps:$4 sm:$0xff]  }
 0x1f9   :  { %3899 = vmatpush1.bf16.msra.mxu1 %v5608_v59  ;;  %3942 = vmatpush1.bf16.msra.mxu0 %v5611_v60  ;;  %v5701_v59 = vld [vmem:[%s7217_s3 + $0x1e8] ss:$100 sps:$4 sm:$0xff]  }
 0x1fa   :  { %3900 = vmatprep.subr.bf16.mxu1 %v5616_v61  ;;  %3943 = vmatprep.subr.bf16.mxu0 %v5619_v62  ;;  %v5706_v60 = vld [vmem:[%s7217_s3 + $0x2ac] ss:$100 sps:$4 sm:$0xff]  }
 0x1fb   :  { %v5704_v61 = vld [vmem:[%s7217_s3 + $0x2a8] ss:$100 sps:$4 sm:$0xff]   ;;  %v5707_v62 = vld [vmem:[%s7217_s3 + $0x2b0] ss:$100 sps:$4 sm:$0xff]  }
 0x1fd   :  { %3901 = vmatpush1.bf16.msra.mxu1 %v5614_v63  ;;  %3944 = vmatpush1.bf16.msra.mxu0 %v5617_v0  ;;  %v5712_v63 = vld [vmem:[%s7217_s3 + $0x374] ss:$100 sps:$4 sm:$0xff]   ;;  %v5715_v0 = vld [vmem:[%s7217_s3 + $0x37c] ss:$100 sps:$4 sm:$0xff]  }
 0x1fe   :  { %3902 = vmatprep.subr.bf16.mxu1 %v5622_v1  ;;  %3945 = vmatprep.subr.bf16.mxu0 %v5625_v2  ;;  %v5710_v1 = vld [vmem:[%s7217_s3 + $0x370] ss:$100 sps:$4 sm:$0xff]   ;;  %v5713_v2 = vld [vmem:[%s7217_s3 + $0x378] ss:$100 sps:$4 sm:$0xff]  }
 0x201   :  { %3903 = vmatpush1.bf16.msra.mxu1 %v5620_v3  ;;  %3946 = vmatpush1.bf16.msra.mxu0 %v5623_v4  ;;  %v5718_v3 = vld [vmem:[%s7217_s3 + $0x43c] ss:$100 sps:$4 sm:$0xff]   ;;  %v5721_v4 = vld [vmem:[%s7217_s3 + $0x444] ss:$100 sps:$4 sm:$0xff]  }
 0x202   :  { %3904 = vmatprep.subr.bf16.mxu1 %v5628_v5  ;;  %3947 = vmatprep.subr.bf16.mxu0 %v5631_v6  ;;  %v5716_v5 = vld [vmem:[%s7217_s3 + $0x438] ss:$100 sps:$4 sm:$0xff]   ;;  %v5719_v6 = vld [vmem:[%s7217_s3 + $0x440] ss:$100 sps:$4 sm:$0xff]  }
 0x205   :  { %3905 = vmatpush1.bf16.msra.mxu1 %v5626_v7  ;;  %3948 = vmatpush1.bf16.msra.mxu0 %v5629_v8  ;;  %v5724_v7 = vld [vmem:[%s7217_s3 + $0x504] ss:$100 sps:$4 sm:$0xff]   ;;  %v5727_v8 = vld [vmem:[%s7217_s3 + $0x50c] ss:$100 sps:$4 sm:$0xff]  }
 0x206   :  { %3906 = vmatprep.subr.bf16.mxu1 %v5634_v9  ;;  %3949 = vmatprep.subr.bf16.mxu0 %v5637_v10  ;;  %v5722_v9 = vld [vmem:[%s7217_s3 + $0x500] ss:$100 sps:$4 sm:$0xff]   ;;  %v5725_v10 = vld [vmem:[%s7217_s3 + $0x508] ss:$100 sps:$4 sm:$0xff]  }
 0x209   :  { %3907 = vmatpush1.bf16.msra.mxu1 %v5632_v11  ;;  %3950 = vmatpush1.bf16.msra.mxu0 %v5635_v12  ;;  %v5730_v11 = vld [vmem:[%s7217_s3 + $0x5cc] ss:$100 sps:$4 sm:$0xff]   ;;  %v5733_v12 = vld [vmem:[%s7217_s3 + $0x5d4] ss:$100 sps:$4 sm:$0xff]  }
 0x20a   :  { %3978 = vmatprep.subr.bf16.mxu1 %v5640_v13  ;;  %4021 = vmatprep.subr.bf16.mxu0 %v5643_v14  ;;  %v5728_v13 = vld [vmem:[%s7217_s3 + $0x5c8] ss:$100 sps:$4 sm:$0xff]   ;;  %v5731_v14 = vld [vmem:[%s7217_s3 + $0x5d0] ss:$100 sps:$4 sm:$0xff]  }
 0x20c   :  { %3925 = vmatmul.mubr.bf16.vlgmr.msra.gmra.mrb[36].mxu1 %v6557_v45  ;;  %3968 = vmatmul.mubr.bf16.vlgmr.msra.gmra.mrb[40].mxu0 %v6557_v45 }
 0x20d   :  { %3979 = vmatpush1.bf16.msra.mxu1 %v5638_v15  ;;  %4022 = vmatpush1.bf16.msra.mxu0 %v5641_v16  ;;  %v5734_v15 = vld [vmem:[%s7217_s3 + $0x60] ss:$100 sps:$4 sm:$0xff]   ;;  %v5735_v16 = vld [vmem:[%s7217_s3 + $0x128] ss:$100 sps:$4 sm:$0xff]  }
 0x20e   :  { %3980 = vmatprep.subr.bf16.mxu1 %v5646_v17  ;;  %4023 = vmatprep.subr.bf16.mxu0 %v5649_v18  ;;  %v5736_v17 = vld [vmem:[%s7217_s3 + $0x1f0] ss:$100 sps:$4 sm:$0xff]   ;;  %v5737_v18 = vld [vmem:[%s7217_s3 + $0x2b8] ss:$100 sps:$4 sm:$0xff]  }
 0x20f   :  { %4010 = vmatprep.mubr.bf16.mxu1 %v5744_v34  ;;  %4053 = vmatprep.mubr.bf16.mxu0 %v5744_v34 }
 0x211   :  { %3981 = vmatpush1.bf16.msra.mxu1 %v5644_v19  ;;  %4024 = vmatpush1.bf16.msra.mxu0 %v5647_v20  ;;  %v5738_v19 = vld [vmem:[%s7217_s3 + $0x380] ss:$100 sps:$4 sm:$0xff]   ;;  %v5739_v20 = vld [vmem:[%s7217_s3 + $0x448] ss:$100 sps:$4 sm:$0xff]  }
 0x212   :  { %3982 = vmatprep.subr.bf16.mxu1 %v5652_v21  ;;  %4025 = vmatprep.subr.bf16.mxu0 %v5655_v23  ;;  %v5740_v21 = vld [vmem:[%s7217_s3 + $0x510] ss:$100 sps:$4 sm:$0xff]   ;;  %v5741_v23 = vld [vmem:[%s7217_s3 + $0x5d8] ss:$100 sps:$4 sm:$0xff]  }
 0x215   :  { %3983 = vmatpush1.bf16.msra.mxu1 %v5650_v24  ;;  %4026 = vmatpush1.bf16.msra.mxu0 %v5653_v25  ;;  %v2501_v24 = vlaneseq }
 0x216   :  { %3984 = vmatprep.subr.bf16.mxu1 %v5658_v26  ;;  %4027 = vmatprep.subr.bf16.mxu0 %v5661_v27 }
 0x217   :  { %v2502_v25 = vshrl.u32 %v2501_v24, 7 }
 0x219   :  { %3985 = vmatpush1.bf16.msra.mxu1 %v5656_v28  ;;  %4028 = vmatpush1.bf16.msra.mxu0 %v5659_v29  ;;  %v7084_v26 = vsub.s32 0, %v2502_v25  ;;  %v7086_v27 = vsub.s32 2, %v2502_v25  ;;  %v2493_v28 = vld [vmem:[%s7218_s4] sm:$0xff]  ;;  %v7091_v29 = vsub.s32 1, %v2502_v25 }
 0x21a   :  { %3986 = vmatprep.subr.bf16.mxu1 %v5664_v30  ;;  %4029 = vmatprep.subr.bf16.mxu0 %v5667_v31  ;;  %v7093_v30 = vsub.s32 3, %v2502_v25 }
 0x21b   :  { %v2504_v31 = vrot.slane %v2493_v28, %v7084_v26 }
 0x21d   :  { %3987 = vmatpush1.bf16.msra.mxu1 %v5662_v32  ;;  %4030 = vmatpush1.bf16.msra.mxu0 %v5665_v33  ;;  %v2516_v32 = vrot.slane %v2493_v28, %v7093_v30 }
 0x21e   :  { %3988 = vmatprep.subr.bf16.mxu1 %v5670_v35  ;;  %4031 = vmatprep.subr.bf16.mxu0 %v5673_v36 }
 0x221   :  { %3989 = vmatpush1.bf16.msra.mxu1 %v5668_v37  ;;  %4032 = vmatpush1.bf16.msra.mxu0 %v5671_v38 }
 0x222   :  { %3990 = vmatprep.subr.bf16.mxu1 %v5676_v39  ;;  %4033 = vmatprep.subr.bf16.mxu0 %v5679_v40 }
 0x225   :  { %3991 = vmatpush1.bf16.msra.mxu1 %v5674_v41  ;;  %4034 = vmatpush1.bf16.msra.mxu0 %v5677_v42 }
 0x226   :  { %3992 = vmatprep.subr.bf16.mxu1 %v5682_v43  ;;  %4035 = vmatprep.subr.bf16.mxu0 %v5685_v44 }
 0x229   :  { %3993 = vmatpush1.bf16.msra.mxu1 %v5680_v46  ;;  %4036 = vmatpush1.bf16.msra.mxu0 %v5683_v47 }
 0x22a   :  { %4064 = vmatprep.subr.bf16.mxu1 %v5688_v48  ;;  %4107 = vmatprep.subr.bf16.mxu0 %v5691_v49 }
 0x22c   :  { %4011 = vmatmul.mubr.bf16.vlgmr.msra.gmra.mrb[40].mxu1 %v6557_v45  ;;  %4054 = vmatmul.mubr.bf16.vlgmr.msra.gmra.mrb[44].mxu0 %v6557_v45 }
 0x22d   :  { %4065 = vmatpush1.bf16.msra.mxu1 %v5686_v50  ;;  %4108 = vmatpush1.bf16.msra.mxu0 %v5689_v51 }
 0x22e   :  { %4066 = vmatprep.subr.bf16.mxu1 %v5694_v52  ;;  %4109 = vmatprep.subr.bf16.mxu0 %v5697_v53 }
 0x22f   :  { %4096 = vmatprep.mubr.bf16.mxu1 %v5744_v34  ;;  %4139 = vmatprep.mubr.bf16.mxu0 %v5744_v34  ;;  %v5709_v34 = vld [vmem:[%s7217_s3 + $0x2b4] ss:$100 sps:$4 sm:$0xff]  }
 0x231   :  { %4067 = vmatpush1.bf16.msra.mxu1 %v5692_v54  ;;  %4110 = vmatpush1.bf16.msra.mxu0 %v5695_v55 }
 0x232   :  { %4068 = vmatprep.subr.bf16.mxu1 %v5700_v56  ;;  %4111 = vmatprep.subr.bf16.mxu0 %v5703_v57 }
 0x235   :  { %4069 = vmatpush1.bf16.msra.mxu1 %v5698_v58  ;;  %4112 = vmatpush1.bf16.msra.mxu0 %v5701_v59 }
 0x236   :  { %4070 = vmatprep.subr.bf16.mxu1 %v5706_v60  ;;  %4113 = vmatprep.subr.bf16.mxu0 %v5709_v34 }
 0x239   :  { %4071 = vmatpush1.bf16.msra.mxu1 %v5704_v61  ;;  %4114 = vmatpush1.bf16.msra.mxu0 %v5707_v62  ;;  %v7111_v62 = vsub.s32 4, %v2502_v25 }
 0x23a   :  { %4072 = vmatprep.subr.bf16.mxu1 %v5712_v63  ;;  %4115 = vmatprep.subr.bf16.mxu0 %v5715_v0  ;;  %v7113_v63 = vsub.s32 6, %v2502_v25  ;;  %v7115_v0 = vsub.s32 5, %v2502_v25 }
 0x23d   :  { %4073 = vmatpush1.bf16.msra.mxu1 %v5710_v1  ;;  %4116 = vmatpush1.bf16.msra.mxu0 %v5713_v2  ;;  %v7117_v1 = vsub.s32 7, %v2502_v25  ;;  %v2520_v2 = vrot.slane %v2493_v28, %v7111_v62 }
 0x23e   :  { %4074 = vmatprep.subr.bf16.mxu1 %v5718_v3  ;;  %4117 = vmatprep.subr.bf16.mxu0 %v5721_v4  ;;  %v2528_v3 = vrot.slane %v2493_v28, %v7113_v63  ;;  %v2524_v4 = vrot.slane %v2493_v28, %v7115_v0 }
 0x241   :  { %4075 = vmatpush1.bf16.msra.mxu1 %v5716_v5  ;;  %4118 = vmatpush1.bf16.msra.mxu0 %v5719_v6  ;;  %v2532_v5 = vrot.slane %v2493_v28, %v7117_v1 }
 0x242   :  { %4076 = vmatprep.subr.bf16.mxu1 %v5724_v7  ;;  %4119 = vmatprep.subr.bf16.mxu0 %v5727_v8 }
 0x245   :  { %4077 = vmatpush1.bf16.msra.mxu1 %v5722_v9  ;;  %4120 = vmatpush1.bf16.msra.mxu0 %v5725_v10 }
 0x246   :  { %4078 = vmatprep.subr.bf16.mxu1 %v5730_v11  ;;  %4121 = vmatprep.subr.bf16.mxu0 %v5733_v12 }
 0x249   :  { %4079 = vmatpush1.bf16.msra.mxu1 %v5728_v13  ;;  %4122 = vmatpush1.bf16.msra.mxu0 %v5731_v14 }
 0x24a   :  { %5190 = vmatprep.subr.bf16.mxu1 %v5742_v22 }
 0x24c   :  { %4097 = vmatmul.mubr.bf16.vlgmr.msra.gmra.mrb[44].mxu1 %v6557_v45  ;;  %4140 = vmatmul.mubr.bf16.vlgmr.msra.gmra.mrb[48].mxu0 %v6557_v45 }
 0x24d   :  { %5191 = vmatpush3.bf16.msra.mxu1 %v5734_v15  ;;  %5206 = vmatprep.mubr.msk.bf16.mxu1 %vm5743_vm0, %v5742_v22 }
 0x24e   :  { %5192 = vmatprep.subr.bf16.mxu1 %v5742_v22 }
 0x251   :  { %5193 = vmatpush3.bf16.msra.mxu1 %v5735_v16 }
 0x252   :  { %5194 = vmatprep.subr.bf16.mxu1 %v5742_v22 }
 0x255   :  { %5195 = vmatpush3.bf16.msra.mxu1 %v5736_v17 }
 0x256   :  { %5196 = vmatprep.subr.bf16.mxu1 %v5742_v22 }
 0x259   :  { %5197 = vmatpush3.bf16.msra.mxu1 %v5737_v18 }
 0x25a   :  { %5198 = vmatprep.subr.bf16.mxu1 %v5742_v22 }
 0x25d   :  { %5199 = vmatpush3.bf16.msra.mxu1 %v5738_v19 }
 0x25e   :  { %5200 = vmatprep.subr.bf16.mxu1 %v5742_v22 }
 0x261   :  { %5201 = vmatpush3.bf16.msra.mxu1 %v5739_v20 }
 0x262   :  { %5202 = vmatprep.subr.bf16.mxu1 %v5742_v22 }
 0x265   :  { %5203 = vmatpush3.bf16.msra.mxu1 %v5740_v21 }
 0x266   :  { %5204 = vmatprep.subr.bf16.mxu1 %v5742_v22  ;;  %v2512_v22 = vrot.slane %v2493_v28, %v7086_v27 }
 0x269   :  { %5205 = vmatpush3.bf16.msra.mxu1 %v5741_v23 }
 0x26c   :  { %5207 = vmatmul.mubr.bf16.vlgmr.msra.gmra.mrb[48].mxu1 %v6557_v45  ;;  %v2508_v45 = vrot.slane %v2493_v28, %v7091_v29 }
 0x27f   :  { %v3668_v33 = vpop.f32.mrb[24].mxu1  ;;  %v3711_v35 = vpop.f32.mrb[28].mxu0 }
 0x280   :  { %v3669_v36 = vadd.f32 %v3668_v33, %v2504_v31  ;;  %v3712_v37 = vadd.f32 %v3711_v35, %v2512_v22  ;;  %v3670_v38 = vpop.f32.mrb[25].mxu1  ;;  %v3713_v39 = vpop.f32.mrb[29].mxu0 }
 0x281   :  { %v3671_v40 = vadd.f32 %v3670_v38, %v2508_v45  ;;  %v3714_v41 = vadd.f32 %v3713_v39, %v2516_v32  ;;  %v3672_v42 = vpop.f32.mrb[26].mxu1  ;;  %v3715_v43 = vpop.f32.mrb[30].mxu0  ;;  %v2494_v38 = vld [vmem:[%s7218_s4 + $0x8] sm:$0xff] }
 0x282   :  { %v4191_v44 = vmax.f32 %v3669_v36, 0.0  ;;  %v4193_v46 = vmax.f32 %v3712_v37, 0.0  ;;  %v3673_v47 = vadd.f32 %v3672_v42, %v2504_v31  ;;  %v3716_v48 = vadd.f32 %v3715_v43, %v2512_v22  ;;  %v3674_v49 = vpop.f32.mrb[27].mxu1  ;;  %v3717_v50 = vpop.f32.mrb[31].mxu0 }
 0x283   :  { %v4192_v51 = vmax.f32 %v3671_v40, 0.0  ;;  %v4194_v52 = vmax.f32 %v3714_v41, 0.0  ;;  %v3675_v53 = vadd.f32 %v3674_v49, %v2508_v45  ;;  %v3718_v54 = vadd.f32 %v3717_v50, %v2516_v32 }
 0x284   :  { %v4216_v55 = vmax.f32 %v3673_v47, 0.0  ;;  %v4218_v56 = vmax.f32 %v3716_v48, 0.0  ;;  %v2536_v39 = vrot.slane %v2494_v38, %v7084_v26  ;;  %v2544_v40 = vrot.slane %v2494_v38, %v7086_v27 }
 0x285   :  { %v4874_v57 = vpack.c.bf16 %v4192_v51, %v4191_v44  ;;  %v4875_v58 = vpack.c.bf16 %v4194_v52, %v4193_v46  ;;  %v4217_v59 = vmax.f32 %v3675_v53, 0.0  ;;  %v4219_v60 = vmax.f32 %v3718_v54, 0.0 }
 0x286   :  { %v2540_v41 = vrot.slane %v2494_v38, %v7091_v29  ;;  %v2548_v42 = vrot.slane %v2494_v38, %v7093_v30 }
 0x287   :  { %4393 = vst [vmem:[%s7219_s5] sm:$0xff] %v4874_v57  ;;  %4394 = vst [vmem:[%s7219_s5 + $0x8] sm:$0xff] %v4875_v58  ;;  %v4887_v34 = vpack.c.bf16 %v4217_v59, %v4216_v55  ;;  %v4888_v61 = vpack.c.bf16 %v4219_v60, %v4218_v56 }
 0x289   :  { %4407 = vst [vmem:[%s7219_s5 + $0x64] sm:$0xff] %v4887_v34  ;;  %4408 = vst [vmem:[%s7219_s5 + $0x6c] sm:$0xff] %v4888_v61 }
 0x29f   :  { %v3754_v6 = vpop.f32.mrb[28].mxu1  ;;  %v3797_v7 = vpop.f32.mrb[32].mxu0 }
 0x2a0   :  { %v3755_v8 = vadd.f32 %v3754_v6, %v2520_v2  ;;  %v3798_v9 = vadd.f32 %v3797_v7, %v2528_v3  ;;  %v3756_v10 = vpop.f32.mrb[29].mxu1  ;;  %v3799_v11 = vpop.f32.mrb[33].mxu0 }
 0x2a1   :  { %v3757_v12 = vadd.f32 %v3756_v10, %v2524_v4  ;;  %v3800_v13 = vadd.f32 %v3799_v11, %v2532_v5  ;;  %v3758_v14 = vpop.f32.mrb[30].mxu1  ;;  %v3801_v15 = vpop.f32.mrb[34].mxu0  ;;  %v2552_v11 = vrot.slane %v2494_v38, %v7111_v62 }
 0x2a2   :  { %v4195_v16 = vmax.f32 %v3755_v8, 0.0  ;;  %v4197_v17 = vmax.f32 %v3798_v9, 0.0  ;;  %v3759_v18 = vadd.f32 %v3758_v14, %v2520_v2  ;;  %v3802_v19 = vadd.f32 %v3801_v15, %v2528_v3  ;;  %v3760_v20 = vpop.f32.mrb[31].mxu1  ;;  %v3803_v21 = vpop.f32.mrb[35].mxu0 }
 0x2a3   :  { %v4196_v23 = vmax.f32 %v3757_v12, 0.0  ;;  %v4198_v24 = vmax.f32 %v3800_v13, 0.0  ;;  %v3761_v25 = vadd.f32 %v3760_v20, %v2524_v4  ;;  %v3804_v28 = vadd.f32 %v3803_v21, %v2532_v5 }
 0x2a4   :  { %v4220_v31 = vmax.f32 %v3759_v18, 0.0  ;;  %v4222_v22 = vmax.f32 %v3802_v19, 0.0  ;;  %v2560_v12 = vrot.slane %v2494_v38, %v7113_v63  ;;  %v2556_v13 = vrot.slane %v2494_v38, %v7115_v0 }
 0x2a5   :  { %v4876_v45 = vpack.c.bf16 %v4196_v23, %v4195_v16  ;;  %v4877_v32 = vpack.c.bf16 %v4198_v24, %v4197_v17  ;;  %v4221_v33 = vmax.f32 %v3761_v25, 0.0  ;;  %v4223_v35 = vmax.f32 %v3804_v28, 0.0 }
 0x2a6   :  { %v2564_v14 = vrot.slane %v2494_v38, %v7117_v1 }
 0x2a7   :  { %4395 = vst [vmem:[%s7219_s5 + $0x10] sm:$0xff] %v4876_v45  ;;  %4396 = vst [vmem:[%s7219_s5 + $0x18] sm:$0xff] %v4877_v32  ;;  %v4889_v36 = vpack.c.bf16 %v4221_v33, %v4220_v31  ;;  %v4890_v37 = vpack.c.bf16 %v4223_v35, %v4222_v22 }
 0x2a9   :  { %4409 = vst [vmem:[%s7219_s5 + $0x74] sm:$0xff] %v4889_v36  ;;  %4410 = vst [vmem:[%s7219_s5 + $0x7c] sm:$0xff] %v4890_v37 }
 0x2bf   :  { %v3840_v43 = vpop.f32.mrb[32].mxu1  ;;  %v3883_v44 = vpop.f32.mrb[36].mxu0 }
 0x2c0   :  { %v3841_v46 = vadd.f32 %v3840_v43, %v2536_v39  ;;  %v3884_v47 = vadd.f32 %v3883_v44, %v2544_v40  ;;  %v3842_v48 = vpop.f32.mrb[33].mxu1  ;;  %v3885_v49 = vpop.f32.mrb[37].mxu0 }
 0x2c1   :  { %v3843_v50 = vadd.f32 %v3842_v48, %v2540_v41  ;;  %v3886_v51 = vadd.f32 %v3885_v49, %v2548_v42  ;;  %v3844_v52 = vpop.f32.mrb[34].mxu1  ;;  %v3887_v53 = vpop.f32.mrb[38].mxu0  ;;  %v2495_v48 = vld [vmem:[%s7218_s4 + $0x10] sm:$0xff] }
 0x2c2   :  { %v4199_v54 = vmax.f32 %v3841_v46, 0.0  ;;  %v4201_v55 = vmax.f32 %v3884_v47, 0.0  ;;  %v3845_v56 = vadd.f32 %v3844_v52, %v2536_v39  ;;  %v3888_v57 = vadd.f32 %v3887_v53, %v2544_v40  ;;  %v3846_v58 = vpop.f32.mrb[35].mxu1  ;;  %v3889_v59 = vpop.f32.mrb[39].mxu0 }
 0x2c3   :  { %v4200_v60 = vmax.f32 %v3843_v50, 0.0  ;;  %v4202_v34 = vmax.f32 %v3886_v51, 0.0  ;;  %v3847_v61 = vadd.f32 %v3846_v58, %v2540_v41  ;;  %v3890_v2 = vadd.f32 %v3889_v59, %v2548_v42 }
 0x2c4   :  { %v4224_v3 = vmax.f32 %v3845_v56, 0.0  ;;  %v4226_v4 = vmax.f32 %v3888_v57, 0.0  ;;  %v2568_v49 = vrot.slane %v2495_v48, %v7084_v26  ;;  %v2576_v50 = vrot.slane %v2495_v48, %v7086_v27 }
 0x2c5   :  { %v4878_v5 = vpack.c.bf16 %v4200_v60, %v4199_v54  ;;  %v4879_v6 = vpack.c.bf16 %v4202_v34, %v4201_v55  ;;  %v4225_v7 = vmax.f32 %v3847_v61, 0.0  ;;  %v4227_v8 = vmax.f32 %v3890_v2, 0.0 }
 0x2c6   :  { %v2572_v51 = vrot.slane %v2495_v48, %v7091_v29  ;;  %v2580_v52 = vrot.slane %v2495_v48, %v7093_v30 }
 0x2c7   :  { %4397 = vst [vmem:[%s7219_s5 + $0x20] sm:$0xff] %v4878_v5  ;;  %4398 = vst [vmem:[%s7219_s5 + $0x28] sm:$0xff] %v4879_v6  ;;  %v4891_v9 = vpack.c.bf16 %v4225_v7, %v4224_v3  ;;  %v4892_v10 = vpack.c.bf16 %v4227_v8, %v4226_v4 }
 0x2c9   :  { %4411 = vst [vmem:[%s7219_s5 + $0x84] sm:$0xff] %v4891_v9  ;;  %4412 = vst [vmem:[%s7219_s5 + $0x8c] sm:$0xff] %v4892_v10 }
 0x2df   :  { %v3926_v15 = vpop.f32.mrb[36].mxu1  ;;  %v3969_v16 = vpop.f32.mrb[40].mxu0 }
 0x2e0   :  { %v3927_v17 = vadd.f32 %v3926_v15, %v2552_v11  ;;  %v3970_v18 = vadd.f32 %v3969_v16, %v2560_v12  ;;  %v3928_v19 = vpop.f32.mrb[37].mxu1  ;;  %v3971_v20 = vpop.f32.mrb[41].mxu0  ;;  %v2584_v16 = vrot.slane %v2495_v48, %v7111_v62 }
 0x2e1   :  { %v3929_v21 = vadd.f32 %v3928_v19, %v2556_v13  ;;  %v3972_v23 = vadd.f32 %v3971_v20, %v2564_v14  ;;  %v3930_v24 = vpop.f32.mrb[38].mxu1  ;;  %v3973_v25 = vpop.f32.mrb[42].mxu0  ;;  %v2596_v19 = vrot.slane %v2495_v48, %v7117_v1 }
 0x2e2   :  { %v4203_v28 = vmax.f32 %v3927_v17, 0.0  ;;  %v4205_v31 = vmax.f32 %v3970_v18, 0.0  ;;  %v3931_v22 = vadd.f32 %v3930_v24, %v2552_v11  ;;  %v3974_v45 = vadd.f32 %v3973_v25, %v2560_v12  ;;  %v3932_v32 = vpop.f32.mrb[39].mxu1  ;;  %v3975_v33 = vpop.f32.mrb[43].mxu0 }
 0x2e3   :  { %v4204_v35 = vmax.f32 %v3929_v21, 0.0  ;;  %v4206_v36 = vmax.f32 %v3972_v23, 0.0  ;;  %v3933_v37 = vadd.f32 %v3932_v32, %v2556_v13  ;;  %v3976_v38 = vadd.f32 %v3975_v33, %v2564_v14 }
 0x2e4   :  { %v4228_v39 = vmax.f32 %v3931_v22, 0.0  ;;  %v4230_v40 = vmax.f32 %v3974_v45, 0.0  ;;  %v2592_v17 = vrot.slane %v2495_v48, %v7113_v63  ;;  %v2588_v18 = vrot.slane %v2495_v48, %v7115_v0 }
 0x2e5   :  { %v4880_v41 = vpack.c.bf16 %v4204_v35, %v4203_v28  ;;  %v4881_v42 = vpack.c.bf16 %v4206_v36, %v4205_v31  ;;  %v4229_v43 = vmax.f32 %v3933_v37, 0.0  ;;  %v4231_v44 = vmax.f32 %v3976_v38, 0.0 }
 0x2e7   :  { %4399 = vst [vmem:[%s7219_s5 + $0x30] sm:$0xff] %v4880_v41  ;;  %4400 = vst [vmem:[%s7219_s5 + $0x38] sm:$0xff] %v4881_v42  ;;  %v4893_v46 = vpack.c.bf16 %v4229_v43, %v4228_v39  ;;  %v4894_v47 = vpack.c.bf16 %v4231_v44, %v4230_v40 }
 0x2e9   :  { %4413 = vst [vmem:[%s7219_s5 + $0x94] sm:$0xff] %v4893_v46  ;;  %4414 = vst [vmem:[%s7219_s5 + $0x9c] sm:$0xff] %v4894_v47 }
 0x2ff   :  { %v4012_v53 = vpop.f32.mrb[40].mxu1  ;;  %v4055_v54 = vpop.f32.mrb[44].mxu0 }
 0x300   :  { %v4013_v55 = vadd.f32 %v4012_v53, %v2568_v49  ;;  %v4056_v56 = vadd.f32 %v4055_v54, %v2576_v50  ;;  %v4014_v57 = vpop.f32.mrb[41].mxu1  ;;  %v4057_v58 = vpop.f32.mrb[45].mxu0 }
 0x301   :  { %v4015_v59 = vadd.f32 %v4014_v57, %v2572_v51  ;;  %v4058_v60 = vadd.f32 %v4057_v58, %v2580_v52  ;;  %v4016_v34 = vpop.f32.mrb[42].mxu1  ;;  %v4059_v61 = vpop.f32.mrb[46].mxu0 }
 0x302   :  { %v4207_v2 = vmax.f32 %v4013_v55, 0.0  ;;  %v4209_v3 = vmax.f32 %v4056_v56, 0.0  ;;  %v4017_v4 = vadd.f32 %v4016_v34, %v2568_v49  ;;  %v4060_v26 = vadd.f32 %v4059_v61, %v2576_v50  ;;  %v4018_v5 = vpop.f32.mrb[43].mxu1  ;;  %v4061_v27 = vpop.f32.mrb[47].mxu0  ;;  %v4647_v49 = vld [vmem:[%s7218_s4 + $0x18] ss:$0 sm:$0xff] }
 0x303   :  { %v4208_v6 = vmax.f32 %v4015_v59, 0.0  ;;  %v4210_v29 = vmax.f32 %v4058_v60, 0.0  ;;  %v4019_v7 = vadd.f32 %v4018_v5, %v2572_v51  ;;  %v4062_v30 = vadd.f32 %v4061_v27, %v2580_v52 }
 0x304   :  { %v4232_v8 = vmax.f32 %v4017_v4, 0.0  ;;  %v4234_v9 = vmax.f32 %v4060_v26, 0.0 }
 0x305   :  { %v4882_v10 = vpack.c.bf16 %v4208_v6, %v4207_v2  ;;  %v4883_v11 = vpack.c.bf16 %v4210_v29, %v4209_v3  ;;  %v4233_v12 = vmax.f32 %v4019_v7, 0.0  ;;  %v4235_v13 = vmax.f32 %v4062_v30, 0.0 }
 0x307   :  { %4401 = vst [vmem:[%s7219_s5 + $0x40] sm:$0xff] %v4882_v10  ;;  %4402 = vst [vmem:[%s7219_s5 + $0x48] sm:$0xff] %v4883_v11  ;;  %v4895_v14 = vpack.c.bf16 %v4233_v12, %v4232_v8  ;;  %v4896_v15 = vpack.c.bf16 %v4235_v13, %v4234_v9 }
 0x309   :  { %4415 = vst [vmem:[%s7219_s5 + $0xa4] sm:$0xff] %v4895_v14  ;;  %4416 = vst [vmem:[%s7219_s5 + $0xac] sm:$0xff] %v4896_v15 }
 0x31f   :  { %v4098_v20 = vpop.f32.mrb[44].mxu1  ;;  %v4141_v21 = vpop.f32.mrb[48].mxu0 }
 0x320   :  { %v4099_v23 = vadd.f32 %v4098_v20, %v2584_v16  ;;  %v4142_v24 = vadd.f32 %v4141_v21, %v2592_v17  ;;  %v4100_v25 = vpop.f32.mrb[45].mxu1  ;;  %v4143_v28 = vpop.f32.mrb[49].mxu0 }
 0x321   :  { %v4101_v31 = vadd.f32 %v4100_v25, %v2588_v18  ;;  %v4144_v22 = vadd.f32 %v4143_v28, %v2596_v19  ;;  %v4102_v45 = vpop.f32.mrb[46].mxu1  ;;  %v4145_v32 = vpop.f32.mrb[50].mxu0 }
 0x322   :  { %v4211_v33 = vmax.f32 %v4099_v23, 0.0  ;;  %v4213_v35 = vmax.f32 %v4142_v24, 0.0  ;;  %v4103_v36 = vadd.f32 %v4102_v45, %v2584_v16  ;;  %v4146_v62 = vadd.f32 %v4145_v32, %v2592_v17  ;;  %v4104_v37 = vpop.f32.mrb[47].mxu1  ;;  %v4147_v63 = vpop.f32.mrb[51].mxu0 }
 0x323   :  { %v4212_v38 = vmax.f32 %v4101_v31, 0.0  ;;  %v4214_v0 = vmax.f32 %v4144_v22, 0.0  ;;  %v4105_v39 = vadd.f32 %v4104_v37, %v2588_v18  ;;  %v4148_v1 = vadd.f32 %v4147_v63, %v2596_v19 }
 0x324   :  { %v4236_v40 = vmax.f32 %v4103_v36, 0.0  ;;  %v4238_v41 = vmax.f32 %v4146_v62, 0.0 }
 0x325   :  { %v4884_v42 = vpack.c.bf16 %v4212_v38, %v4211_v33  ;;  %v4885_v43 = vpack.c.bf16 %v4214_v0, %v4213_v35  ;;  %v4237_v44 = vmax.f32 %v4105_v39, 0.0  ;;  %v4239_v46 = vmax.f32 %v4148_v1, 0.0 }
 0x327   :  { %4403 = vst [vmem:[%s7219_s5 + $0x50] sm:$0xff] %v4884_v42  ;;  %4404 = vst [vmem:[%s7219_s5 + $0x58] sm:$0xff] %v4885_v43  ;;  %v4897_v47 = vpack.c.bf16 %v4237_v44, %v4236_v40  ;;  %v4898_v48 = vpack.c.bf16 %v4239_v46, %v4238_v41 }
 0x329   :  { %4417 = vst [vmem:[%s7219_s5 + $0xb4] sm:$0xff] %v4897_v47  ;;  %4418 = vst [vmem:[%s7219_s5 + $0xbc] sm:$0xff] %v4898_v48 }
 0x33f   :  { %v4184_v50 = vpop.f32.mrb[48].mxu1 }
 0x340   :  { %v4185_v51 = vadd.f32 %v4647_v49, %v4184_v50  ;;  %v5208_v52 = vpop.f32.mrb[49].mxu1 }
 0x341   :  { %v4187_v53 = vpop.f32.mrb[50].mxu1 }
 0x342   :  { %v4215_v54 = vmax.f32 %v4185_v51, 0.0  ;;  %v4188_v55 = vadd.f32 %v4647_v49, %v4187_v53  ;;  %v5209_v56 = vpop.f32.mrb[51].mxu1 }
 0x344   :  { %v4886_v57 = vpack.c.bf16 %v4215_v54, %v4215_v54  ;;  %v4240_v58 = vmax.f32 %v4188_v55, 0.0 }
 0x346   :  { %4406 = vst.msk [vmem:[%s7219_s5 + $0x60] sm:$0xf] %vm4405_vm2, %v4886_v57  ;;  %v4899_v59 = vpack.c.bf16 %v4240_v58, %v4240_v58 }
 0x348   :  { %4419 = vst.msk [vmem:[%s7219_s5 + $0xc4] sm:$0xf] %vm4405_vm2, %v4899_v59 }

// kernel: cnn_autoencoder_forward.9
= control target key start
LH: loop header
LB: loop body
LE: loop exit
PB: predicated region body
PF: predicated region fallthrough
CT: control target
= control target key end

     0   :  { %v1258_v0 = vmov 0.0   ;;  %vm1259_vm0 = vmmov 0   ;;  %vm769_vm1 = vcmask 27648   ;;  %s1700_s1 = inlined_call_operand.vmem [shape: bf16[128,4], index: 1, kind: input, shape index: {}]   ;;  %s1701_s0 = inlined_call_operand.vmem [shape: bf16[400,128], index: 0, kind: input, shape index: {}]   ;;  %s1702_s2 = inlined_call_operand.vmem [shape: f32[1,4], index: 2, kind: input, shape index: {}]   ;;  %s1703_s3 = inlined_call_operand.vmem [shape: bf16[400,4], index: 3, kind: output, shape index: {}]  }
   0x1   :  { %991 = vmatprep.subr.bf16.mxu0 %v1258_v0  ;;  %v1125_v1 = vld [vmem:[%s1700_s1] sm:$0xff]   ;;  %1107 = vmatprep.subr.bf16.mxu1 %v1258_v0  ;;  %v1126_v2 = vld [vmem:[%s1700_s1 + $0x8] sm:$0xff]   ;;  %v1127_v3 = vld [vmem:[%s1700_s1 + $0x10] sm:$0xff]  }
   0x2   :  { %1007 = vmatprep.mubr.msk.bf16.mxu0 %vm1259_vm0, %v1258_v0  ;;  %1059 = vmatprep.mubr.msk.bf16.mxu1 %vm1259_vm0, %v1258_v0  ;;  %v1128_v4 = vld [vmem:[%s1700_s1 + $0x18] sm:$0xff]   ;;  %v1129_v5 = vld [vmem:[%s1700_s1 + $0x20] sm:$0xff]   ;;  %v1130_v6 = vld [vmem:[%s1700_s1 + $0x28] sm:$0xff]  }
   0x3   :  { %992 = vmatpush3.bf16.msra.mxu0 %v1125_v1  ;;  %1115 = vmatpush3.bf16.msra.mxu1 %v1125_v1  ;;  %v1131_v7 = vld [vmem:[%s1700_s1 + $0x30] sm:$0xff]   ;;  %v1132_v8 = vld [vmem:[%s1700_s1 + $0x38] sm:$0xff]   ;;  %v1133_v9 = vld [vmem:[%s1701_s0] sm:$0xff]  }
   0x4   :  { %993 = vmatprep.subr.bf16.mxu0 %v1258_v0  ;;  %1108 = vmatprep.subr.bf16.mxu1 %v1258_v0  ;;  %v1134_v10 = vld [vmem:[%s1701_s0 + $0x68] sm:$0xff]   ;;  %v1136_v12 = vld [vmem:[%s1701_s0 + $0x70] sm:$0xff]   ;;  %v1138_v14 = vld [vmem:[%s1701_s0 + $0x78] sm:$0xff]  }
   0x5   :  { %v1135_v11 = vld [vmem:[%s1701_s0 + $0x8] sm:$0xff]   ;;  %v1137_v13 = vld [vmem:[%s1701_s0 + $0x10] sm:$0xff]   ;;  %v1139_v15 = vld [vmem:[%s1701_s0 + $0x18] sm:$0xff]  }
   0x6   :  { %v1140_v16 = vld [vmem:[%s1701_s0 + $0x80] sm:$0xff]   ;;  %v1142_v18 = vld [vmem:[%s1701_s0 + $0x88] sm:$0xff]   ;;  %v1144_v20 = vld [vmem:[%s1701_s0 + $0x90] sm:$0xff]  }
   0x7   :  { %994 = vmatpush3.bf16.msra.mxu0 %v1126_v2  ;;  %1116 = vmatpush3.bf16.msra.mxu1 %v1126_v2  ;;  %v1141_v17 = vld [vmem:[%s1701_s0 + $0x20] sm:$0xff]   ;;  %v1143_v19 = vld [vmem:[%s1701_s0 + $0x28] sm:$0xff]   ;;  %v1145_v21 = vld [vmem:[%s1701_s0 + $0x30] sm:$0xff]  }
   0x8   :  { %995 = vmatprep.subr.bf16.mxu0 %v1258_v0  ;;  %1109 = vmatprep.subr.bf16.mxu1 %v1258_v0  ;;  %v1146_v22 = vld [vmem:[%s1701_s0 + $0x98] sm:$0xff]   ;;  %v1148_v24 = vld [vmem:[%s1701_s0 + $0xa0] sm:$0xff]   ;;  %v1150_v26 = vld [vmem:[%s1701_s0 + $0xa8] sm:$0xff]  }
   0x9   :  { %v1147_v23 = vld [vmem:[%s1701_s0 + $0x38] sm:$0xff]   ;;  %v1149_v25 = vld [vmem:[%s1701_s0 + $0x40] sm:$0xff]   ;;  %v1151_v27 = vld [vmem:[%s1701_s0 + $0x48] sm:$0xff]  }
   0xa   :  { %v1152_v28 = vld [vmem:[%s1701_s0 + $0xb0] sm:$0xff]   ;;  %v1154_v30 = vld [vmem:[%s1701_s0 + $0xb8] sm:$0xff]   ;;  %v1156_v32 = vld [vmem:[%s1701_s0 + $0xc0] sm:$0xff]  }
   0xb   :  { %996 = vmatpush3.bf16.msra.mxu0 %v1127_v3  ;;  %1117 = vmatpush3.bf16.msra.mxu1 %v1127_v3  ;;  %v1153_v29 = vld [vmem:[%s1701_s0 + $0x50] sm:$0xff]   ;;  %v1155_v31 = vld [vmem:[%s1701_s0 + $0x58] sm:$0xff]   ;;  %v1157_v33 = vld [vmem:[%s1701_s0 + $0x60] sm:$0xff]  }
   0xc   :  { %997 = vmatprep.subr.bf16.mxu0 %v1258_v0  ;;  %1110 = vmatprep.subr.bf16.mxu1 %v1258_v0  ;;  %v1448_v34 = vld [vmem:[%s1702_s2] ss:$0 sm:$0xff] }
   0xf   :  { %998 = vmatpush3.bf16.msra.mxu0 %v1128_v4  ;;  %1118 = vmatpush3.bf16.msra.mxu1 %v1128_v4 }
  0x10   :  { %999 = vmatprep.subr.bf16.mxu0 %v1258_v0  ;;  %1111 = vmatprep.subr.bf16.mxu1 %v1258_v0 }
  0x13   :  { %1000 = vmatpush3.bf16.msra.mxu0 %v1129_v5  ;;  %1119 = vmatpush3.bf16.msra.mxu1 %v1129_v5 }
  0x14   :  { %1001 = vmatprep.subr.bf16.mxu0 %v1258_v0  ;;  %1112 = vmatprep.subr.bf16.mxu1 %v1258_v0 }
  0x17   :  { %1002 = vmatpush3.bf16.msra.mxu0 %v1130_v6  ;;  %1120 = vmatpush3.bf16.msra.mxu1 %v1130_v6 }
  0x18   :  { %1003 = vmatprep.subr.bf16.mxu0 %v1258_v0  ;;  %1113 = vmatprep.subr.bf16.mxu1 %v1258_v0 }
  0x1b   :  { %1004 = vmatpush3.bf16.msra.mxu0 %v1131_v7  ;;  %1121 = vmatpush3.bf16.msra.mxu1 %v1131_v7 }
  0x1c   :  { %1005 = vmatprep.subr.bf16.mxu0 %v1258_v0  ;;  %1114 = vmatprep.subr.bf16.mxu1 %v1258_v0 }
  0x1f   :  { %1006 = vmatpush3.bf16.msra.mxu0 %v1132_v8  ;;  %1122 = vmatpush3.bf16.msra.mxu1 %v1132_v8 }
  0x22   :  { %1008 = vmatmul.mubr.bf16.vlgmr.msra.gmra.mrb[0].mxu0 %v1133_v9  ;;  %1060 = vmatmul.mubr.bf16.vlgmr.msra.gmra.mrb[0].mxu1 %v1134_v10 }
  0x23   :  { %1011 = vmatprep.mubr.msk.bf16.mxu0 %vm1259_vm0, %v1258_v0  ;;  %1063 = vmatprep.mubr.msk.bf16.mxu1 %vm1259_vm0, %v1258_v0 }
  0x2a   :  { %1012 = vmatmul.mubr.bf16.gmra.mrb[4].mxu0 %v1135_v11  ;;  %1064 = vmatmul.mubr.bf16.gmra.mrb[4].mxu1 %v1136_v12 }
  0x2b   :  { %1015 = vmatprep.mubr.msk.bf16.mxu0 %vm1259_vm0, %v1258_v0  ;;  %1067 = vmatprep.mubr.msk.bf16.mxu1 %vm1259_vm0, %v1258_v0 }
  0x32   :  { %1016 = vmatmul.mubr.bf16.gmra.mrb[8].mxu0 %v1137_v13  ;;  %1068 = vmatmul.mubr.bf16.gmra.mrb[8].mxu1 %v1138_v14 }
  0x33   :  { %1019 = vmatprep.mubr.msk.bf16.mxu0 %vm1259_vm0, %v1258_v0  ;;  %1071 = vmatprep.mubr.msk.bf16.mxu1 %vm1259_vm0, %v1258_v0 }
  0x3a   :  { %1020 = vmatmul.mubr.bf16.gmra.mrb[12].mxu0 %v1139_v15  ;;  %1072 = vmatmul.mubr.bf16.gmra.mrb[12].mxu1 %v1140_v16 }
  0x3b   :  { %1023 = vmatprep.mubr.msk.bf16.mxu0 %vm1259_vm0, %v1258_v0  ;;  %1075 = vmatprep.mubr.msk.bf16.mxu1 %vm1259_vm0, %v1258_v0 }
  0x42   :  { %1024 = vmatmul.mubr.bf16.gmra.mrb[16].mxu0 %v1141_v17  ;;  %1076 = vmatmul.mubr.bf16.gmra.mrb[16].mxu1 %v1142_v18 }
  0x43   :  { %1027 = vmatprep.mubr.msk.bf16.mxu0 %vm1259_vm0, %v1258_v0  ;;  %1079 = vmatprep.mubr.msk.bf16.mxu1 %vm1259_vm0, %v1258_v0 }
  0x4a   :  { %1028 = vmatmul.mubr.bf16.gmra.mrb[20].mxu0 %v1143_v19  ;;  %1080 = vmatmul.mubr.bf16.gmra.mrb[20].mxu1 %v1144_v20 }
  0x4b   :  { %1031 = vmatprep.mubr.msk.bf16.mxu0 %vm1259_vm0, %v1258_v0  ;;  %1083 = vmatprep.mubr.msk.bf16.mxu1 %vm1259_vm0, %v1258_v0 }
  0x52   :  { %1032 = vmatmul.mubr.bf16.gmra.mrb[24].mxu0 %v1145_v21  ;;  %1084 = vmatmul.mubr.bf16.gmra.mrb[24].mxu1 %v1146_v22 }
  0x53   :  { %1035 = vmatprep.mubr.msk.bf16.mxu0 %vm1259_vm0, %v1258_v0  ;;  %1087 = vmatprep.mubr.msk.bf16.mxu1 %vm1259_vm0, %v1258_v0 }
  0x5a   :  { %1036 = vmatmul.mubr.bf16.gmra.mrb[28].mxu0 %v1147_v23  ;;  %1088 = vmatmul.mubr.bf16.gmra.mrb[28].mxu1 %v1148_v24 }
  0x5b   :  { %1039 = vmatprep.mubr.msk.bf16.mxu0 %vm1259_vm0, %v1258_v0  ;;  %1091 = vmatprep.mubr.msk.bf16.mxu1 %vm1259_vm0, %v1258_v0 }
  0x62   :  { %1040 = vmatmul.mubr.bf16.gmra.mrb[32].mxu0 %v1149_v25  ;;  %1092 = vmatmul.mubr.bf16.gmra.mrb[32].mxu1 %v1150_v26 }
  0x63   :  { %1043 = vmatprep.mubr.msk.bf16.mxu0 %vm1259_vm0, %v1258_v0  ;;  %1095 = vmatprep.mubr.msk.bf16.mxu1 %vm1259_vm0, %v1258_v0 }
  0x6a   :  { %1044 = vmatmul.mubr.bf16.gmra.mrb[36].mxu0 %v1151_v27  ;;  %1096 = vmatmul.mubr.bf16.gmra.mrb[36].mxu1 %v1152_v28 }
  0x6b   :  { %1047 = vmatprep.mubr.msk.bf16.mxu0 %vm1259_vm0, %v1258_v0  ;;  %1099 = vmatprep.mubr.msk.bf16.mxu1 %vm1259_vm0, %v1258_v0 }
  0x72   :  { %1048 = vmatmul.mubr.bf16.gmra.mrb[40].mxu0 %v1153_v29  ;;  %1100 = vmatmul.mubr.bf16.gmra.mrb[40].mxu1 %v1154_v30 }
  0x73   :  { %1051 = vmatprep.mubr.msk.bf16.mxu0 %vm1259_vm0, %v1258_v0  ;;  %1103 = vmatprep.mubr.msk.bf16.mxu1 %vm1259_vm0, %v1258_v0 }
  0x7a   :  { %1052 = vmatmul.mubr.bf16.gmra.mrb[44].mxu0 %v1155_v31  ;;  %1104 = vmatmul.mubr.bf16.gmra.mrb[44].mxu1 %v1156_v32 }
  0x7b   :  { %1055 = vmatprep.mubr.msk.bf16.mxu0 %vm1259_vm0, %v1258_v0 }
  0x82   :  { %1056 = vmatmul.mubr.bf16.gmra.mrb[48].mxu0 %v1157_v33 }
  0xf5   :  { %v320_v35 = vpop.f32.mrb[0].mxu0  ;;  %v424_v36 = vpop.f32.mrb[0].mxu1 }
  0xf6   :  { %v321_v37 = vadd.f32 %v1448_v34, %v320_v35  ;;  %v1009_v38 = vpop.f32.mrb[1].mxu0  ;;  %v425_v39 = vadd.f32 %v1448_v34, %v424_v36  ;;  %v1061_v40 = vpop.f32.mrb[1].mxu1 }
  0xf7   :  { %v323_v41 = vpop.f32.mrb[2].mxu0  ;;  %v427_v42 = vpop.f32.mrb[2].mxu1 }
  0xf8   :  { %1158 = vtanh.f32 %v321_v37  ;;  %v324_v43 = vadd.f32 %v1448_v34, %v323_v41  ;;  %v1010_v44 = vpop.f32.mrb[3].mxu0  ;;  %v428_v45 = vadd.f32 %v1448_v34, %v427_v42  ;;  %v1062_v46 = vpop.f32.mrb[3].mxu1 }
  0xf9   :  { %1160 = vtanh.f32 %v425_v39 }
  0xfa   :  { %1162 = vtanh.f32 %v324_v43 }
  0xfb   :  { %1164 = vtanh.f32 %v428_v45 }
  0xfd   :  { %v328_v47 = vpop.f32.mrb[4].mxu0  ;;  %v432_v48 = vpop.f32.mrb[4].mxu1 }
  0xfe   :  { %v329_v49 = vadd.f32 %v1448_v34, %v328_v47  ;;  %v1013_v50 = vpop.f32.mrb[5].mxu0  ;;  %v433_v51 = vadd.f32 %v1448_v34, %v432_v48  ;;  %v1065_v52 = vpop.f32.mrb[5].mxu1 }
  0xff   :  { %v331_v53 = vpop.f32.mrb[6].mxu0  ;;  %v435_v54 = vpop.f32.mrb[6].mxu1 }
 0x100   :  { %1166 = vtanh.f32 %v329_v49  ;;  %v332_v55 = vadd.f32 %v1448_v34, %v331_v53  ;;  %v1014_v56 = vpop.f32.mrb[7].mxu0  ;;  %v436_v57 = vadd.f32 %v1448_v34, %v435_v54  ;;  %v1066_v58 = vpop.f32.mrb[7].mxu1 }
 0x101   :  { %1168 = vtanh.f32 %v433_v51 }
 0x102   :  { %v1159_v59 = vpop.eup %1158  ;;  %1170 = vtanh.f32 %v332_v55 }
 0x103   :  { %v1161_v60 = vpop.eup %1160  ;;  %v908_v61 = vpack.c.bf16 %v1159_v59, %v1159_v59  ;;  %1172 = vtanh.f32 %v436_v57 }
 0x104   :  { %v1163_v62 = vpop.eup %1162  ;;  %v934_v63 = vpack.c.bf16 %v1161_v60, %v1161_v60 }
 0x105   :  { %v1165_v0 = vpop.eup %1164  ;;  %770 = vst.msk [vmem:[%s1703_s3] sm:$0xf] %vm769_vm1, %v908_v61  ;;  %v909_v1 = vpack.c.bf16 %v1163_v62, %v1163_v62  ;;  %v336_v2 = vpop.f32.mrb[8].mxu0 }
 0x106   :  { %v440_v3 = vpop.f32.mrb[8].mxu1  ;;  %796 = vst.msk [vmem:[%s1703_s3 + $0x68] sm:$0xf] %vm769_vm1, %v934_v63  ;;  %v935_v4 = vpack.c.bf16 %v1165_v0, %v1165_v0  ;;  %v337_v5 = vadd.f32 %v1448_v34, %v336_v2  ;;  %v1017_v6 = vpop.f32.mrb[9].mxu0 }
 0x107   :  { %v441_v7 = vadd.f32 %v1448_v34, %v440_v3  ;;  %v1069_v8 = vpop.f32.mrb[9].mxu1  ;;  %771 = vst.msk [vmem:[%s1703_s3 + $0x4] sm:$0xf] %vm769_vm1, %v909_v1  ;;  %v339_v9 = vpop.f32.mrb[10].mxu0 }
 0x108   :  { %v443_v10 = vpop.f32.mrb[10].mxu1  ;;  %797 = vst.msk [vmem:[%s1703_s3 + $0x6c] sm:$0xf] %vm769_vm1, %v935_v4  ;;  %1174 = vtanh.f32 %v337_v5  ;;  %v340_v11 = vadd.f32 %v1448_v34, %v339_v9  ;;  %v1018_v12 = vpop.f32.mrb[11].mxu0 }
 0x109   :  { %v444_v13 = vadd.f32 %v1448_v34, %v443_v10  ;;  %v1070_v14 = vpop.f32.mrb[11].mxu1  ;;  %1176 = vtanh.f32 %v441_v7 }
 0x10a   :  { %v1167_v15 = vpop.eup %1166  ;;  %1178 = vtanh.f32 %v340_v11 }
 0x10b   :  { %v1169_v16 = vpop.eup %1168  ;;  %v910_v17 = vpack.c.bf16 %v1167_v15, %v1167_v15  ;;  %1180 = vtanh.f32 %v444_v13 }
 0x10c   :  { %v1171_v18 = vpop.eup %1170  ;;  %v936_v19 = vpack.c.bf16 %v1169_v16, %v1169_v16 }
 0x10d   :  { %v1173_v20 = vpop.eup %1172  ;;  %772 = vst.msk [vmem:[%s1703_s3 + $0x8] sm:$0xf] %vm769_vm1, %v910_v17  ;;  %v911_v21 = vpack.c.bf16 %v1171_v18, %v1171_v18  ;;  %v344_v22 = vpop.f32.mrb[12].mxu0 }
 0x10e   :  { %v448_v23 = vpop.f32.mrb[12].mxu1  ;;  %798 = vst.msk [vmem:[%s1703_s3 + $0x70] sm:$0xf] %vm769_vm1, %v936_v19  ;;  %v937_v24 = vpack.c.bf16 %v1173_v20, %v1173_v20  ;;  %v345_v25 = vadd.f32 %v1448_v34, %v344_v22  ;;  %v1021_v26 = vpop.f32.mrb[13].mxu0 }
 0x10f   :  { %v449_v27 = vadd.f32 %v1448_v34, %v448_v23  ;;  %v1073_v28 = vpop.f32.mrb[13].mxu1  ;;  %773 = vst.msk [vmem:[%s1703_s3 + $0xc] sm:$0xf] %vm769_vm1, %v911_v21  ;;  %v347_v29 = vpop.f32.mrb[14].mxu0 }
 0x110   :  { %v451_v30 = vpop.f32.mrb[14].mxu1  ;;  %799 = vst.msk [vmem:[%s1703_s3 + $0x74] sm:$0xf] %vm769_vm1, %v937_v24  ;;  %1182 = vtanh.f32 %v345_v25  ;;  %v348_v31 = vadd.f32 %v1448_v34, %v347_v29  ;;  %v1022_v32 = vpop.f32.mrb[15].mxu0 }
 0x111   :  { %v452_v33 = vadd.f32 %v1448_v34, %v451_v30  ;;  %v1074_v35 = vpop.f32.mrb[15].mxu1  ;;  %1184 = vtanh.f32 %v449_v27 }
 0x112   :  { %v1175_v36 = vpop.eup %1174  ;;  %1186 = vtanh.f32 %v348_v31 }
 0x113   :  { %v1177_v37 = vpop.eup %1176  ;;  %v912_v38 = vpack.c.bf16 %v1175_v36, %v1175_v36  ;;  %1188 = vtanh.f32 %v452_v33 }
 0x114   :  { %v1179_v39 = vpop.eup %1178  ;;  %v938_v40 = vpack.c.bf16 %v1177_v37, %v1177_v37 }
 0x115   :  { %v1181_v41 = vpop.eup %1180  ;;  %774 = vst.msk [vmem:[%s1703_s3 + $0x10] sm:$0xf] %vm769_vm1, %v912_v38  ;;  %v913_v42 = vpack.c.bf16 %v1179_v39, %v1179_v39  ;;  %v352_v43 = vpop.f32.mrb[16].mxu0 }
 0x116   :  { %v456_v44 = vpop.f32.mrb[16].mxu1  ;;  %800 = vst.msk [vmem:[%s1703_s3 + $0x78] sm:$0xf] %vm769_vm1, %v938_v40  ;;  %v939_v45 = vpack.c.bf16 %v1181_v41, %v1181_v41  ;;  %v353_v46 = vadd.f32 %v1448_v34, %v352_v43  ;;  %v1025_v47 = vpop.f32.mrb[17].mxu0 }
 0x117   :  { %v457_v48 = vadd.f32 %v1448_v34, %v456_v44  ;;  %v1077_v49 = vpop.f32.mrb[17].mxu1  ;;  %775 = vst.msk [vmem:[%s1703_s3 + $0x14] sm:$0xf] %vm769_vm1, %v913_v42  ;;  %v355_v50 = vpop.f32.mrb[18].mxu0 }
 0x118   :  { %v459_v51 = vpop.f32.mrb[18].mxu1  ;;  %801 = vst.msk [vmem:[%s1703_s3 + $0x7c] sm:$0xf] %vm769_vm1, %v939_v45  ;;  %1190 = vtanh.f32 %v353_v46  ;;  %v356_v52 = vadd.f32 %v1448_v34, %v355_v50  ;;  %v1026_v53 = vpop.f32.mrb[19].mxu0 }
 0x119   :  { %v460_v54 = vadd.f32 %v1448_v34, %v459_v51  ;;  %v1078_v55 = vpop.f32.mrb[19].mxu1  ;;  %1192 = vtanh.f32 %v457_v48 }
 0x11a   :  { %v1183_v56 = vpop.eup %1182  ;;  %1194 = vtanh.f32 %v356_v52 }
 0x11b   :  { %v1185_v57 = vpop.eup %1184  ;;  %v914_v58 = vpack.c.bf16 %v1183_v56, %v1183_v56  ;;  %1196 = vtanh.f32 %v460_v54 }
 0x11c   :  { %v1187_v59 = vpop.eup %1186  ;;  %v940_v60 = vpack.c.bf16 %v1185_v57, %v1185_v57 }
 0x11d   :  { %v1189_v61 = vpop.eup %1188  ;;  %776 = vst.msk [vmem:[%s1703_s3 + $0x18] sm:$0xf] %vm769_vm1, %v914_v58  ;;  %v915_v62 = vpack.c.bf16 %v1187_v59, %v1187_v59  ;;  %v360_v63 = vpop.f32.mrb[20].mxu0 }
 0x11e   :  { %v464_v0 = vpop.f32.mrb[20].mxu1  ;;  %802 = vst.msk [vmem:[%s1703_s3 + $0x80] sm:$0xf] %vm769_vm1, %v940_v60  ;;  %v941_v1 = vpack.c.bf16 %v1189_v61, %v1189_v61  ;;  %v361_v2 = vadd.f32 %v1448_v34, %v360_v63  ;;  %v1029_v3 = vpop.f32.mrb[21].mxu0 }
 0x11f   :  { %v465_v4 = vadd.f32 %v1448_v34, %v464_v0  ;;  %v1081_v5 = vpop.f32.mrb[21].mxu1  ;;  %777 = vst.msk [vmem:[%s1703_s3 + $0x1c] sm:$0xf] %vm769_vm1, %v915_v62  ;;  %v363_v6 = vpop.f32.mrb[22].mxu0 }
 0x120   :  { %v467_v7 = vpop.f32.mrb[22].mxu1  ;;  %803 = vst.msk [vmem:[%s1703_s3 + $0x84] sm:$0xf] %vm769_vm1, %v941_v1  ;;  %1198 = vtanh.f32 %v361_v2  ;;  %v364_v8 = vadd.f32 %v1448_v34, %v363_v6  ;;  %v1030_v9 = vpop.f32.mrb[23].mxu0 }
 0x121   :  { %v468_v10 = vadd.f32 %v1448_v34, %v467_v7  ;;  %v1082_v11 = vpop.f32.mrb[23].mxu1  ;;  %1200 = vtanh.f32 %v465_v4 }
 0x122   :  { %v1191_v12 = vpop.eup %1190  ;;  %1202 = vtanh.f32 %v364_v8 }
 0x123   :  { %v1193_v13 = vpop.eup %1192  ;;  %v916_v14 = vpack.c.bf16 %v1191_v12, %v1191_v12  ;;  %1204 = vtanh.f32 %v468_v10 }
 0x124   :  { %v1195_v15 = vpop.eup %1194  ;;  %v942_v16 = vpack.c.bf16 %v1193_v13, %v1193_v13 }
 0x125   :  { %v1197_v17 = vpop.eup %1196  ;;  %778 = vst.msk [vmem:[%s1703_s3 + $0x20] sm:$0xf] %vm769_vm1, %v916_v14  ;;  %v917_v18 = vpack.c.bf16 %v1195_v15, %v1195_v15  ;;  %v368_v19 = vpop.f32.mrb[24].mxu0 }
 0x126   :  { %v472_v20 = vpop.f32.mrb[24].mxu1  ;;  %804 = vst.msk [vmem:[%s1703_s3 + $0x88] sm:$0xf] %vm769_vm1, %v942_v16  ;;  %v943_v21 = vpack.c.bf16 %v1197_v17, %v1197_v17  ;;  %v369_v22 = vadd.f32 %v1448_v34, %v368_v19  ;;  %v1033_v23 = vpop.f32.mrb[25].mxu0 }
 0x127   :  { %v473_v24 = vadd.f32 %v1448_v34, %v472_v20  ;;  %v1085_v25 = vpop.f32.mrb[25].mxu1  ;;  %779 = vst.msk [vmem:[%s1703_s3 + $0x24] sm:$0xf] %vm769_vm1, %v917_v18  ;;  %v371_v26 = vpop.f32.mrb[26].mxu0 }
 0x128   :  { %v475_v27 = vpop.f32.mrb[26].mxu1  ;;  %805 = vst.msk [vmem:[%s1703_s3 + $0x8c] sm:$0xf] %vm769_vm1, %v943_v21  ;;  %1206 = vtanh.f32 %v369_v22  ;;  %v372_v28 = vadd.f32 %v1448_v34, %v371_v26  ;;  %v1034_v29 = vpop.f32.mrb[27].mxu0 }
 0x129   :  { %v476_v30 = vadd.f32 %v1448_v34, %v475_v27  ;;  %v1086_v31 = vpop.f32.mrb[27].mxu1  ;;  %1208 = vtanh.f32 %v473_v24 }
 0x12a   :  { %v1199_v32 = vpop.eup %1198  ;;  %1210 = vtanh.f32 %v372_v28 }
 0x12b   :  { %v1201_v33 = vpop.eup %1200  ;;  %v918_v35 = vpack.c.bf16 %v1199_v32, %v1199_v32  ;;  %1212 = vtanh.f32 %v476_v30 }
 0x12c   :  { %v1203_v36 = vpop.eup %1202  ;;  %v944_v37 = vpack.c.bf16 %v1201_v33, %v1201_v33 }
 0x12d   :  { %v1205_v38 = vpop.eup %1204  ;;  %780 = vst.msk [vmem:[%s1703_s3 + $0x28] sm:$0xf] %vm769_vm1, %v918_v35  ;;  %v919_v39 = vpack.c.bf16 %v1203_v36, %v1203_v36  ;;  %v376_v40 = vpop.f32.mrb[28].mxu0 }
 0x12e   :  { %v480_v41 = vpop.f32.mrb[28].mxu1  ;;  %806 = vst.msk [vmem:[%s1703_s3 + $0x90] sm:$0xf] %vm769_vm1, %v944_v37  ;;  %v945_v42 = vpack.c.bf16 %v1205_v38, %v1205_v38  ;;  %v377_v43 = vadd.f32 %v1448_v34, %v376_v40  ;;  %v1037_v44 = vpop.f32.mrb[29].mxu0 }
 0x12f   :  { %v481_v45 = vadd.f32 %v1448_v34, %v480_v41  ;;  %v1089_v46 = vpop.f32.mrb[29].mxu1  ;;  %781 = vst.msk [vmem:[%s1703_s3 + $0x2c] sm:$0xf] %vm769_vm1, %v919_v39  ;;  %v379_v47 = vpop.f32.mrb[30].mxu0 }
 0x130   :  { %v483_v48 = vpop.f32.mrb[30].mxu1  ;;  %807 = vst.msk [vmem:[%s1703_s3 + $0x94] sm:$0xf] %vm769_vm1, %v945_v42  ;;  %1214 = vtanh.f32 %v377_v43  ;;  %v380_v49 = vadd.f32 %v1448_v34, %v379_v47  ;;  %v1038_v50 = vpop.f32.mrb[31].mxu0 }
 0x131   :  { %v484_v51 = vadd.f32 %v1448_v34, %v483_v48  ;;  %v1090_v52 = vpop.f32.mrb[31].mxu1  ;;  %1216 = vtanh.f32 %v481_v45 }
 0x132   :  { %v1207_v53 = vpop.eup %1206  ;;  %1218 = vtanh.f32 %v380_v49 }
 0x133   :  { %v1209_v54 = vpop.eup %1208  ;;  %v920_v55 = vpack.c.bf16 %v1207_v53, %v1207_v53  ;;  %1220 = vtanh.f32 %v484_v51 }
 0x134   :  { %v1211_v56 = vpop.eup %1210  ;;  %v946_v57 = vpack.c.bf16 %v1209_v54, %v1209_v54 }
 0x135   :  { %v1213_v58 = vpop.eup %1212  ;;  %782 = vst.msk [vmem:[%s1703_s3 + $0x30] sm:$0xf] %vm769_vm1, %v920_v55  ;;  %v921_v59 = vpack.c.bf16 %v1211_v56, %v1211_v56  ;;  %v384_v60 = vpop.f32.mrb[32].mxu0 }
 0x136   :  { %v488_v61 = vpop.f32.mrb[32].mxu1  ;;  %808 = vst.msk [vmem:[%s1703_s3 + $0x98] sm:$0xf] %vm769_vm1, %v946_v57  ;;  %v947_v62 = vpack.c.bf16 %v1213_v58, %v1213_v58  ;;  %v385_v63 = vadd.f32 %v1448_v34, %v384_v60  ;;  %v1041_v0 = vpop.f32.mrb[33].mxu0 }
 0x137   :  { %v489_v1 = vadd.f32 %v1448_v34, %v488_v61  ;;  %v1093_v2 = vpop.f32.mrb[33].mxu1  ;;  %783 = vst.msk [vmem:[%s1703_s3 + $0x34] sm:$0xf] %vm769_vm1, %v921_v59  ;;  %v387_v3 = vpop.f32.mrb[34].mxu0 }
 0x138   :  { %v491_v4 = vpop.f32.mrb[34].mxu1  ;;  %809 = vst.msk [vmem:[%s1703_s3 + $0x9c] sm:$0xf] %vm769_vm1, %v947_v62  ;;  %1222 = vtanh.f32 %v385_v63  ;;  %v388_v5 = vadd.f32 %v1448_v34, %v387_v3  ;;  %v1042_v6 = vpop.f32.mrb[35].mxu0 }
 0x139   :  { %v492_v7 = vadd.f32 %v1448_v34, %v491_v4  ;;  %v1094_v8 = vpop.f32.mrb[35].mxu1  ;;  %1224 = vtanh.f32 %v489_v1 }
 0x13a   :  { %v1215_v9 = vpop.eup %1214  ;;  %1226 = vtanh.f32 %v388_v5 }
 0x13b   :  { %v1217_v10 = vpop.eup %1216  ;;  %v922_v11 = vpack.c.bf16 %v1215_v9, %v1215_v9  ;;  %1228 = vtanh.f32 %v492_v7 }
 0x13c   :  { %v1219_v12 = vpop.eup %1218  ;;  %v948_v13 = vpack.c.bf16 %v1217_v10, %v1217_v10 }
 0x13d   :  { %v1221_v14 = vpop.eup %1220  ;;  %784 = vst.msk [vmem:[%s1703_s3 + $0x38] sm:$0xf] %vm769_vm1, %v922_v11  ;;  %v923_v15 = vpack.c.bf16 %v1219_v12, %v1219_v12  ;;  %v392_v16 = vpop.f32.mrb[36].mxu0 }
 0x13e   :  { %v496_v17 = vpop.f32.mrb[36].mxu1  ;;  %810 = vst.msk [vmem:[%s1703_s3 + $0xa0] sm:$0xf] %vm769_vm1, %v948_v13  ;;  %v949_v18 = vpack.c.bf16 %v1221_v14, %v1221_v14  ;;  %v393_v19 = vadd.f32 %v1448_v34, %v392_v16  ;;  %v1045_v20 = vpop.f32.mrb[37].mxu0 }
 0x13f   :  { %v497_v21 = vadd.f32 %v1448_v34, %v496_v17  ;;  %v1097_v22 = vpop.f32.mrb[37].mxu1  ;;  %785 = vst.msk [vmem:[%s1703_s3 + $0x3c] sm:$0xf] %vm769_vm1, %v923_v15  ;;  %v395_v23 = vpop.f32.mrb[38].mxu0 }
 0x140   :  { %v499_v24 = vpop.f32.mrb[38].mxu1  ;;  %811 = vst.msk [vmem:[%s1703_s3 + $0xa4] sm:$0xf] %vm769_vm1, %v949_v18  ;;  %1230 = vtanh.f32 %v393_v19  ;;  %v396_v25 = vadd.f32 %v1448_v34, %v395_v23  ;;  %v1046_v26 = vpop.f32.mrb[39].mxu0 }
 0x141   :  { %v500_v27 = vadd.f32 %v1448_v34, %v499_v24  ;;  %v1098_v28 = vpop.f32.mrb[39].mxu1  ;;  %1232 = vtanh.f32 %v497_v21 }
 0x142   :  { %v1223_v29 = vpop.eup %1222  ;;  %1234 = vtanh.f32 %v396_v25 }
 0x143   :  { %v1225_v30 = vpop.eup %1224  ;;  %v924_v31 = vpack.c.bf16 %v1223_v29, %v1223_v29  ;;  %1236 = vtanh.f32 %v500_v27 }
 0x144   :  { %v1227_v32 = vpop.eup %1226  ;;  %v950_v33 = vpack.c.bf16 %v1225_v30, %v1225_v30 }
 0x145   :  { %v1229_v35 = vpop.eup %1228  ;;  %786 = vst.msk [vmem:[%s1703_s3 + $0x40] sm:$0xf] %vm769_vm1, %v924_v31  ;;  %v925_v36 = vpack.c.bf16 %v1227_v32, %v1227_v32  ;;  %v400_v37 = vpop.f32.mrb[40].mxu0 }
 0x146   :  { %v504_v38 = vpop.f32.mrb[40].mxu1  ;;  %812 = vst.msk [vmem:[%s1703_s3 + $0xa8] sm:$0xf] %vm769_vm1, %v950_v33  ;;  %v951_v39 = vpack.c.bf16 %v1229_v35, %v1229_v35  ;;  %v401_v40 = vadd.f32 %v1448_v34, %v400_v37  ;;  %v1049_v41 = vpop.f32.mrb[41].mxu0 }
 0x147   :  { %v505_v42 = vadd.f32 %v1448_v34, %v504_v38  ;;  %v1101_v43 = vpop.f32.mrb[41].mxu1  ;;  %787 = vst.msk [vmem:[%s1703_s3 + $0x44] sm:$0xf] %vm769_vm1, %v925_v36  ;;  %v403_v44 = vpop.f32.mrb[42].mxu0 }
 0x148   :  { %v507_v45 = vpop.f32.mrb[42].mxu1  ;;  %813 = vst.msk [vmem:[%s1703_s3 + $0xac] sm:$0xf] %vm769_vm1, %v951_v39  ;;  %1238 = vtanh.f32 %v401_v40  ;;  %v404_v46 = vadd.f32 %v1448_v34, %v403_v44  ;;  %v1050_v47 = vpop.f32.mrb[43].mxu0 }
 0x149   :  { %v508_v48 = vadd.f32 %v1448_v34, %v507_v45  ;;  %v1102_v49 = vpop.f32.mrb[43].mxu1  ;;  %1240 = vtanh.f32 %v505_v42 }
 0x14a   :  { %v1231_v50 = vpop.eup %1230  ;;  %1242 = vtanh.f32 %v404_v46 }
 0x14b   :  { %v1233_v51 = vpop.eup %1232  ;;  %v926_v52 = vpack.c.bf16 %v1231_v50, %v1231_v50  ;;  %1244 = vtanh.f32 %v508_v48 }
 0x14c   :  { %v1235_v53 = vpop.eup %1234  ;;  %v952_v54 = vpack.c.bf16 %v1233_v51, %v1233_v51 }
 0x14d   :  { %v1237_v55 = vpop.eup %1236  ;;  %788 = vst.msk [vmem:[%s1703_s3 + $0x48] sm:$0xf] %vm769_vm1, %v926_v52  ;;  %v927_v56 = vpack.c.bf16 %v1235_v53, %v1235_v53  ;;  %v408_v57 = vpop.f32.mrb[44].mxu0 }
 0x14e   :  { %v512_v58 = vpop.f32.mrb[44].mxu1  ;;  %814 = vst.msk [vmem:[%s1703_s3 + $0xb0] sm:$0xf] %vm769_vm1, %v952_v54  ;;  %v953_v59 = vpack.c.bf16 %v1237_v55, %v1237_v55  ;;  %v409_v60 = vadd.f32 %v1448_v34, %v408_v57  ;;  %v1053_v61 = vpop.f32.mrb[45].mxu0 }
 0x14f   :  { %v513_v62 = vadd.f32 %v1448_v34, %v512_v58  ;;  %v1105_v63 = vpop.f32.mrb[45].mxu1  ;;  %789 = vst.msk [vmem:[%s1703_s3 + $0x4c] sm:$0xf] %vm769_vm1, %v927_v56  ;;  %v411_v0 = vpop.f32.mrb[46].mxu0 }
 0x150   :  { %v515_v1 = vpop.f32.mrb[46].mxu1  ;;  %815 = vst.msk [vmem:[%s1703_s3 + $0xb4] sm:$0xf] %vm769_vm1, %v953_v59  ;;  %1246 = vtanh.f32 %v409_v60  ;;  %v412_v2 = vadd.f32 %v1448_v34, %v411_v0  ;;  %v1054_v3 = vpop.f32.mrb[47].mxu0 }
 0x151   :  { %v516_v4 = vadd.f32 %v1448_v34, %v515_v1  ;;  %v1106_v5 = vpop.f32.mrb[47].mxu1  ;;  %1248 = vtanh.f32 %v513_v62 }
 0x152   :  { %v1239_v6 = vpop.eup %1238  ;;  %1250 = vtanh.f32 %v412_v2 }
 0x153   :  { %v1241_v7 = vpop.eup %1240  ;;  %v928_v8 = vpack.c.bf16 %v1239_v6, %v1239_v6  ;;  %1252 = vtanh.f32 %v516_v4 }
 0x154   :  { %v1243_v9 = vpop.eup %1242  ;;  %v954_v10 = vpack.c.bf16 %v1241_v7, %v1241_v7 }
 0x155   :  { %v1245_v11 = vpop.eup %1244  ;;  %790 = vst.msk [vmem:[%s1703_s3 + $0x50] sm:$0xf] %vm769_vm1, %v928_v8  ;;  %v929_v12 = vpack.c.bf16 %v1243_v9, %v1243_v9  ;;  %v416_v13 = vpop.f32.mrb[48].mxu0 }
 0x156   :  { %816 = vst.msk [vmem:[%s1703_s3 + $0xb8] sm:$0xf] %vm769_vm1, %v954_v10  ;;  %v955_v14 = vpack.c.bf16 %v1245_v11, %v1245_v11  ;;  %v417_v15 = vadd.f32 %v1448_v34, %v416_v13  ;;  %v1057_v16 = vpop.f32.mrb[49].mxu0 }
 0x157   :  { %791 = vst.msk [vmem:[%s1703_s3 + $0x54] sm:$0xf] %vm769_vm1, %v929_v12  ;;  %v419_v17 = vpop.f32.mrb[50].mxu0 }
 0x158   :  { %817 = vst.msk [vmem:[%s1703_s3 + $0xbc] sm:$0xf] %vm769_vm1, %v955_v14  ;;  %1254 = vtanh.f32 %v417_v15  ;;  %v420_v18 = vadd.f32 %v1448_v34, %v419_v17  ;;  %v1058_v19 = vpop.f32.mrb[51].mxu0 }
 0x15a   :  { %v1247_v20 = vpop.eup %1246  ;;  %1256 = vtanh.f32 %v420_v18 }
 0x15b   :  { %v1249_v21 = vpop.eup %1248  ;;  %v930_v22 = vpack.c.bf16 %v1247_v20, %v1247_v20 }
 0x15c   :  { %v1251_v23 = vpop.eup %1250  ;;  %v956_v24 = vpack.c.bf16 %v1249_v21, %v1249_v21 }
 0x15d   :  { %v1253_v25 = vpop.eup %1252  ;;  %792 = vst.msk [vmem:[%s1703_s3 + $0x58] sm:$0xf] %vm769_vm1, %v930_v22  ;;  %v931_v26 = vpack.c.bf16 %v1251_v23, %v1251_v23 }
 0x15e   :  { %818 = vst.msk [vmem:[%s1703_s3 + $0xc0] sm:$0xf] %vm769_vm1, %v956_v24  ;;  %v957_v34 = vpack.c.bf16 %v1253_v25, %v1253_v25 }
 0x15f   :  { %793 = vst.msk [vmem:[%s1703_s3 + $0x5c] sm:$0xf] %vm769_vm1, %v931_v26 }
 0x160   :  { %819 = vst.msk [vmem:[%s1703_s3 + $0xc4] sm:$0xf] %vm769_vm1, %v957_v34 }
 0x162   :  { %v1255_v27 = vpop.eup %1254 }
 0x163   :  { %v932_v28 = vpack.c.bf16 %v1255_v27, %v1255_v27 }
 0x164   :  { %v1257_v29 = vpop.eup %1256 }
 0x165   :  { %794 = vst.msk [vmem:[%s1703_s3 + $0x60] sm:$0xf] %vm769_vm1, %v932_v28  ;;  %v933_v30 = vpack.c.bf16 %v1257_v29, %v1257_v29 }
 0x167   :  { %795 = vst.msk [vmem:[%s1703_s3 + $0x64] sm:$0xf] %vm769_vm1, %v933_v30 }

</bundles_post_ra>
